<compile_context>
chip_gen: v6e
topology: v6e:2x2x1
jax: 0.10.0
libtpu: 0.0.40
codegen_flags: <defaults>
</compile_context>

<pallas_src>
import functools

import jax
import jax.numpy as jnp
from jax.experimental import pallas as pl
from jax.experimental.pallas import tpu as pltpu


def _round_up(x, m):
    return ((x + m - 1) // m) * m


def _affine_sigmoid_store(prod, b_ref, o_ref):
    """Shared epilogue: ONE reduce, ONE bias add, ONE sigmoid, ONE store.

    prod : (D, TR) float32, latent dim on sublanes, batch on lanes.
    """
    # Sublane reduction over the latent axis -> (1, TR), still lane-dense.
    logits = jnp.sum(prod, axis=0, keepdims=True) + b_ref[0, 0]
    # Exact sigmoid (matches jax.nn.sigmoid to within ulps).  The approx EUP
    # reciprocal is rejected here to preserve the 1e-5 tolerance; the single
    # (1, TR) exp/divide is negligible now that the epilogue is merged.
    rating = 1.0 / (1.0 + jnp.exp(-logits))
    # Lane-dense output block: last dim = tile_rows (multiple of 128) so the
    # store is an unmasked full-lane vst.
    o_ref[...] = rating.astype(o_ref.dtype)


def _gmf_fused_kernel(uidx_ref, iidx_ref, ut_ref, it_ref, w_ref, b_ref, o_ref,
                      *, num_users, num_items):
    """Fused-gather GMF tile.

    uidx_ref, iidx_ref : (1, TR) int32  batch-tile of indices (batch on lanes)
    ut_ref             : (D, U)  f32    user table, transposed, VMEM-resident
    it_ref             : (D, I)  f32    item table, transposed, VMEM-resident
    w_ref              : (D, 1)  f32    affine weight column
    b_ref              : (1, 1)  f32    affine bias (SMEM scalar)
    o_ref              : (1, TR) f32    sigmoid(logits) for this tile
    """
    uidx = uidx_ref[...]                       # (1, TR) int32
    iidx = iidx_ref[...]
    D = ut_ref.shape[0]
    TR = uidx.shape[1]

    # In-kernel gather: tables live in VMEM for the whole grid (constant
    # index_map), so no per-batch-row HBM traffic.  One vectorized select per
    # table row; exact f32 (no MXU / bf16 rounding).  Static unroll is guarded
    # by max_fused_table_rows in the wrapper.
    u_emb = jnp.zeros((D, TR), jnp.float32)
    i_emb = jnp.zeros((D, TR), jnp.float32)
    for r in range(num_users):
        u_emb = jnp.where(uidx == r, ut_ref[:, r:r + 1], u_emb)
    for r in range(num_items):
        i_emb = jnp.where(iidx == r, it_ref[:, r:r + 1], i_emb)

    prod = u_emb * i_emb * w_ref[...]          # (D, TR) full-lane VPU work
    _affine_sigmoid_store(prod, b_ref, o_ref)


def _gmf_embT_kernel(u_ref, i_ref, w_ref, b_ref, o_ref):
    """Fallback tile: pre-gathered, transposed embeddings (D, TR)."""
    prod = u_ref[...] * i_ref[...] * w_ref[...]
    _affine_sigmoid_store(prod, b_ref, o_ref)


def gmf_forward(user_indices, item_indices, user_table, item_table, w, b,
                *, max_tile_rows=16384, max_fused_table_rows=512):
    """GMF forward: rating = sigmoid(Linear(user_emb * item_emb)) -> (B, 1)."""
    B = user_indices.shape[0]
    U, D = user_table.shape
    I = item_table.shape[0]

    # ---- batch tiling: sized from the actual batch, padding bounded -------
    row_align = 128                              # lane width: unmasked stores
    num_tiles = max(1, pl.cdiv(B, max_tile_rows))
    if num_tiles == 1 and B >= 2 * row_align:
        num_tiles = 2                            # give both TCs work on v7x
    tile_rows = _round_up(pl.cdiv(B, num_tiles), row_align)
    b_pad = num_tiles * tile_rows

    w_col = jnp.reshape(w, (D, 1)).astype(jnp.float32)
    b_s = jnp.reshape(b, (1, 1)).astype(jnp.float32)

    # Pad the indices only (cheap); padded rows gather row 0 and are sliced
    # off before returning.
    ui = jnp.pad(user_indices.astype(jnp.int32), (0, b_pad - B)).reshape(1, b_pad)
    ii = jnp.pad(item_indices.astype(jnp.int32), (0, b_pad - B)).reshape(1, b_pad)

    idx_spec = pl.BlockSpec((1, tile_rows), lambda i: (0, i))
    out_spec = pl.BlockSpec((1, tile_rows), lambda i: (0, i))
    smem_spec = pl.BlockSpec(memory_space=pltpu.MemorySpace.SMEM)

    def _full(shape):                            # whole-array, fetched once
        return pl.BlockSpec(shape, lambda i: (0, 0))

    params = pltpu.CompilerParams(dimension_semantics=("parallel",))
    out_shape = jax.ShapeDtypeStruct((1, b_pad), jnp.float32)

    if U + I <= max_fused_table_rows:
        # Fused-gather path: whole (transposed) tables resident in VMEM.
        utT = user_table.astype(jnp.float32).T   # (D, U), tiny, once per call
        itT = item_table.astype(jnp.float32).T   # (D, I)
        kernel = functools.partial(_gmf_fused_kernel,
                                   num_users=U, num_items=I)
        out = pl.pallas_call(
            kernel,
            out_shape=out_shape,
            grid_spec=pltpu.PrefetchScalarGridSpec(
                num_scalar_prefetch=0,
                grid=(num_tiles,),
                in_specs=[idx_spec, idx_spec,
                          _full((D, U)), _full((D, I)), _full((D, 1)),
                          smem_spec],
                out_specs=out_spec),
            compiler_params=params,
        )(ui, ii, utT, itT, w_col, b_s)
    else:
        # TODO(synk): replace this XLA gather+transpose with in-kernel manual
        #             per-row DMA gathers from HBM-resident tables.
        uT = user_table.astype(jnp.float32)[ui[0]].T     # (D, b_pad)
        iT = item_table.astype(jnp.float32)[ii[0]].T     # (D, b_pad)
        emb_spec = pl.BlockSpec((D, tile_rows), lambda i: (0, i))
        out = pl.pallas_call(
            _gmf_embT_kernel,
            out_shape=out_shape,
            grid_spec=pltpu.PrefetchScalarGridSpec(
                num_scalar_prefetch=0,
                grid=(num_tiles,),
                in_specs=[emb_spec, emb_spec, _full((D, 1)), smem_spec],
                out_specs=out_spec),
            compiler_params=params,
        )(uT, iT, w_col, b_s)

    # (1, b_pad) in batch order; drop padding, return (B, 1).
    return out[0, :B].reshape(B, 1)


def reference_gmf(user_indices, item_indices, user_table, item_table, w, b):
    u = user_table[user_indices]
    it = item_table[item_indices]
    logits = (u * it) @ jnp.reshape(w, (-1, 1)) + jnp.reshape(b, (1, 1))
    return jax.nn.sigmoid(logits)


if __name__ == "__main__":
    # Config (synthetic, small): num_users=32, num_items=40, latent_dim=32
    num_users, num_items, latent_dim = 32, 40, 32
    batch = 8

    key = jax.random.PRNGKey(0)
    k_u, k_i, k_w, k_b, k_ui, k_ii = jax.random.split(key, 6)

    # Deterministic parameter init (shapes from GMF.__init__).
    user_table = jax.random.normal(k_u, (num_users, latent_dim), jnp.float32)
    item_table = jax.random.normal(k_i, (num_items, latent_dim), jnp.float32)
    # Linear(latent_dim -> 1): uniform(-1/sqrt(D), 1/sqrt(D)) like torch default.
    bound = 1.0 / (latent_dim ** 0.5)
    w = jax.random.uniform(k_w, (latent_dim, 1), jnp.float32, -bound, bound)
    b = jax.random.uniform(k_b, (1, 1), jnp.float32, -bound, bound)

    user_indices = jax.random.randint(k_ui, (batch,), 0, num_users, jnp.int32)
    item_indices = jax.random.randint(k_ii, (batch,), 0, num_items, jnp.int32)

    rating = gmf_forward(user_indices, item_indices,
                         user_table, item_table, w, b)
    rating = jax.block_until_ready(rating)

    expected = reference_gmf(user_indices, item_indices,
                             user_table, item_table, w, b)
    assert rating.shape == (batch, 1)
    assert jnp.allclose(rating, expected, atol=1e-5, rtol=1e-5)

    print("KERNEL_OK")
</pallas_src>

<mosaic_0001>
module attributes {stable_mosaic.version = 11 : i64} {
  func.func @_gmf_fused_kernel(%arg0: i32, %arg1: memref<1x128xi32, #tpu.memory_space<vmem>>, %arg2: memref<1x128xi32, #tpu.memory_space<vmem>>, %arg3: memref<32x32xf32, #tpu.memory_space<vmem>>, %arg4: memref<32x40xf32, #tpu.memory_space<vmem>>, %arg5: memref<32x1xf32, #tpu.memory_space<vmem>>, %arg6: memref<1x1xf32, #tpu.memory_space<smem>>, %arg7: memref<1x128xf32, #tpu.memory_space<vmem>>) attributes {dimension_semantics = [#tpu.dimension_semantics<parallel>], iteration_bounds = array<i64: 1>, scalar_prefetch = 0 : i64, scratch_operands = 0 : i64, tpu.core_type = #tpu.core_type<tc>, window_params = [{transform_indices = @transform_0, window_bounds = array<i64: 1, 128>}, {transform_indices = @transform_1, window_bounds = array<i64: 1, 128>}, {pipeline_mode = #tpu.pipeline_mode<synchronous>, transform_indices = @transform_2, window_bounds = array<i64: 32, 32>}, {pipeline_mode = #tpu.pipeline_mode<synchronous>, transform_indices = @transform_3, window_bounds = array<i64: 32, 40>}, {pipeline_mode = #tpu.pipeline_mode<synchronous>, transform_indices = @transform_4, window_bounds = array<i64: 32, 1>}, {transform_indices = @transform_5, window_bounds = array<i64: 1, 1>}, {transform_indices = @transform_6, window_bounds = array<i64: 1, 128>}]} {
    %c0 = arith.constant 0 : index
    %c0_0 = arith.constant 0 : index
    %0 = vector.load %arg1[%c0, %c0_0] : memref<1x128xi32, #tpu.memory_space<vmem>>, vector<1x128xi32>
    %c0_1 = arith.constant 0 : index
    %c0_2 = arith.constant 0 : index
    %1 = vector.load %arg2[%c0_1, %c0_2] : memref<1x128xi32, #tpu.memory_space<vmem>>, vector<1x128xi32>
    %cst = arith.constant 0.000000e+00 : f32
    %2 = vector.broadcast %cst : f32 to vector<32x128xf32>
    %cst_3 = arith.constant 0.000000e+00 : f32
    %3 = vector.broadcast %cst_3 : f32 to vector<32x128xf32>
    %c0_i32 = arith.constant 0 : i32
    %4 = vector.broadcast %c0_i32 : i32 to vector<1x128xi32>
    %5 = arith.cmpi eq, %0, %4 : vector<1x128xi32>
    %c0_4 = arith.constant 0 : index
    %c0_5 = arith.constant 0 : index
    %6 = vector.load %arg3[%c0_4, %c0_5] : memref<32x32xf32, #tpu.memory_space<vmem>>, vector<32x1xf32>
    %7 = vector.shape_cast %5 : vector<1x128xi1> to vector<1x128xi1>
    %8 = vector.broadcast %7 : vector<1x128xi1> to vector<32x128xi1>
    %9 = vector.shape_cast %6 : vector<32x1xf32> to vector<32x1xf32>
    %10 = vector.broadcast %9 : vector<32x1xf32> to vector<32x128xf32>
    %11 = arith.select %8, %10, %2 : vector<32x128xi1>, vector<32x128xf32>
    %c1_i32 = arith.constant 1 : i32
    %12 = vector.broadcast %c1_i32 : i32 to vector<1x128xi32>
    %13 = arith.cmpi eq, %0, %12 : vector<1x128xi32>
    %c0_6 = arith.constant 0 : index
    %c1 = arith.constant 1 : index
    %14 = vector.load %arg3[%c0_6, %c1] : memref<32x32xf32, #tpu.memory_space<vmem>>, vector<32x1xf32>
    %15 = vector.shape_cast %13 : vector<1x128xi1> to vector<1x128xi1>
    %16 = vector.broadcast %15 : vector<1x128xi1> to vector<32x128xi1>
    %17 = vector.shape_cast %14 : vector<32x1xf32> to vector<32x1xf32>
    %18 = vector.broadcast %17 : vector<32x1xf32> to vector<32x128xf32>
    %19 = arith.select %16, %18, %11 : vector<32x128xi1>, vector<32x128xf32>
    %c2_i32 = arith.constant 2 : i32
    %20 = vector.broadcast %c2_i32 : i32 to vector<1x128xi32>
    %21 = arith.cmpi eq, %0, %20 : vector<1x128xi32>
    %c0_7 = arith.constant 0 : index
    %c2 = arith.constant 2 : index
    %22 = vector.load %arg3[%c0_7, %c2] : memref<32x32xf32, #tpu.memory_space<vmem>>, vector<32x1xf32>
    %23 = vector.shape_cast %21 : vector<1x128xi1> to vector<1x128xi1>
    %24 = vector.broadcast %23 : vector<1x128xi1> to vector<32x128xi1>
    %25 = vector.shape_cast %22 : vector<32x1xf32> to vector<32x1xf32>
    %26 = vector.broadcast %25 : vector<32x1xf32> to vector<32x128xf32>
    %27 = arith.select %24, %26, %19 : vector<32x128xi1>, vector<32x128xf32>
    %c3_i32 = arith.constant 3 : i32
    %28 = vector.broadcast %c3_i32 : i32 to vector<1x128xi32>
    %29 = arith.cmpi eq, %0, %28 : vector<1x128xi32>
    %c0_8 = arith.constant 0 : index
    %c3 = arith.constant 3 : index
    %30 = vector.load %arg3[%c0_8, %c3] : memref<32x32xf32, #tpu.memory_space<vmem>>, vector<32x1xf32>
    %31 = vector.shape_cast %29 : vector<1x128xi1> to vector<1x128xi1>
    %32 = vector.broadcast %31 : vector<1x128xi1> to vector<32x128xi1>
    %33 = vector.shape_cast %30 : vector<32x1xf32> to vector<32x1xf32>
    %34 = vector.broadcast %33 : vector<32x1xf32> to vector<32x128xf32>
    %35 = arith.select %32, %34, %27 : vector<32x128xi1>, vector<32x128xf32>
    %c4_i32 = arith.constant 4 : i32
    %36 = vector.broadcast %c4_i32 : i32 to vector<1x128xi32>
    %37 = arith.cmpi eq, %0, %36 : vector<1x128xi32>
    %c0_9 = arith.constant 0 : index
    %c4 = arith.constant 4 : index
    %38 = vector.load %arg3[%c0_9, %c4] : memref<32x32xf32, #tpu.memory_space<vmem>>, vector<32x1xf32>
    %39 = vector.shape_cast %37 : vector<1x128xi1> to vector<1x128xi1>
    %40 = vector.broadcast %39 : vector<1x128xi1> to vector<32x128xi1>
    %41 = vector.shape_cast %38 : vector<32x1xf32> to vector<32x1xf32>
    %42 = vector.broadcast %41 : vector<32x1xf32> to vector<32x128xf32>
    %43 = arith.select %40, %42, %35 : vector<32x128xi1>, vector<32x128xf32>
    %c5_i32 = arith.constant 5 : i32
    %44 = vector.broadcast %c5_i32 : i32 to vector<1x128xi32>
    %45 = arith.cmpi eq, %0, %44 : vector<1x128xi32>
    %c0_10 = arith.constant 0 : index
    %c5 = arith.constant 5 : index
    %46 = vector.load %arg3[%c0_10, %c5] : memref<32x32xf32, #tpu.memory_space<vmem>>, vector<32x1xf32>
    %47 = vector.shape_cast %45 : vector<1x128xi1> to vector<1x128xi1>
    %48 = vector.broadcast %47 : vector<1x128xi1> to vector<32x128xi1>
    %49 = vector.shape_cast %46 : vector<32x1xf32> to vector<32x1xf32>
    %50 = vector.broadcast %49 : vector<32x1xf32> to vector<32x128xf32>
    %51 = arith.select %48, %50, %43 : vector<32x128xi1>, vector<32x128xf32>
    %c6_i32 = arith.constant 6 : i32
    %52 = vector.broadcast %c6_i32 : i32 to vector<1x128xi32>
    %53 = arith.cmpi eq, %0, %52 : vector<1x128xi32>
    %c0_11 = arith.constant 0 : index
    %c6 = arith.constant 6 : index
    %54 = vector.load %arg3[%c0_11, %c6] : memref<32x32xf32, #tpu.memory_space<vmem>>, vector<32x1xf32>
    %55 = vector.shape_cast %53 : vector<1x128xi1> to vector<1x128xi1>
    %56 = vector.broadcast %55 : vector<1x128xi1> to vector<32x128xi1>
    %57 = vector.shape_cast %54 : vector<32x1xf32> to vector<32x1xf32>
    %58 = vector.broadcast %57 : vector<32x1xf32> to vector<32x128xf32>
    %59 = arith.select %56, %58, %51 : vector<32x128xi1>, vector<32x128xf32>
    %c7_i32 = arith.constant 7 : i32
    %60 = vector.broadcast %c7_i32 : i32 to vector<1x128xi32>
    %61 = arith.cmpi eq, %0, %60 : vector<1x128xi32>
    %c0_12 = arith.constant 0 : index
    %c7 = arith.constant 7 : index
    %62 = vector.load %arg3[%c0_12, %c7] : memref<32x32xf32, #tpu.memory_space<vmem>>, vector<32x1xf32>
    %63 = vector.shape_cast %61 : vector<1x128xi1> to vector<1x128xi1>
    %64 = vector.broadcast %63 : vector<1x128xi1> to vector<32x128xi1>
    %65 = vector.shape_cast %62 : vector<32x1xf32> to vector<32x1xf32>
    %66 = vector.broadcast %65 : vector<32x1xf32> to vector<32x128xf32>
    %67 = arith.select %64, %66, %59 : vector<32x128xi1>, vector<32x128xf32>
    %c8_i32 = arith.constant 8 : i32
    %68 = vector.broadcast %c8_i32 : i32 to vector<1x128xi32>
    %69 = arith.cmpi eq, %0, %68 : vector<1x128xi32>
    %c0_13 = arith.constant 0 : index
    %c8 = arith.constant 8 : index
    %70 = vector.load %arg3[%c0_13, %c8] : memref<32x32xf32, #tpu.memory_space<vmem>>, vector<32x1xf32>
    %71 = vector.shape_cast %69 : vector<1x128xi1> to vector<1x128xi1>
    %72 = vector.broadcast %71 : vector<1x128xi1> to vector<32x128xi1>
    %73 = vector.shape_cast %70 : vector<32x1xf32> to vector<32x1xf32>
    %74 = vector.broadcast %73 : vector<32x1xf32> to vector<32x128xf32>
    %75 = arith.select %72, %74, %67 : vector<32x128xi1>, vector<32x128xf32>
    %c9_i32 = arith.constant 9 : i32
    %76 = vector.broadcast %c9_i32 : i32 to vector<1x128xi32>
    %77 = arith.cmpi eq, %0, %76 : vector<1x128xi32>
    %c0_14 = arith.constant 0 : index
    %c9 = arith.constant 9 : index
    %78 = vector.load %arg3[%c0_14, %c9] : memref<32x32xf32, #tpu.memory_space<vmem>>, vector<32x1xf32>
    %79 = vector.shape_cast %77 : vector<1x128xi1> to vector<1x128xi1>
    %80 = vector.broadcast %79 : vector<1x128xi1> to vector<32x128xi1>
    %81 = vector.shape_cast %78 : vector<32x1xf32> to vector<32x1xf32>
    %82 = vector.broadcast %81 : vector<32x1xf32> to vector<32x128xf32>
    %83 = arith.select %80, %82, %75 : vector<32x128xi1>, vector<32x128xf32>
    %c10_i32 = arith.constant 10 : i32
    %84 = vector.broadcast %c10_i32 : i32 to vector<1x128xi32>
    %85 = arith.cmpi eq, %0, %84 : vector<1x128xi32>
    %c0_15 = arith.constant 0 : index
    %c10 = arith.constant 10 : index
    %86 = vector.load %arg3[%c0_15, %c10] : memref<32x32xf32, #tpu.memory_space<vmem>>, vector<32x1xf32>
    %87 = vector.shape_cast %85 : vector<1x128xi1> to vector<1x128xi1>
    %88 = vector.broadcast %87 : vector<1x128xi1> to vector<32x128xi1>
    %89 = vector.shape_cast %86 : vector<32x1xf32> to vector<32x1xf32>
    %90 = vector.broadcast %89 : vector<32x1xf32> to vector<32x128xf32>
    %91 = arith.select %88, %90, %83 : vector<32x128xi1>, vector<32x128xf32>
    %c11_i32 = arith.constant 11 : i32
    %92 = vector.broadcast %c11_i32 : i32 to vector<1x128xi32>
    %93 = arith.cmpi eq, %0, %92 : vector<1x128xi32>
    %c0_16 = arith.constant 0 : index
    %c11 = arith.constant 11 : index
    %94 = vector.load %arg3[%c0_16, %c11] : memref<32x32xf32, #tpu.memory_space<vmem>>, vector<32x1xf32>
    %95 = vector.shape_cast %93 : vector<1x128xi1> to vector<1x128xi1>
    %96 = vector.broadcast %95 : vector<1x128xi1> to vector<32x128xi1>
    %97 = vector.shape_cast %94 : vector<32x1xf32> to vector<32x1xf32>
    %98 = vector.broadcast %97 : vector<32x1xf32> to vector<32x128xf32>
    %99 = arith.select %96, %98, %91 : vector<32x128xi1>, vector<32x128xf32>
    %c12_i32 = arith.constant 12 : i32
    %100 = vector.broadcast %c12_i32 : i32 to vector<1x128xi32>
    %101 = arith.cmpi eq, %0, %100 : vector<1x128xi32>
    %c0_17 = arith.constant 0 : index
    %c12 = arith.constant 12 : index
    %102 = vector.load %arg3[%c0_17, %c12] : memref<32x32xf32, #tpu.memory_space<vmem>>, vector<32x1xf32>
    %103 = vector.shape_cast %101 : vector<1x128xi1> to vector<1x128xi1>
    %104 = vector.broadcast %103 : vector<1x128xi1> to vector<32x128xi1>
    %105 = vector.shape_cast %102 : vector<32x1xf32> to vector<32x1xf32>
    %106 = vector.broadcast %105 : vector<32x1xf32> to vector<32x128xf32>
    %107 = arith.select %104, %106, %99 : vector<32x128xi1>, vector<32x128xf32>
    %c13_i32 = arith.constant 13 : i32
    %108 = vector.broadcast %c13_i32 : i32 to vector<1x128xi32>
    %109 = arith.cmpi eq, %0, %108 : vector<1x128xi32>
    %c0_18 = arith.constant 0 : index
    %c13 = arith.constant 13 : index
    %110 = vector.load %arg3[%c0_18, %c13] : memref<32x32xf32, #tpu.memory_space<vmem>>, vector<32x1xf32>
    %111 = vector.shape_cast %109 : vector<1x128xi1> to vector<1x128xi1>
    %112 = vector.broadcast %111 : vector<1x128xi1> to vector<32x128xi1>
    %113 = vector.shape_cast %110 : vector<32x1xf32> to vector<32x1xf32>
    %114 = vector.broadcast %113 : vector<32x1xf32> to vector<32x128xf32>
    %115 = arith.select %112, %114, %107 : vector<32x128xi1>, vector<32x128xf32>
    %c14_i32 = arith.constant 14 : i32
    %116 = vector.broadcast %c14_i32 : i32 to vector<1x128xi32>
    %117 = arith.cmpi eq, %0, %116 : vector<1x128xi32>
    %c0_19 = arith.constant 0 : index
    %c14 = arith.constant 14 : index
    %118 = vector.load %arg3[%c0_19, %c14] : memref<32x32xf32, #tpu.memory_space<vmem>>, vector<32x1xf32>
    %119 = vector.shape_cast %117 : vector<1x128xi1> to vector<1x128xi1>
    %120 = vector.broadcast %119 : vector<1x128xi1> to vector<32x128xi1>
    %121 = vector.shape_cast %118 : vector<32x1xf32> to vector<32x1xf32>
    %122 = vector.broadcast %121 : vector<32x1xf32> to vector<32x128xf32>
    %123 = arith.select %120, %122, %115 : vector<32x128xi1>, vector<32x128xf32>
    %c15_i32 = arith.constant 15 : i32
    %124 = vector.broadcast %c15_i32 : i32 to vector<1x128xi32>
    %125 = arith.cmpi eq, %0, %124 : vector<1x128xi32>
    %c0_20 = arith.constant 0 : index
    %c15 = arith.constant 15 : index
    %126 = vector.load %arg3[%c0_20, %c15] : memref<32x32xf32, #tpu.memory_space<vmem>>, vector<32x1xf32>
    %127 = vector.shape_cast %125 : vector<1x128xi1> to vector<1x128xi1>
    %128 = vector.broadcast %127 : vector<1x128xi1> to vector<32x128xi1>
    %129 = vector.shape_cast %126 : vector<32x1xf32> to vector<32x1xf32>
    %130 = vector.broadcast %129 : vector<32x1xf32> to vector<32x128xf32>
    %131 = arith.select %128, %130, %123 : vector<32x128xi1>, vector<32x128xf32>
    %c16_i32 = arith.constant 16 : i32
    %132 = vector.broadcast %c16_i32 : i32 to vector<1x128xi32>
    %133 = arith.cmpi eq, %0, %132 : vector<1x128xi32>
    %c0_21 = arith.constant 0 : index
    %c16 = arith.constant 16 : index
    %134 = vector.load %arg3[%c0_21, %c16] : memref<32x32xf32, #tpu.memory_space<vmem>>, vector<32x1xf32>
    %135 = vector.shape_cast %133 : vector<1x128xi1> to vector<1x128xi1>
    %136 = vector.broadcast %135 : vector<1x128xi1> to vector<32x128xi1>
    %137 = vector.shape_cast %134 : vector<32x1xf32> to vector<32x1xf32>
    %138 = vector.broadcast %137 : vector<32x1xf32> to vector<32x128xf32>
    %139 = arith.select %136, %138, %131 : vector<32x128xi1>, vector<32x128xf32>
    %c17_i32 = arith.constant 17 : i32
    %140 = vector.broadcast %c17_i32 : i32 to vector<1x128xi32>
    %141 = arith.cmpi eq, %0, %140 : vector<1x128xi32>
    %c0_22 = arith.constant 0 : index
    %c17 = arith.constant 17 : index
    %142 = vector.load %arg3[%c0_22, %c17] : memref<32x32xf32, #tpu.memory_space<vmem>>, vector<32x1xf32>
    %143 = vector.shape_cast %141 : vector<1x128xi1> to vector<1x128xi1>
    %144 = vector.broadcast %143 : vector<1x128xi1> to vector<32x128xi1>
    %145 = vector.shape_cast %142 : vector<32x1xf32> to vector<32x1xf32>
    %146 = vector.broadcast %145 : vector<32x1xf32> to vector<32x128xf32>
    %147 = arith.select %144, %146, %139 : vector<32x128xi1>, vector<32x128xf32>
    %c18_i32 = arith.constant 18 : i32
    %148 = vector.broadcast %c18_i32 : i32 to vector<1x128xi32>
    %149 = arith.cmpi eq, %0, %148 : vector<1x128xi32>
    %c0_23 = arith.constant 0 : index
    %c18 = arith.constant 18 : index
    %150 = vector.load %arg3[%c0_23, %c18] : memref<32x32xf32, #tpu.memory_space<vmem>>, vector<32x1xf32>
    %151 = vector.shape_cast %149 : vector<1x128xi1> to vector<1x128xi1>
    %152 = vector.broadcast %151 : vector<1x128xi1> to vector<32x128xi1>
    %153 = vector.shape_cast %150 : vector<32x1xf32> to vector<32x1xf32>
    %154 = vector.broadcast %153 : vector<32x1xf32> to vector<32x128xf32>
    %155 = arith.select %152, %154, %147 : vector<32x128xi1>, vector<32x128xf32>
    %c19_i32 = arith.constant 19 : i32
    %156 = vector.broadcast %c19_i32 : i32 to vector<1x128xi32>
    %157 = arith.cmpi eq, %0, %156 : vector<1x128xi32>
    %c0_24 = arith.constant 0 : index
    %c19 = arith.constant 19 : index
    %158 = vector.load %arg3[%c0_24, %c19] : memref<32x32xf32, #tpu.memory_space<vmem>>, vector<32x1xf32>
    %159 = vector.shape_cast %157 : vector<1x128xi1> to vector<1x128xi1>
    %160 = vector.broadcast %159 : vector<1x128xi1> to vector<32x128xi1>
    %161 = vector.shape_cast %158 : vector<32x1xf32> to vector<32x1xf32>
    %162 = vector.broadcast %161 : vector<32x1xf32> to vector<32x128xf32>
    %163 = arith.select %160, %162, %155 : vector<32x128xi1>, vector<32x128xf32>
    %c20_i32 = arith.constant 20 : i32
    %164 = vector.broadcast %c20_i32 : i32 to vector<1x128xi32>
    %165 = arith.cmpi eq, %0, %164 : vector<1x128xi32>
    %c0_25 = arith.constant 0 : index
    %c20 = arith.constant 20 : index
    %166 = vector.load %arg3[%c0_25, %c20] : memref<32x32xf32, #tpu.memory_space<vmem>>, vector<32x1xf32>
    %167 = vector.shape_cast %165 : vector<1x128xi1> to vector<1x128xi1>
    %168 = vector.broadcast %167 : vector<1x128xi1> to vector<32x128xi1>
    %169 = vector.shape_cast %166 : vector<32x1xf32> to vector<32x1xf32>
    %170 = vector.broadcast %169 : vector<32x1xf32> to vector<32x128xf32>
    %171 = arith.select %168, %170, %163 : vector<32x128xi1>, vector<32x128xf32>
    %c21_i32 = arith.constant 21 : i32
    %172 = vector.broadcast %c21_i32 : i32 to vector<1x128xi32>
    %173 = arith.cmpi eq, %0, %172 : vector<1x128xi32>
    %c0_26 = arith.constant 0 : index
    %c21 = arith.constant 21 : index
    %174 = vector.load %arg3[%c0_26, %c21] : memref<32x32xf32, #tpu.memory_space<vmem>>, vector<32x1xf32>
    %175 = vector.shape_cast %173 : vector<1x128xi1> to vector<1x128xi1>
    %176 = vector.broadcast %175 : vector<1x128xi1> to vector<32x128xi1>
    %177 = vector.shape_cast %174 : vector<32x1xf32> to vector<32x1xf32>
    %178 = vector.broadcast %177 : vector<32x1xf32> to vector<32x128xf32>
    %179 = arith.select %176, %178, %171 : vector<32x128xi1>, vector<32x128xf32>
    %c22_i32 = arith.constant 22 : i32
    %180 = vector.broadcast %c22_i32 : i32 to vector<1x128xi32>
    %181 = arith.cmpi eq, %0, %180 : vector<1x128xi32>
    %c0_27 = arith.constant 0 : index
    %c22 = arith.constant 22 : index
    %182 = vector.load %arg3[%c0_27, %c22] : memref<32x32xf32, #tpu.memory_space<vmem>>, vector<32x1xf32>
    %183 = vector.shape_cast %181 : vector<1x128xi1> to vector<1x128xi1>
    %184 = vector.broadcast %183 : vector<1x128xi1> to vector<32x128xi1>
    %185 = vector.shape_cast %182 : vector<32x1xf32> to vector<32x1xf32>
    %186 = vector.broadcast %185 : vector<32x1xf32> to vector<32x128xf32>
    %187 = arith.select %184, %186, %179 : vector<32x128xi1>, vector<32x128xf32>
    %c23_i32 = arith.constant 23 : i32
    %188 = vector.broadcast %c23_i32 : i32 to vector<1x128xi32>
    %189 = arith.cmpi eq, %0, %188 : vector<1x128xi32>
    %c0_28 = arith.constant 0 : index
    %c23 = arith.constant 23 : index
    %190 = vector.load %arg3[%c0_28, %c23] : memref<32x32xf32, #tpu.memory_space<vmem>>, vector<32x1xf32>
    %191 = vector.shape_cast %189 : vector<1x128xi1> to vector<1x128xi1>
    %192 = vector.broadcast %191 : vector<1x128xi1> to vector<32x128xi1>
    %193 = vector.shape_cast %190 : vector<32x1xf32> to vector<32x1xf32>
    %194 = vector.broadcast %193 : vector<32x1xf32> to vector<32x128xf32>
    %195 = arith.select %192, %194, %187 : vector<32x128xi1>, vector<32x128xf32>
    %c24_i32 = arith.constant 24 : i32
    %196 = vector.broadcast %c24_i32 : i32 to vector<1x128xi32>
    %197 = arith.cmpi eq, %0, %196 : vector<1x128xi32>
    %c0_29 = arith.constant 0 : index
    %c24 = arith.constant 24 : index
    %198 = vector.load %arg3[%c0_29, %c24] : memref<32x32xf32, #tpu.memory_space<vmem>>, vector<32x1xf32>
    %199 = vector.shape_cast %197 : vector<1x128xi1> to vector<1x128xi1>
    %200 = vector.broadcast %199 : vector<1x128xi1> to vector<32x128xi1>
    %201 = vector.shape_cast %198 : vector<32x1xf32> to vector<32x1xf32>
    %202 = vector.broadcast %201 : vector<32x1xf32> to vector<32x128xf32>
    %203 = arith.select %200, %202, %195 : vector<32x128xi1>, vector<32x128xf32>
    %c25_i32 = arith.constant 25 : i32
    %204 = vector.broadcast %c25_i32 : i32 to vector<1x128xi32>
    %205 = arith.cmpi eq, %0, %204 : vector<1x128xi32>
    %c0_30 = arith.constant 0 : index
    %c25 = arith.constant 25 : index
    %206 = vector.load %arg3[%c0_30, %c25] : memref<32x32xf32, #tpu.memory_space<vmem>>, vector<32x1xf32>
    %207 = vector.shape_cast %205 : vector<1x128xi1> to vector<1x128xi1>
    %208 = vector.broadcast %207 : vector<1x128xi1> to vector<32x128xi1>
    %209 = vector.shape_cast %206 : vector<32x1xf32> to vector<32x1xf32>
    %210 = vector.broadcast %209 : vector<32x1xf32> to vector<32x128xf32>
    %211 = arith.select %208, %210, %203 : vector<32x128xi1>, vector<32x128xf32>
    %c26_i32 = arith.constant 26 : i32
    %212 = vector.broadcast %c26_i32 : i32 to vector<1x128xi32>
    %213 = arith.cmpi eq, %0, %212 : vector<1x128xi32>
    %c0_31 = arith.constant 0 : index
    %c26 = arith.constant 26 : index
    %214 = vector.load %arg3[%c0_31, %c26] : memref<32x32xf32, #tpu.memory_space<vmem>>, vector<32x1xf32>
    %215 = vector.shape_cast %213 : vector<1x128xi1> to vector<1x128xi1>
    %216 = vector.broadcast %215 : vector<1x128xi1> to vector<32x128xi1>
    %217 = vector.shape_cast %214 : vector<32x1xf32> to vector<32x1xf32>
    %218 = vector.broadcast %217 : vector<32x1xf32> to vector<32x128xf32>
    %219 = arith.select %216, %218, %211 : vector<32x128xi1>, vector<32x128xf32>
    %c27_i32 = arith.constant 27 : i32
    %220 = vector.broadcast %c27_i32 : i32 to vector<1x128xi32>
    %221 = arith.cmpi eq, %0, %220 : vector<1x128xi32>
    %c0_32 = arith.constant 0 : index
    %c27 = arith.constant 27 : index
    %222 = vector.load %arg3[%c0_32, %c27] : memref<32x32xf32, #tpu.memory_space<vmem>>, vector<32x1xf32>
    %223 = vector.shape_cast %221 : vector<1x128xi1> to vector<1x128xi1>
    %224 = vector.broadcast %223 : vector<1x128xi1> to vector<32x128xi1>
    %225 = vector.shape_cast %222 : vector<32x1xf32> to vector<32x1xf32>
    %226 = vector.broadcast %225 : vector<32x1xf32> to vector<32x128xf32>
    %227 = arith.select %224, %226, %219 : vector<32x128xi1>, vector<32x128xf32>
    %c28_i32 = arith.constant 28 : i32
    %228 = vector.broadcast %c28_i32 : i32 to vector<1x128xi32>
    %229 = arith.cmpi eq, %0, %228 : vector<1x128xi32>
    %c0_33 = arith.constant 0 : index
    %c28 = arith.constant 28 : index
    %230 = vector.load %arg3[%c0_33, %c28] : memref<32x32xf32, #tpu.memory_space<vmem>>, vector<32x1xf32>
    %231 = vector.shape_cast %229 : vector<1x128xi1> to vector<1x128xi1>
    %232 = vector.broadcast %231 : vector<1x128xi1> to vector<32x128xi1>
    %233 = vector.shape_cast %230 : vector<32x1xf32> to vector<32x1xf32>
    %234 = vector.broadcast %233 : vector<32x1xf32> to vector<32x128xf32>
    %235 = arith.select %232, %234, %227 : vector<32x128xi1>, vector<32x128xf32>
    %c29_i32 = arith.constant 29 : i32
    %236 = vector.broadcast %c29_i32 : i32 to vector<1x128xi32>
    %237 = arith.cmpi eq, %0, %236 : vector<1x128xi32>
    %c0_34 = arith.constant 0 : index
    %c29 = arith.constant 29 : index
    %238 = vector.load %arg3[%c0_34, %c29] : memref<32x32xf32, #tpu.memory_space<vmem>>, vector<32x1xf32>
    %239 = vector.shape_cast %237 : vector<1x128xi1> to vector<1x128xi1>
    %240 = vector.broadcast %239 : vector<1x128xi1> to vector<32x128xi1>
    %241 = vector.shape_cast %238 : vector<32x1xf32> to vector<32x1xf32>
    %242 = vector.broadcast %241 : vector<32x1xf32> to vector<32x128xf32>
    %243 = arith.select %240, %242, %235 : vector<32x128xi1>, vector<32x128xf32>
    %c30_i32 = arith.constant 30 : i32
    %244 = vector.broadcast %c30_i32 : i32 to vector<1x128xi32>
    %245 = arith.cmpi eq, %0, %244 : vector<1x128xi32>
    %c0_35 = arith.constant 0 : index
    %c30 = arith.constant 30 : index
    %246 = vector.load %arg3[%c0_35, %c30] : memref<32x32xf32, #tpu.memory_space<vmem>>, vector<32x1xf32>
    %247 = vector.shape_cast %245 : vector<1x128xi1> to vector<1x128xi1>
    %248 = vector.broadcast %247 : vector<1x128xi1> to vector<32x128xi1>
    %249 = vector.shape_cast %246 : vector<32x1xf32> to vector<32x1xf32>
    %250 = vector.broadcast %249 : vector<32x1xf32> to vector<32x128xf32>
    %251 = arith.select %248, %250, %243 : vector<32x128xi1>, vector<32x128xf32>
    %c31_i32 = arith.constant 31 : i32
    %252 = vector.broadcast %c31_i32 : i32 to vector<1x128xi32>
    %253 = arith.cmpi eq, %0, %252 : vector<1x128xi32>
    %c0_36 = arith.constant 0 : index
    %c31 = arith.constant 31 : index
    %254 = vector.load %arg3[%c0_36, %c31] : memref<32x32xf32, #tpu.memory_space<vmem>>, vector<32x1xf32>
    %255 = vector.shape_cast %253 : vector<1x128xi1> to vector<1x128xi1>
    %256 = vector.broadcast %255 : vector<1x128xi1> to vector<32x128xi1>
    %257 = vector.shape_cast %254 : vector<32x1xf32> to vector<32x1xf32>
    %258 = vector.broadcast %257 : vector<32x1xf32> to vector<32x128xf32>
    %259 = arith.select %256, %258, %251 : vector<32x128xi1>, vector<32x128xf32>
    %c0_i32_37 = arith.constant 0 : i32
    %260 = vector.broadcast %c0_i32_37 : i32 to vector<1x128xi32>
    %261 = arith.cmpi eq, %1, %260 : vector<1x128xi32>
    %c0_38 = arith.constant 0 : index
    %c0_39 = arith.constant 0 : index
    %262 = vector.load %arg4[%c0_38, %c0_39] : memref<32x40xf32, #tpu.memory_space<vmem>>, vector<32x1xf32>
    %263 = vector.shape_cast %261 : vector<1x128xi1> to vector<1x128xi1>
    %264 = vector.broadcast %263 : vector<1x128xi1> to vector<32x128xi1>
    %265 = vector.shape_cast %262 : vector<32x1xf32> to vector<32x1xf32>
    %266 = vector.broadcast %265 : vector<32x1xf32> to vector<32x128xf32>
    %267 = arith.select %264, %266, %3 : vector<32x128xi1>, vector<32x128xf32>
    %c1_i32_40 = arith.constant 1 : i32
    %268 = vector.broadcast %c1_i32_40 : i32 to vector<1x128xi32>
    %269 = arith.cmpi eq, %1, %268 : vector<1x128xi32>
    %c0_41 = arith.constant 0 : index
    %c1_42 = arith.constant 1 : index
    %270 = vector.load %arg4[%c0_41, %c1_42] : memref<32x40xf32, #tpu.memory_space<vmem>>, vector<32x1xf32>
    %271 = vector.shape_cast %269 : vector<1x128xi1> to vector<1x128xi1>
    %272 = vector.broadcast %271 : vector<1x128xi1> to vector<32x128xi1>
    %273 = vector.shape_cast %270 : vector<32x1xf32> to vector<32x1xf32>
    %274 = vector.broadcast %273 : vector<32x1xf32> to vector<32x128xf32>
    %275 = arith.select %272, %274, %267 : vector<32x128xi1>, vector<32x128xf32>
    %c2_i32_43 = arith.constant 2 : i32
    %276 = vector.broadcast %c2_i32_43 : i32 to vector<1x128xi32>
    %277 = arith.cmpi eq, %1, %276 : vector<1x128xi32>
    %c0_44 = arith.constant 0 : index
    %c2_45 = arith.constant 2 : index
    %278 = vector.load %arg4[%c0_44, %c2_45] : memref<32x40xf32, #tpu.memory_space<vmem>>, vector<32x1xf32>
    %279 = vector.shape_cast %277 : vector<1x128xi1> to vector<1x128xi1>
    %280 = vector.broadcast %279 : vector<1x128xi1> to vector<32x128xi1>
    %281 = vector.shape_cast %278 : vector<32x1xf32> to vector<32x1xf32>
    %282 = vector.broadcast %281 : vector<32x1xf32> to vector<32x128xf32>
    %283 = arith.select %280, %282, %275 : vector<32x128xi1>, vector<32x128xf32>
    %c3_i32_46 = arith.constant 3 : i32
    %284 = vector.broadcast %c3_i32_46 : i32 to vector<1x128xi32>
    %285 = arith.cmpi eq, %1, %284 : vector<1x128xi32>
    %c0_47 = arith.constant 0 : index
    %c3_48 = arith.constant 3 : index
    %286 = vector.load %arg4[%c0_47, %c3_48] : memref<32x40xf32, #tpu.memory_space<vmem>>, vector<32x1xf32>
    %287 = vector.shape_cast %285 : vector<1x128xi1> to vector<1x128xi1>
    %288 = vector.broadcast %287 : vector<1x128xi1> to vector<32x128xi1>
    %289 = vector.shape_cast %286 : vector<32x1xf32> to vector<32x1xf32>
    %290 = vector.broadcast %289 : vector<32x1xf32> to vector<32x128xf32>
    %291 = arith.select %288, %290, %283 : vector<32x128xi1>, vector<32x128xf32>
    %c4_i32_49 = arith.constant 4 : i32
    %292 = vector.broadcast %c4_i32_49 : i32 to vector<1x128xi32>
    %293 = arith.cmpi eq, %1, %292 : vector<1x128xi32>
    %c0_50 = arith.constant 0 : index
    %c4_51 = arith.constant 4 : index
    %294 = vector.load %arg4[%c0_50, %c4_51] : memref<32x40xf32, #tpu.memory_space<vmem>>, vector<32x1xf32>
    %295 = vector.shape_cast %293 : vector<1x128xi1> to vector<1x128xi1>
    %296 = vector.broadcast %295 : vector<1x128xi1> to vector<32x128xi1>
    %297 = vector.shape_cast %294 : vector<32x1xf32> to vector<32x1xf32>
    %298 = vector.broadcast %297 : vector<32x1xf32> to vector<32x128xf32>
    %299 = arith.select %296, %298, %291 : vector<32x128xi1>, vector<32x128xf32>
    %c5_i32_52 = arith.constant 5 : i32
    %300 = vector.broadcast %c5_i32_52 : i32 to vector<1x128xi32>
    %301 = arith.cmpi eq, %1, %300 : vector<1x128xi32>
    %c0_53 = arith.constant 0 : index
    %c5_54 = arith.constant 5 : index
    %302 = vector.load %arg4[%c0_53, %c5_54] : memref<32x40xf32, #tpu.memory_space<vmem>>, vector<32x1xf32>
    %303 = vector.shape_cast %301 : vector<1x128xi1> to vector<1x128xi1>
    %304 = vector.broadcast %303 : vector<1x128xi1> to vector<32x128xi1>
    %305 = vector.shape_cast %302 : vector<32x1xf32> to vector<32x1xf32>
    %306 = vector.broadcast %305 : vector<32x1xf32> to vector<32x128xf32>
    %307 = arith.select %304, %306, %299 : vector<32x128xi1>, vector<32x128xf32>
    %c6_i32_55 = arith.constant 6 : i32
    %308 = vector.broadcast %c6_i32_55 : i32 to vector<1x128xi32>
    %309 = arith.cmpi eq, %1, %308 : vector<1x128xi32>
    %c0_56 = arith.constant 0 : index
    %c6_57 = arith.constant 6 : index
    %310 = vector.load %arg4[%c0_56, %c6_57] : memref<32x40xf32, #tpu.memory_space<vmem>>, vector<32x1xf32>
    %311 = vector.shape_cast %309 : vector<1x128xi1> to vector<1x128xi1>
    %312 = vector.broadcast %311 : vector<1x128xi1> to vector<32x128xi1>
    %313 = vector.shape_cast %310 : vector<32x1xf32> to vector<32x1xf32>
    %314 = vector.broadcast %313 : vector<32x1xf32> to vector<32x128xf32>
    %315 = arith.select %312, %314, %307 : vector<32x128xi1>, vector<32x128xf32>
    %c7_i32_58 = arith.constant 7 : i32
    %316 = vector.broadcast %c7_i32_58 : i32 to vector<1x128xi32>
    %317 = arith.cmpi eq, %1, %316 : vector<1x128xi32>
    %c0_59 = arith.constant 0 : index
    %c7_60 = arith.constant 7 : index
    %318 = vector.load %arg4[%c0_59, %c7_60] : memref<32x40xf32, #tpu.memory_space<vmem>>, vector<32x1xf32>
    %319 = vector.shape_cast %317 : vector<1x128xi1> to vector<1x128xi1>
    %320 = vector.broadcast %319 : vector<1x128xi1> to vector<32x128xi1>
    %321 = vector.shape_cast %318 : vector<32x1xf32> to vector<32x1xf32>
    %322 = vector.broadcast %321 : vector<32x1xf32> to vector<32x128xf32>
    %323 = arith.select %320, %322, %315 : vector<32x128xi1>, vector<32x128xf32>
    %c8_i32_61 = arith.constant 8 : i32
    %324 = vector.broadcast %c8_i32_61 : i32 to vector<1x128xi32>
    %325 = arith.cmpi eq, %1, %324 : vector<1x128xi32>
    %c0_62 = arith.constant 0 : index
    %c8_63 = arith.constant 8 : index
    %326 = vector.load %arg4[%c0_62, %c8_63] : memref<32x40xf32, #tpu.memory_space<vmem>>, vector<32x1xf32>
    %327 = vector.shape_cast %325 : vector<1x128xi1> to vector<1x128xi1>
    %328 = vector.broadcast %327 : vector<1x128xi1> to vector<32x128xi1>
    %329 = vector.shape_cast %326 : vector<32x1xf32> to vector<32x1xf32>
    %330 = vector.broadcast %329 : vector<32x1xf32> to vector<32x128xf32>
    %331 = arith.select %328, %330, %323 : vector<32x128xi1>, vector<32x128xf32>
    %c9_i32_64 = arith.constant 9 : i32
    %332 = vector.broadcast %c9_i32_64 : i32 to vector<1x128xi32>
    %333 = arith.cmpi eq, %1, %332 : vector<1x128xi32>
    %c0_65 = arith.constant 0 : index
    %c9_66 = arith.constant 9 : index
    %334 = vector.load %arg4[%c0_65, %c9_66] : memref<32x40xf32, #tpu.memory_space<vmem>>, vector<32x1xf32>
    %335 = vector.shape_cast %333 : vector<1x128xi1> to vector<1x128xi1>
    %336 = vector.broadcast %335 : vector<1x128xi1> to vector<32x128xi1>
    %337 = vector.shape_cast %334 : vector<32x1xf32> to vector<32x1xf32>
    %338 = vector.broadcast %337 : vector<32x1xf32> to vector<32x128xf32>
    %339 = arith.select %336, %338, %331 : vector<32x128xi1>, vector<32x128xf32>
    %c10_i32_67 = arith.constant 10 : i32
    %340 = vector.broadcast %c10_i32_67 : i32 to vector<1x128xi32>
    %341 = arith.cmpi eq, %1, %340 : vector<1x128xi32>
    %c0_68 = arith.constant 0 : index
    %c10_69 = arith.constant 10 : index
    %342 = vector.load %arg4[%c0_68, %c10_69] : memref<32x40xf32, #tpu.memory_space<vmem>>, vector<32x1xf32>
    %343 = vector.shape_cast %341 : vector<1x128xi1> to vector<1x128xi1>
    %344 = vector.broadcast %343 : vector<1x128xi1> to vector<32x128xi1>
    %345 = vector.shape_cast %342 : vector<32x1xf32> to vector<32x1xf32>
    %346 = vector.broadcast %345 : vector<32x1xf32> to vector<32x128xf32>
    %347 = arith.select %344, %346, %339 : vector<32x128xi1>, vector<32x128xf32>
    %c11_i32_70 = arith.constant 11 : i32
    %348 = vector.broadcast %c11_i32_70 : i32 to vector<1x128xi32>
    %349 = arith.cmpi eq, %1, %348 : vector<1x128xi32>
    %c0_71 = arith.constant 0 : index
    %c11_72 = arith.constant 11 : index
    %350 = vector.load %arg4[%c0_71, %c11_72] : memref<32x40xf32, #tpu.memory_space<vmem>>, vector<32x1xf32>
    %351 = vector.shape_cast %349 : vector<1x128xi1> to vector<1x128xi1>
    %352 = vector.broadcast %351 : vector<1x128xi1> to vector<32x128xi1>
    %353 = vector.shape_cast %350 : vector<32x1xf32> to vector<32x1xf32>
    %354 = vector.broadcast %353 : vector<32x1xf32> to vector<32x128xf32>
    %355 = arith.select %352, %354, %347 : vector<32x128xi1>, vector<32x128xf32>
    %c12_i32_73 = arith.constant 12 : i32
    %356 = vector.broadcast %c12_i32_73 : i32 to vector<1x128xi32>
    %357 = arith.cmpi eq, %1, %356 : vector<1x128xi32>
    %c0_74 = arith.constant 0 : index
    %c12_75 = arith.constant 12 : index
    %358 = vector.load %arg4[%c0_74, %c12_75] : memref<32x40xf32, #tpu.memory_space<vmem>>, vector<32x1xf32>
    %359 = vector.shape_cast %357 : vector<1x128xi1> to vector<1x128xi1>
    %360 = vector.broadcast %359 : vector<1x128xi1> to vector<32x128xi1>
    %361 = vector.shape_cast %358 : vector<32x1xf32> to vector<32x1xf32>
    %362 = vector.broadcast %361 : vector<32x1xf32> to vector<32x128xf32>
    %363 = arith.select %360, %362, %355 : vector<32x128xi1>, vector<32x128xf32>
    %c13_i32_76 = arith.constant 13 : i32
    %364 = vector.broadcast %c13_i32_76 : i32 to vector<1x128xi32>
    %365 = arith.cmpi eq, %1, %364 : vector<1x128xi32>
    %c0_77 = arith.constant 0 : index
    %c13_78 = arith.constant 13 : index
    %366 = vector.load %arg4[%c0_77, %c13_78] : memref<32x40xf32, #tpu.memory_space<vmem>>, vector<32x1xf32>
    %367 = vector.shape_cast %365 : vector<1x128xi1> to vector<1x128xi1>
    %368 = vector.broadcast %367 : vector<1x128xi1> to vector<32x128xi1>
    %369 = vector.shape_cast %366 : vector<32x1xf32> to vector<32x1xf32>
    %370 = vector.broadcast %369 : vector<32x1xf32> to vector<32x128xf32>
    %371 = arith.select %368, %370, %363 : vector<32x128xi1>, vector<32x128xf32>
    %c14_i32_79 = arith.constant 14 : i32
    %372 = vector.broadcast %c14_i32_79 : i32 to vector<1x128xi32>
    %373 = arith.cmpi eq, %1, %372 : vector<1x128xi32>
    %c0_80 = arith.constant 0 : index
    %c14_81 = arith.constant 14 : index
    %374 = vector.load %arg4[%c0_80, %c14_81] : memref<32x40xf32, #tpu.memory_space<vmem>>, vector<32x1xf32>
    %375 = vector.shape_cast %373 : vector<1x128xi1> to vector<1x128xi1>
    %376 = vector.broadcast %375 : vector<1x128xi1> to vector<32x128xi1>
    %377 = vector.shape_cast %374 : vector<32x1xf32> to vector<32x1xf32>
    %378 = vector.broadcast %377 : vector<32x1xf32> to vector<32x128xf32>
    %379 = arith.select %376, %378, %371 : vector<32x128xi1>, vector<32x128xf32>
    %c15_i32_82 = arith.constant 15 : i32
    %380 = vector.broadcast %c15_i32_82 : i32 to vector<1x128xi32>
    %381 = arith.cmpi eq, %1, %380 : vector<1x128xi32>
    %c0_83 = arith.constant 0 : index
    %c15_84 = arith.constant 15 : index
    %382 = vector.load %arg4[%c0_83, %c15_84] : memref<32x40xf32, #tpu.memory_space<vmem>>, vector<32x1xf32>
    %383 = vector.shape_cast %381 : vector<1x128xi1> to vector<1x128xi1>
    %384 = vector.broadcast %383 : vector<1x128xi1> to vector<32x128xi1>
    %385 = vector.shape_cast %382 : vector<32x1xf32> to vector<32x1xf32>
    %386 = vector.broadcast %385 : vector<32x1xf32> to vector<32x128xf32>
    %387 = arith.select %384, %386, %379 : vector<32x128xi1>, vector<32x128xf32>
    %c16_i32_85 = arith.constant 16 : i32
    %388 = vector.broadcast %c16_i32_85 : i32 to vector<1x128xi32>
    %389 = arith.cmpi eq, %1, %388 : vector<1x128xi32>
    %c0_86 = arith.constant 0 : index
    %c16_87 = arith.constant 16 : index
    %390 = vector.load %arg4[%c0_86, %c16_87] : memref<32x40xf32, #tpu.memory_space<vmem>>, vector<32x1xf32>
    %391 = vector.shape_cast %389 : vector<1x128xi1> to vector<1x128xi1>
    %392 = vector.broadcast %391 : vector<1x128xi1> to vector<32x128xi1>
    %393 = vector.shape_cast %390 : vector<32x1xf32> to vector<32x1xf32>
    %394 = vector.broadcast %393 : vector<32x1xf32> to vector<32x128xf32>
    %395 = arith.select %392, %394, %387 : vector<32x128xi1>, vector<32x128xf32>
    %c17_i32_88 = arith.constant 17 : i32
    %396 = vector.broadcast %c17_i32_88 : i32 to vector<1x128xi32>
    %397 = arith.cmpi eq, %1, %396 : vector<1x128xi32>
    %c0_89 = arith.constant 0 : index
    %c17_90 = arith.constant 17 : index
    %398 = vector.load %arg4[%c0_89, %c17_90] : memref<32x40xf32, #tpu.memory_space<vmem>>, vector<32x1xf32>
    %399 = vector.shape_cast %397 : vector<1x128xi1> to vector<1x128xi1>
    %400 = vector.broadcast %399 : vector<1x128xi1> to vector<32x128xi1>
    %401 = vector.shape_cast %398 : vector<32x1xf32> to vector<32x1xf32>
    %402 = vector.broadcast %401 : vector<32x1xf32> to vector<32x128xf32>
    %403 = arith.select %400, %402, %395 : vector<32x128xi1>, vector<32x128xf32>
    %c18_i32_91 = arith.constant 18 : i32
    %404 = vector.broadcast %c18_i32_91 : i32 to vector<1x128xi32>
    %405 = arith.cmpi eq, %1, %404 : vector<1x128xi32>
    %c0_92 = arith.constant 0 : index
    %c18_93 = arith.constant 18 : index
    %406 = vector.load %arg4[%c0_92, %c18_93] : memref<32x40xf32, #tpu.memory_space<vmem>>, vector<32x1xf32>
    %407 = vector.shape_cast %405 : vector<1x128xi1> to vector<1x128xi1>
    %408 = vector.broadcast %407 : vector<1x128xi1> to vector<32x128xi1>
    %409 = vector.shape_cast %406 : vector<32x1xf32> to vector<32x1xf32>
    %410 = vector.broadcast %409 : vector<32x1xf32> to vector<32x128xf32>
    %411 = arith.select %408, %410, %403 : vector<32x128xi1>, vector<32x128xf32>
    %c19_i32_94 = arith.constant 19 : i32
    %412 = vector.broadcast %c19_i32_94 : i32 to vector<1x128xi32>
    %413 = arith.cmpi eq, %1, %412 : vector<1x128xi32>
    %c0_95 = arith.constant 0 : index
    %c19_96 = arith.constant 19 : index
    %414 = vector.load %arg4[%c0_95, %c19_96] : memref<32x40xf32, #tpu.memory_space<vmem>>, vector<32x1xf32>
    %415 = vector.shape_cast %413 : vector<1x128xi1> to vector<1x128xi1>
    %416 = vector.broadcast %415 : vector<1x128xi1> to vector<32x128xi1>
    %417 = vector.shape_cast %414 : vector<32x1xf32> to vector<32x1xf32>
    %418 = vector.broadcast %417 : vector<32x1xf32> to vector<32x128xf32>
    %419 = arith.select %416, %418, %411 : vector<32x128xi1>, vector<32x128xf32>
    %c20_i32_97 = arith.constant 20 : i32
    %420 = vector.broadcast %c20_i32_97 : i32 to vector<1x128xi32>
    %421 = arith.cmpi eq, %1, %420 : vector<1x128xi32>
    %c0_98 = arith.constant 0 : index
    %c20_99 = arith.constant 20 : index
    %422 = vector.load %arg4[%c0_98, %c20_99] : memref<32x40xf32, #tpu.memory_space<vmem>>, vector<32x1xf32>
    %423 = vector.shape_cast %421 : vector<1x128xi1> to vector<1x128xi1>
    %424 = vector.broadcast %423 : vector<1x128xi1> to vector<32x128xi1>
    %425 = vector.shape_cast %422 : vector<32x1xf32> to vector<32x1xf32>
    %426 = vector.broadcast %425 : vector<32x1xf32> to vector<32x128xf32>
    %427 = arith.select %424, %426, %419 : vector<32x128xi1>, vector<32x128xf32>
    %c21_i32_100 = arith.constant 21 : i32
    %428 = vector.broadcast %c21_i32_100 : i32 to vector<1x128xi32>
    %429 = arith.cmpi eq, %1, %428 : vector<1x128xi32>
    %c0_101 = arith.constant 0 : index
    %c21_102 = arith.constant 21 : index
    %430 = vector.load %arg4[%c0_101, %c21_102] : memref<32x40xf32, #tpu.memory_space<vmem>>, vector<32x1xf32>
    %431 = vector.shape_cast %429 : vector<1x128xi1> to vector<1x128xi1>
    %432 = vector.broadcast %431 : vector<1x128xi1> to vector<32x128xi1>
    %433 = vector.shape_cast %430 : vector<32x1xf32> to vector<32x1xf32>
    %434 = vector.broadcast %433 : vector<32x1xf32> to vector<32x128xf32>
    %435 = arith.select %432, %434, %427 : vector<32x128xi1>, vector<32x128xf32>
    %c22_i32_103 = arith.constant 22 : i32
    %436 = vector.broadcast %c22_i32_103 : i32 to vector<1x128xi32>
    %437 = arith.cmpi eq, %1, %436 : vector<1x128xi32>
    %c0_104 = arith.constant 0 : index
    %c22_105 = arith.constant 22 : index
    %438 = vector.load %arg4[%c0_104, %c22_105] : memref<32x40xf32, #tpu.memory_space<vmem>>, vector<32x1xf32>
    %439 = vector.shape_cast %437 : vector<1x128xi1> to vector<1x128xi1>
    %440 = vector.broadcast %439 : vector<1x128xi1> to vector<32x128xi1>
    %441 = vector.shape_cast %438 : vector<32x1xf32> to vector<32x1xf32>
    %442 = vector.broadcast %441 : vector<32x1xf32> to vector<32x128xf32>
    %443 = arith.select %440, %442, %435 : vector<32x128xi1>, vector<32x128xf32>
    %c23_i32_106 = arith.constant 23 : i32
    %444 = vector.broadcast %c23_i32_106 : i32 to vector<1x128xi32>
    %445 = arith.cmpi eq, %1, %444 : vector<1x128xi32>
    %c0_107 = arith.constant 0 : index
    %c23_108 = arith.constant 23 : index
    %446 = vector.load %arg4[%c0_107, %c23_108] : memref<32x40xf32, #tpu.memory_space<vmem>>, vector<32x1xf32>
    %447 = vector.shape_cast %445 : vector<1x128xi1> to vector<1x128xi1>
    %448 = vector.broadcast %447 : vector<1x128xi1> to vector<32x128xi1>
    %449 = vector.shape_cast %446 : vector<32x1xf32> to vector<32x1xf32>
    %450 = vector.broadcast %449 : vector<32x1xf32> to vector<32x128xf32>
    %451 = arith.select %448, %450, %443 : vector<32x128xi1>, vector<32x128xf32>
    %c24_i32_109 = arith.constant 24 : i32
    %452 = vector.broadcast %c24_i32_109 : i32 to vector<1x128xi32>
    %453 = arith.cmpi eq, %1, %452 : vector<1x128xi32>
    %c0_110 = arith.constant 0 : index
    %c24_111 = arith.constant 24 : index
    %454 = vector.load %arg4[%c0_110, %c24_111] : memref<32x40xf32, #tpu.memory_space<vmem>>, vector<32x1xf32>
    %455 = vector.shape_cast %453 : vector<1x128xi1> to vector<1x128xi1>
    %456 = vector.broadcast %455 : vector<1x128xi1> to vector<32x128xi1>
    %457 = vector.shape_cast %454 : vector<32x1xf32> to vector<32x1xf32>
    %458 = vector.broadcast %457 : vector<32x1xf32> to vector<32x128xf32>
    %459 = arith.select %456, %458, %451 : vector<32x128xi1>, vector<32x128xf32>
    %c25_i32_112 = arith.constant 25 : i32
    %460 = vector.broadcast %c25_i32_112 : i32 to vector<1x128xi32>
    %461 = arith.cmpi eq, %1, %460 : vector<1x128xi32>
    %c0_113 = arith.constant 0 : index
    %c25_114 = arith.constant 25 : index
    %462 = vector.load %arg4[%c0_113, %c25_114] : memref<32x40xf32, #tpu.memory_space<vmem>>, vector<32x1xf32>
    %463 = vector.shape_cast %461 : vector<1x128xi1> to vector<1x128xi1>
    %464 = vector.broadcast %463 : vector<1x128xi1> to vector<32x128xi1>
    %465 = vector.shape_cast %462 : vector<32x1xf32> to vector<32x1xf32>
    %466 = vector.broadcast %465 : vector<32x1xf32> to vector<32x128xf32>
    %467 = arith.select %464, %466, %459 : vector<32x128xi1>, vector<32x128xf32>
    %c26_i32_115 = arith.constant 26 : i32
    %468 = vector.broadcast %c26_i32_115 : i32 to vector<1x128xi32>
    %469 = arith.cmpi eq, %1, %468 : vector<1x128xi32>
    %c0_116 = arith.constant 0 : index
    %c26_117 = arith.constant 26 : index
    %470 = vector.load %arg4[%c0_116, %c26_117] : memref<32x40xf32, #tpu.memory_space<vmem>>, vector<32x1xf32>
    %471 = vector.shape_cast %469 : vector<1x128xi1> to vector<1x128xi1>
    %472 = vector.broadcast %471 : vector<1x128xi1> to vector<32x128xi1>
    %473 = vector.shape_cast %470 : vector<32x1xf32> to vector<32x1xf32>
    %474 = vector.broadcast %473 : vector<32x1xf32> to vector<32x128xf32>
    %475 = arith.select %472, %474, %467 : vector<32x128xi1>, vector<32x128xf32>
    %c27_i32_118 = arith.constant 27 : i32
    %476 = vector.broadcast %c27_i32_118 : i32 to vector<1x128xi32>
    %477 = arith.cmpi eq, %1, %476 : vector<1x128xi32>
    %c0_119 = arith.constant 0 : index
    %c27_120 = arith.constant 27 : index
    %478 = vector.load %arg4[%c0_119, %c27_120] : memref<32x40xf32, #tpu.memory_space<vmem>>, vector<32x1xf32>
    %479 = vector.shape_cast %477 : vector<1x128xi1> to vector<1x128xi1>
    %480 = vector.broadcast %479 : vector<1x128xi1> to vector<32x128xi1>
    %481 = vector.shape_cast %478 : vector<32x1xf32> to vector<32x1xf32>
    %482 = vector.broadcast %481 : vector<32x1xf32> to vector<32x128xf32>
    %483 = arith.select %480, %482, %475 : vector<32x128xi1>, vector<32x128xf32>
    %c28_i32_121 = arith.constant 28 : i32
    %484 = vector.broadcast %c28_i32_121 : i32 to vector<1x128xi32>
    %485 = arith.cmpi eq, %1, %484 : vector<1x128xi32>
    %c0_122 = arith.constant 0 : index
    %c28_123 = arith.constant 28 : index
    %486 = vector.load %arg4[%c0_122, %c28_123] : memref<32x40xf32, #tpu.memory_space<vmem>>, vector<32x1xf32>
    %487 = vector.shape_cast %485 : vector<1x128xi1> to vector<1x128xi1>
    %488 = vector.broadcast %487 : vector<1x128xi1> to vector<32x128xi1>
    %489 = vector.shape_cast %486 : vector<32x1xf32> to vector<32x1xf32>
    %490 = vector.broadcast %489 : vector<32x1xf32> to vector<32x128xf32>
    %491 = arith.select %488, %490, %483 : vector<32x128xi1>, vector<32x128xf32>
    %c29_i32_124 = arith.constant 29 : i32
    %492 = vector.broadcast %c29_i32_124 : i32 to vector<1x128xi32>
    %493 = arith.cmpi eq, %1, %492 : vector<1x128xi32>
    %c0_125 = arith.constant 0 : index
    %c29_126 = arith.constant 29 : index
    %494 = vector.load %arg4[%c0_125, %c29_126] : memref<32x40xf32, #tpu.memory_space<vmem>>, vector<32x1xf32>
    %495 = vector.shape_cast %493 : vector<1x128xi1> to vector<1x128xi1>
    %496 = vector.broadcast %495 : vector<1x128xi1> to vector<32x128xi1>
    %497 = vector.shape_cast %494 : vector<32x1xf32> to vector<32x1xf32>
    %498 = vector.broadcast %497 : vector<32x1xf32> to vector<32x128xf32>
    %499 = arith.select %496, %498, %491 : vector<32x128xi1>, vector<32x128xf32>
    %c30_i32_127 = arith.constant 30 : i32
    %500 = vector.broadcast %c30_i32_127 : i32 to vector<1x128xi32>
    %501 = arith.cmpi eq, %1, %500 : vector<1x128xi32>
    %c0_128 = arith.constant 0 : index
    %c30_129 = arith.constant 30 : index
    %502 = vector.load %arg4[%c0_128, %c30_129] : memref<32x40xf32, #tpu.memory_space<vmem>>, vector<32x1xf32>
    %503 = vector.shape_cast %501 : vector<1x128xi1> to vector<1x128xi1>
    %504 = vector.broadcast %503 : vector<1x128xi1> to vector<32x128xi1>
    %505 = vector.shape_cast %502 : vector<32x1xf32> to vector<32x1xf32>
    %506 = vector.broadcast %505 : vector<32x1xf32> to vector<32x128xf32>
    %507 = arith.select %504, %506, %499 : vector<32x128xi1>, vector<32x128xf32>
    %c31_i32_130 = arith.constant 31 : i32
    %508 = vector.broadcast %c31_i32_130 : i32 to vector<1x128xi32>
    %509 = arith.cmpi eq, %1, %508 : vector<1x128xi32>
    %c0_131 = arith.constant 0 : index
    %c31_132 = arith.constant 31 : index
    %510 = vector.load %arg4[%c0_131, %c31_132] : memref<32x40xf32, #tpu.memory_space<vmem>>, vector<32x1xf32>
    %511 = vector.shape_cast %509 : vector<1x128xi1> to vector<1x128xi1>
    %512 = vector.broadcast %511 : vector<1x128xi1> to vector<32x128xi1>
    %513 = vector.shape_cast %510 : vector<32x1xf32> to vector<32x1xf32>
    %514 = vector.broadcast %513 : vector<32x1xf32> to vector<32x128xf32>
    %515 = arith.select %512, %514, %507 : vector<32x128xi1>, vector<32x128xf32>
    %c32_i32 = arith.constant 32 : i32
    %516 = vector.broadcast %c32_i32 : i32 to vector<1x128xi32>
    %517 = arith.cmpi eq, %1, %516 : vector<1x128xi32>
    %c0_133 = arith.constant 0 : index
    %c32 = arith.constant 32 : index
    %518 = vector.load %arg4[%c0_133, %c32] : memref<32x40xf32, #tpu.memory_space<vmem>>, vector<32x1xf32>
    %519 = vector.shape_cast %517 : vector<1x128xi1> to vector<1x128xi1>
    %520 = vector.broadcast %519 : vector<1x128xi1> to vector<32x128xi1>
    %521 = vector.shape_cast %518 : vector<32x1xf32> to vector<32x1xf32>
    %522 = vector.broadcast %521 : vector<32x1xf32> to vector<32x128xf32>
    %523 = arith.select %520, %522, %515 : vector<32x128xi1>, vector<32x128xf32>
    %c33_i32 = arith.constant 33 : i32
    %524 = vector.broadcast %c33_i32 : i32 to vector<1x128xi32>
    %525 = arith.cmpi eq, %1, %524 : vector<1x128xi32>
    %c0_134 = arith.constant 0 : index
    %c33 = arith.constant 33 : index
    %526 = vector.load %arg4[%c0_134, %c33] : memref<32x40xf32, #tpu.memory_space<vmem>>, vector<32x1xf32>
    %527 = vector.shape_cast %525 : vector<1x128xi1> to vector<1x128xi1>
    %528 = vector.broadcast %527 : vector<1x128xi1> to vector<32x128xi1>
    %529 = vector.shape_cast %526 : vector<32x1xf32> to vector<32x1xf32>
    %530 = vector.broadcast %529 : vector<32x1xf32> to vector<32x128xf32>
    %531 = arith.select %528, %530, %523 : vector<32x128xi1>, vector<32x128xf32>
    %c34_i32 = arith.constant 34 : i32
    %532 = vector.broadcast %c34_i32 : i32 to vector<1x128xi32>
    %533 = arith.cmpi eq, %1, %532 : vector<1x128xi32>
    %c0_135 = arith.constant 0 : index
    %c34 = arith.constant 34 : index
    %534 = vector.load %arg4[%c0_135, %c34] : memref<32x40xf32, #tpu.memory_space<vmem>>, vector<32x1xf32>
    %535 = vector.shape_cast %533 : vector<1x128xi1> to vector<1x128xi1>
    %536 = vector.broadcast %535 : vector<1x128xi1> to vector<32x128xi1>
    %537 = vector.shape_cast %534 : vector<32x1xf32> to vector<32x1xf32>
    %538 = vector.broadcast %537 : vector<32x1xf32> to vector<32x128xf32>
    %539 = arith.select %536, %538, %531 : vector<32x128xi1>, vector<32x128xf32>
    %c35_i32 = arith.constant 35 : i32
    %540 = vector.broadcast %c35_i32 : i32 to vector<1x128xi32>
    %541 = arith.cmpi eq, %1, %540 : vector<1x128xi32>
    %c0_136 = arith.constant 0 : index
    %c35 = arith.constant 35 : index
    %542 = vector.load %arg4[%c0_136, %c35] : memref<32x40xf32, #tpu.memory_space<vmem>>, vector<32x1xf32>
    %543 = vector.shape_cast %541 : vector<1x128xi1> to vector<1x128xi1>
    %544 = vector.broadcast %543 : vector<1x128xi1> to vector<32x128xi1>
    %545 = vector.shape_cast %542 : vector<32x1xf32> to vector<32x1xf32>
    %546 = vector.broadcast %545 : vector<32x1xf32> to vector<32x128xf32>
    %547 = arith.select %544, %546, %539 : vector<32x128xi1>, vector<32x128xf32>
    %c36_i32 = arith.constant 36 : i32
    %548 = vector.broadcast %c36_i32 : i32 to vector<1x128xi32>
    %549 = arith.cmpi eq, %1, %548 : vector<1x128xi32>
    %c0_137 = arith.constant 0 : index
    %c36 = arith.constant 36 : index
    %550 = vector.load %arg4[%c0_137, %c36] : memref<32x40xf32, #tpu.memory_space<vmem>>, vector<32x1xf32>
    %551 = vector.shape_cast %549 : vector<1x128xi1> to vector<1x128xi1>
    %552 = vector.broadcast %551 : vector<1x128xi1> to vector<32x128xi1>
    %553 = vector.shape_cast %550 : vector<32x1xf32> to vector<32x1xf32>
    %554 = vector.broadcast %553 : vector<32x1xf32> to vector<32x128xf32>
    %555 = arith.select %552, %554, %547 : vector<32x128xi1>, vector<32x128xf32>
    %c37_i32 = arith.constant 37 : i32
    %556 = vector.broadcast %c37_i32 : i32 to vector<1x128xi32>
    %557 = arith.cmpi eq, %1, %556 : vector<1x128xi32>
    %c0_138 = arith.constant 0 : index
    %c37 = arith.constant 37 : index
    %558 = vector.load %arg4[%c0_138, %c37] : memref<32x40xf32, #tpu.memory_space<vmem>>, vector<32x1xf32>
    %559 = vector.shape_cast %557 : vector<1x128xi1> to vector<1x128xi1>
    %560 = vector.broadcast %559 : vector<1x128xi1> to vector<32x128xi1>
    %561 = vector.shape_cast %558 : vector<32x1xf32> to vector<32x1xf32>
    %562 = vector.broadcast %561 : vector<32x1xf32> to vector<32x128xf32>
    %563 = arith.select %560, %562, %555 : vector<32x128xi1>, vector<32x128xf32>
    %c38_i32 = arith.constant 38 : i32
    %564 = vector.broadcast %c38_i32 : i32 to vector<1x128xi32>
    %565 = arith.cmpi eq, %1, %564 : vector<1x128xi32>
    %c0_139 = arith.constant 0 : index
    %c38 = arith.constant 38 : index
    %566 = vector.load %arg4[%c0_139, %c38] : memref<32x40xf32, #tpu.memory_space<vmem>>, vector<32x1xf32>
    %567 = vector.shape_cast %565 : vector<1x128xi1> to vector<1x128xi1>
    %568 = vector.broadcast %567 : vector<1x128xi1> to vector<32x128xi1>
    %569 = vector.shape_cast %566 : vector<32x1xf32> to vector<32x1xf32>
    %570 = vector.broadcast %569 : vector<32x1xf32> to vector<32x128xf32>
    %571 = arith.select %568, %570, %563 : vector<32x128xi1>, vector<32x128xf32>
    %c39_i32 = arith.constant 39 : i32
    %572 = vector.broadcast %c39_i32 : i32 to vector<1x128xi32>
    %573 = arith.cmpi eq, %1, %572 : vector<1x128xi32>
    %c0_140 = arith.constant 0 : index
    %c39 = arith.constant 39 : index
    %574 = vector.load %arg4[%c0_140, %c39] : memref<32x40xf32, #tpu.memory_space<vmem>>, vector<32x1xf32>
    %575 = vector.shape_cast %573 : vector<1x128xi1> to vector<1x128xi1>
    %576 = vector.broadcast %575 : vector<1x128xi1> to vector<32x128xi1>
    %577 = vector.shape_cast %574 : vector<32x1xf32> to vector<32x1xf32>
    %578 = vector.broadcast %577 : vector<32x1xf32> to vector<32x128xf32>
    %579 = arith.select %576, %578, %571 : vector<32x128xi1>, vector<32x128xf32>
    %580 = arith.mulf %259, %579 : vector<32x128xf32>
    %c0_141 = arith.constant 0 : index
    %c0_142 = arith.constant 0 : index
    %581 = vector.load %arg5[%c0_141, %c0_142] : memref<32x1xf32, #tpu.memory_space<vmem>>, vector<32x1xf32>
    %582 = vector.broadcast %581 : vector<32x1xf32> to vector<32x128xf32>
    %583 = arith.mulf %580, %582 : vector<32x128xf32>
    %cst_143 = arith.constant dense<0.000000e+00> : vector<128xf32>
    %584 = vector.multi_reduction <add>, %583, %cst_143 [0] : vector<32x128xf32> to vector<128xf32>
    %585 = vector.shape_cast %584 : vector<128xf32> to vector<1x128xf32>
    %c0_144 = arith.constant 0 : index
    %c0_145 = arith.constant 0 : index
    %586 = memref.load %arg6[%c0_144, %c0_145] : memref<1x1xf32, #tpu.memory_space<smem>>
    %587 = vector.broadcast %586 : f32 to vector<1x128xf32>
    %588 = arith.addf %585, %587 : vector<1x128xf32>
    %cst_146 = arith.constant 0.000000e+00 : f32
    %589 = vector.broadcast %cst_146 : f32 to vector<1x128xf32>
    %590 = arith.subf %589, %588 : vector<1x128xf32>
    %591 = math.exp %590 : vector<1x128xf32>
    %cst_147 = arith.constant 1.000000e+00 : f32
    %592 = vector.broadcast %cst_147 : f32 to vector<1x128xf32>
    %593 = arith.addf %592, %591 : vector<1x128xf32>
    %cst_148 = arith.constant 1.000000e+00 : f32
    %594 = vector.broadcast %cst_148 : f32 to vector<1x128xf32>
    %595 = arith.divf %594, %593 : vector<1x128xf32>
    %c0_149 = arith.constant 0 : index
    %c0_150 = arith.constant 0 : index
    %596 = vector.load %arg7[%c0_149, %c0_150] : memref<1x128xf32, #tpu.memory_space<vmem>>, vector<1x128xf32>
    tpu.vector_store %arg7[%c0_149, %c0_150], %595 {strides = array<i32>} : memref<1x128xf32, #tpu.memory_space<vmem>>, vector<1x128xf32>,
    return
  }
  func.func @transform_0(%arg0: i32) -> (i32, i32) {
    %c0_i32 = arith.constant 0 : i32
    %c0_i32_0 = arith.constant 0 : i32
    return %c0_i32, %arg0 : i32, i32
  }
  func.func @transform_1(%arg0: i32) -> (i32, i32) {
    %c0_i32 = arith.constant 0 : i32
    %c0_i32_0 = arith.constant 0 : i32
    return %c0_i32, %arg0 : i32, i32
  }
  func.func @transform_2(%arg0: i32) -> (i32, i32) {
    %c0_i32 = arith.constant 0 : i32
    %c0_i32_0 = arith.constant 0 : i32
    %c0_i32_1 = arith.constant 0 : i32
    return %c0_i32, %c0_i32_0 : i32, i32
  }
  func.func @transform_3(%arg0: i32) -> (i32, i32) {
    %c0_i32 = arith.constant 0 : i32
    %c0_i32_0 = arith.constant 0 : i32
    %c0_i32_1 = arith.constant 0 : i32
    return %c0_i32, %c0_i32_0 : i32, i32
  }
  func.func @transform_4(%arg0: i32) -> (i32, i32) {
    %c0_i32 = arith.constant 0 : i32
    %c0_i32_0 = arith.constant 0 : i32
    %c0_i32_1 = arith.constant 0 : i32
    return %c0_i32, %c0_i32_0 : i32, i32
  }
  func.func @transform_5(%arg0: i32) -> (i32, i32) {
    %c0_i32 = arith.constant 0 : i32
    %c0_i32_0 = arith.constant 0 : i32
    %c0_i32_1 = arith.constant 0 : i32
    return %c0_i32, %c0_i32_0 : i32, i32
  }
  func.func @transform_6(%arg0: i32) -> (i32, i32) {
    %c0_i32 = arith.constant 0 : i32
    %c0_i32_0 = arith.constant 0 : i32
    return %c0_i32, %arg0 : i32, i32
  }
}

</mosaic_0001>

<bundles_post_ra>
// kernel: tpu_custom_call.1
= control target key start
LH: loop header
LB: loop body
LE: loop exit
PB: predicated region body
PF: predicated region fallthrough
CT: control target
= control target key end

     0   :  { %12 = vsyncpa [#allocation4], 0  ;;  %s4666_s0 = inlined_call_operand.vmem [shape: s32[1,128], index: 0, kind: input, shape index: {}]   ;;  %s4667_s1 = inlined_call_operand.vmem [shape: s32[1,128], index: 1, kind: input, shape index: {}]   ;;  %s4668_s2 = inlined_call_operand.vmem [shape: f32[32,32], index: 2, kind: input, shape index: {}]   ;;  %s4669_s3 = inlined_call_operand.hbm [shape: f32[32,40], index: 3, kind: input, shape index: {}]   ;;  %s4670_s4 = inlined_call_operand.vmem [shape: f32[32,1], index: 4, kind: input, shape index: {}]   ;;  %s4671_s5 = inlined_call_operand.<no memory space> [shape: f32[1,1], index: 5, kind: input, shape index: {}]   ;;  %s4672_s6 = inlined_call_operand.hbm [shape: f32[1,128], index: 6, kind: output, shape index: {}]  }
   0x1   :  { %13 = vsyncpa [#allocation5], 0  ;;  %s2294_s21 = smov [#allocation3]  }
   0x2   :  { %s25_s22 = sshll.u32 %s2294_s21, 4  ;;  %s26_s22 = int_to_ptr.vmem [resolvable:$true] %s25_s22 }
   0x3   :  { %s2258_s23 = scalar_lea.vmem %s26_s22, 512  ;;  %p2263_p1 = scmp.lt.s32.totalorder %s26_s22, %s26_s22 }
   0x4   :  { %p2259_p0 = scmp.ne.s32.totalorder %s26_s22, %s2258_s23  ;;  %p2264_p2 = scmp.lt.s32.totalorder %s2258_s23, %s2258_s23 }
   0x6   :  { %p2265_p3 = por %p2264_p2, %p2263_p1 }
   0x8   :  { %p2266_p4 = pnand %p2265_p3, %p2259_p0 }
   0xa   :  { %2269 = shalt.err (!%p2266_p4)
}
   0xb   :  { %s2295_s24 = smov 128   ;;  %s2296_s25 = smov 8  }
   0xc   :  { %31 = dma.hbm_to_vmem [thread:$0]  %s4669_s3, 512, %s26_s22, [#allocation4], %s2295_s24, %s2295_s24, %s2296_s25  }
   0xd   :  { %2290 = dma.done.wait [#allocation4], 512  }
   0xe   :  { %2291 = vsyncadd [#allocation4], 4294966784  ;;  %v4690_v0 = vmov 0   ;;  %v2381_v1 = vld [vmem:[%s4668_s2 + $0x10] sm:$0xff]  ;;  %v2386_v2 = vld [vmem:[%s4668_s2] sm:$0xff]  ;;  %v4689_v6 = vmov 1  }
   0xf   :  { %2112 = vset.pattern.permute.xlu1 %v4690_v0  ;;  %2111 = vset.pattern.permute.xlu0 %v4690_v0  ;;  %v2393_v3 = vld [vmem:[%s4668_s2 + $0x18] sm:$0xff]  ;;  %v2398_v4 = vld [vmem:[%s4668_s2 + $0x8] sm:$0xff]  ;;  %v4687_v7 = vmov 2   ;;  %v2413_v8 = vld [vmem:[#allocation3] sm:$0xff]  ;;  %v4686_v10 = vmov 3   ;;  %v4685_v11 = vmov 4  }
  0x10   :  { %64 = vperm.xlu1 %2112, %v2381_v1   ;;  %54 = vperm.xlu0 %2111, %v2386_v2   ;;  %v2402_v5 = vld [vmem:[#allocation3 + $0x8] sm:$0xff]  ;;  %v2417_v9 = vld [vmem:[#allocation3 + $0x18] sm:$0xff]  ;;  %v4684_v12 = vmov 5   ;;  %v4682_v13 = vmov 6   ;;  %v4681_v14 = vmov 7   ;;  %v4680_v15 = vmov 8  }
  0x11   :  { %v4679_v16 = vmov 9   ;;  %v4678_v17 = vmov 10   ;;  %v4677_v18 = vmov 11   ;;  %v4676_v22 = vmov 12   ;;  %s2337_s27 = smov [#allocation6]  }
  0x12   :  { %v4675_v28 = vmov 13   ;;  %v4673_v34 = vmov 14   ;;  %v4674_v40 = vmov 15   ;;  %v4683_v46 = vmov 16   ;;  %s2058_s28 = sshll.u32 %s2337_s27, 4  ;;  %s2059_s28 = int_to_ptr.vmem [resolvable:$true] %s2058_s28 }
  0x13   :  { %v4688_v53 = vmov 17   ;;  %v4700_v58 = vmov 18   ;;  %s2270_s29 = scalar_lea.vmem %s2059_s28, 16  ;;  %s2274_s30 = scalar_lea.vmem %s2059_s28, 32 }
  0x14   :  { %69 = vperm.xlu1 %2112, %v2393_v3   ;;  %59 = vperm.xlu0 %2111, %v2398_v4   ;;  %p2271_p5 = scmp.ne.s32.totalorder %s2059_s28, %s2270_s29  ;;  %p2275_p6 = scmp.lt.s32.totalorder %s2059_s28, %s2059_s28 }
  0x15   :  { %p2276_p7 = scmp.lt.s32.totalorder %s2274_s30, %s2270_s29 }
  0x17   :  { %p2277_p8 = por %p2276_p7, %p2275_p6 }
  0x18   :  { %2113 = vset.pattern.permute.xlu1 %v4689_v6  ;;  %931 = vperm.xlu0 %2111, %v2402_v5  }
  0x19   :  { %88 = vperm.xlu1 %2113, %v2398_v4   ;;  %p2278_p9 = pnand %p2277_p8, %p2271_p5 }
  0x1c   :  { %2145 = vset.pattern.permute.xlu0 %v4689_v6 }
  0x1d   :  { %92 = vperm.xlu1 %2113, %v2381_v1   ;;  %84 = vperm.xlu0 %2145, %v2386_v2  }
  0x21   :  { %2114 = vset.pattern.permute.xlu1 %v4687_v7  ;;  %96 = vperm.xlu0 %2145, %v2393_v3  }
  0x22   :  { %111 = vperm.xlu1 %2114, %v2386_v2  }
  0x25   :  { %956 = vperm.xlu0 %2145, %v2413_v8  }
  0x26   :  { %119 = vperm.xlu1 %2114, %v2381_v1  }
  0x29   :  { %968 = vperm.xlu0 %2145, %v2417_v9  }
  0x2a   :  { %123 = vperm.xlu1 %2114, %v2393_v3  }
  0x2d   :  { %2147 = vset.pattern.permute.xlu0 %v4687_v7 }
  0x2e   :  { %2115 = vset.pattern.permute.xlu1 %v4686_v10  ;;  %115 = vperm.xlu0 %2147, %v2398_v4  }
  0x2f   :  { %142 = vperm.xlu1 %2115, %v2398_v4  }
  0x32   :  { %987 = vperm.xlu0 %2147, %v2402_v5  }
  0x33   :  { %146 = vperm.xlu1 %2115, %v2381_v1  }
  0x36   :  { %2149 = vset.pattern.permute.xlu0 %v4686_v10  ;;  %v4694_v10 = vmov 21  }
  0x37   :  { %2116 = vset.pattern.permute.xlu1 %v4685_v11  ;;  %138 = vperm.xlu0 %2149, %v2386_v2  }
  0x38   :  { %165 = vperm.xlu1 %2116, %v2386_v2  }
  0x3b   :  { %150 = vperm.xlu0 %2149, %v2393_v3  }
  0x3c   :  { %173 = vperm.xlu1 %2116, %v2381_v1  }
  0x3f   :  { %1010 = vperm.xlu0 %2149, %v2413_v8  }
  0x40   :  { %177 = vperm.xlu1 %2116, %v2393_v3  }
  0x43   :  { %1022 = vperm.xlu0 %2149, %v2417_v9  }
  0x44   :  { %2117 = vset.pattern.permute.xlu1 %v4684_v12 }
  0x45   :  { %196 = vperm.xlu1 %2117, %v2398_v4  }
  0x47   :  { %2151 = vset.pattern.permute.xlu0 %v4685_v11 }
  0x48   :  { %169 = vperm.xlu0 %2151, %v2398_v4  }
  0x49   :  { %200 = vperm.xlu1 %2117, %v2381_v1  }
  0x4c   :  { %1041 = vperm.xlu0 %2151, %v2402_v5  }
  0x4d   :  { %2118 = vset.pattern.permute.xlu1 %v4682_v13 }
  0x4e   :  { %219 = vperm.xlu1 %2118, %v2386_v2  }
  0x50   :  { %2153 = vset.pattern.permute.xlu0 %v4684_v12 }
  0x51   :  { %192 = vperm.xlu0 %2153, %v2386_v2  }
  0x52   :  { %227 = vperm.xlu1 %2118, %v2381_v1  }
  0x55   :  { %204 = vperm.xlu0 %2153, %v2393_v3  }
  0x56   :  { %231 = vperm.xlu1 %2118, %v2393_v3  }
  0x59   :  { %1064 = vperm.xlu0 %2153, %v2413_v8  }
  0x5a   :  { %2119 = vset.pattern.permute.xlu1 %v4681_v14 }
  0x5b   :  { %250 = vperm.xlu1 %2119, %v2398_v4  }
  0x5d   :  { %1076 = vperm.xlu0 %2153, %v2417_v9  }
  0x5f   :  { %254 = vperm.xlu1 %2119, %v2381_v1  }
  0x61   :  { %2155 = vset.pattern.permute.xlu0 %v4682_v13 }
  0x62   :  { %223 = vperm.xlu0 %2155, %v2398_v4  }
  0x63   :  { %2120 = vset.pattern.permute.xlu1 %v4680_v15 }
  0x64   :  { %273 = vperm.xlu1 %2120, %v2386_v2  }
  0x66   :  { %1095 = vperm.xlu0 %2155, %v2402_v5  }
  0x68   :  { %281 = vperm.xlu1 %2120, %v2381_v1  }
  0x6a   :  { %2157 = vset.pattern.permute.xlu0 %v4681_v14 }
  0x6b   :  { %246 = vperm.xlu0 %2157, %v2386_v2  }
  0x6c   :  { %285 = vperm.xlu1 %2120, %v2393_v3  }
  0x6f   :  { %258 = vperm.xlu0 %2157, %v2393_v3  }
  0x70   :  { %2121 = vset.pattern.permute.xlu1 %v4679_v16 }
  0x71   :  { %304 = vperm.xlu1 %2121, %v2398_v4  }
  0x73   :  { %1118 = vperm.xlu0 %2157, %v2413_v8  }
  0x75   :  { %308 = vperm.xlu1 %2121, %v2381_v1  }
  0x77   :  { %1130 = vperm.xlu0 %2157, %v2417_v9  }
  0x79   :  { %2122 = vset.pattern.permute.xlu1 %v4678_v17 }
  0x7a   :  { %327 = vperm.xlu1 %2122, %v2386_v2  }
  0x7b   :  { %2159 = vset.pattern.permute.xlu0 %v4680_v15 }
  0x7c   :  { %277 = vperm.xlu0 %2159, %v2398_v4  }
  0x7e   :  { %335 = vperm.xlu1 %2122, %v2381_v1  }
  0x80   :  { %1149 = vperm.xlu0 %2159, %v2402_v5  }
  0x82   :  { %339 = vperm.xlu1 %2122, %v2393_v3  }
  0x84   :  { %2161 = vset.pattern.permute.xlu0 %v4679_v16  ;;  %v4692_v16 = vmov 20  }
  0x85   :  { %300 = vperm.xlu0 %2161, %v2386_v2  }
  0x86   :  { %2123 = vset.pattern.permute.xlu1 %v4677_v18 }
  0x87   :  { %358 = vperm.xlu1 %2123, %v2398_v4  }
  0x89   :  { %312 = vperm.xlu0 %2161, %v2393_v3  }
  0x8b   :  { %v2481_v19 = vpop.permute.xlu1 %64  ;;  %362 = vperm.xlu1 %2123, %v2381_v1   ;;  %v2484_v20 = vpop.permute.xlu0 %54 }
  0x8c   :  { %4800 = vst [vmem:[#allocation9_spill] sm:$0xff] %v2481_v19 }
  0x8d   :  { %1172 = vperm.xlu0 %2161, %v2413_v8  }
  0x8f   :  { %v2487_v21 = vpop.permute.xlu1 %69  ;;  %2124 = vset.pattern.permute.xlu1 %v4676_v22  ;;  %v2490_v23 = vpop.permute.xlu0 %59 }
  0x90   :  { %381 = vperm.xlu1 %2124, %v2386_v2  }
  0x91   :  { %1184 = vperm.xlu0 %2161, %v2417_v9  }
  0x93   :  { %v2494_v24 = vpop.permute.xlu0 %931 }
  0x94   :  { %4801 = vst [vmem:[#allocation10_spill] sm:$0xff] %v2494_v24  ;;  %v2496_v25 = vpop.permute.xlu1 %88  ;;  %389 = vperm.xlu1 %2124, %v2381_v1   ;;  %v4711_v24 = vmov 28  }
  0x95   :  { %2163 = vset.pattern.permute.xlu0 %v4678_v17 }
  0x96   :  { %331 = vperm.xlu0 %2163, %v2398_v4  }
  0x98   :  { %v2501_v26 = vpop.permute.xlu1 %92  ;;  %393 = vperm.xlu1 %2124, %v2393_v3   ;;  %v2504_v27 = vpop.permute.xlu0 %84 }
  0x99   :  { %4802 = vst [vmem:[#allocation11_spill] sm:$0xff] %v2501_v26  ;;  %v4831_v26 = vmov 20  }
  0x9a   :  { %1203 = vperm.xlu0 %2163, %v2402_v5  }
  0x9c   :  { %2125 = vset.pattern.permute.xlu1 %v4675_v28  ;;  %v2508_v29 = vpop.permute.xlu0 %96 }
  0x9d   :  { %412 = vperm.xlu1 %2125, %v2398_v4   ;;  %v2511_v30 = vpop.permute.xlu1 %111 }
  0x9e   :  { %2165 = vset.pattern.permute.xlu0 %v4677_v18 }
  0x9f   :  { %354 = vperm.xlu0 %2165, %v2386_v2  }
  0xa0   :  { %v2515_v31 = vpop.permute.xlu0 %956 }
  0xa1   :  { %4803 = vst [vmem:[#allocation12_spill] sm:$0xff] %v2515_v31  ;;  %416 = vperm.xlu1 %2125, %v2381_v1   ;;  %v2518_v32 = vpop.permute.xlu1 %119 }
  0xa2   :  { %4804 = vst [vmem:[#allocation13_spill] sm:$0xff] %v2518_v32 }
  0xa3   :  { %366 = vperm.xlu0 %2165, %v2393_v3  }
  0xa4   :  { %v2521_v33 = vpop.permute.xlu0 %968 }
  0xa5   :  { %4805 = vst [vmem:[#allocation14_spill] sm:$0xff] %v2521_v33  ;;  %2126 = vset.pattern.permute.xlu1 %v4673_v34  ;;  %v2524_v35 = vpop.permute.xlu1 %123 }
  0xa6   :  { %435 = vperm.xlu1 %2126, %v2386_v2  }
  0xa7   :  { %1226 = vperm.xlu0 %2165, %v2413_v8  }
  0xa9   :  { %v2528_v36 = vpop.permute.xlu0 %115 }
  0xaa   :  { %443 = vperm.xlu1 %2126, %v2381_v1   ;;  %v2531_v37 = vpop.permute.xlu1 %142 }
  0xab   :  { %1238 = vperm.xlu0 %2165, %v2417_v9  }
  0xad   :  { %v2534_v38 = vpop.permute.xlu0 %987 }
  0xae   :  { %4806 = vst [vmem:[#allocation15_spill] sm:$0xff] %v2534_v38  ;;  %447 = vperm.xlu1 %2126, %v2393_v3   ;;  %v2537_v39 = vpop.permute.xlu1 %146 }
  0xaf   :  { %4807 = vst [vmem:[#allocation16_spill] sm:$0xff] %v2537_v39  ;;  %2167 = vset.pattern.permute.xlu0 %v4676_v22  ;;  %v4703_v39 = vmov 24  }
  0xb0   :  { %385 = vperm.xlu0 %2167, %v2398_v4  }
  0xb2   :  { %2127 = vset.pattern.permute.xlu1 %v4674_v40  ;;  %v2542_v41 = vpop.permute.xlu0 %138 }
  0xb3   :  { %466 = vperm.xlu1 %2127, %v2398_v4   ;;  %v2545_v42 = vpop.permute.xlu1 %165 }
  0xb4   :  { %1257 = vperm.xlu0 %2167, %v2402_v5  }
  0xb6   :  { %v2548_v43 = vpop.permute.xlu0 %150 }
  0xb7   :  { %470 = vperm.xlu1 %2127, %v2381_v1   ;;  %v2551_v44 = vpop.permute.xlu1 %173 }
  0xb8   :  { %4808 = vst [vmem:[#allocation17_spill] sm:$0xff] %v2551_v44  ;;  %2169 = vset.pattern.permute.xlu0 %v4675_v28 }
  0xb9   :  { %408 = vperm.xlu0 %2169, %v2386_v2  }
  0xba   :  { %v2555_v45 = vpop.permute.xlu0 %1010 }
  0xbb   :  { %4809 = vst [vmem:[#allocation18_spill] sm:$0xff] %v2555_v45  ;;  %2128 = vset.pattern.permute.xlu1 %v4683_v46  ;;  %v2558_v47 = vpop.permute.xlu1 %177 }
  0xbc   :  { %489 = vperm.xlu1 %2128, %v2386_v2  }
  0xbd   :  { %420 = vperm.xlu0 %2169, %v2393_v3  }
  0xbe   :  { %v2562_v48 = vpop.permute.xlu0 %1022 }
  0xbf   :  { %4810 = vst [vmem:[#allocation19_spill] sm:$0xff] %v2562_v48 }
  0xc0   :  { %497 = vperm.xlu1 %2128, %v2381_v1   ;;  %v2565_v49 = vpop.permute.xlu1 %196 }
  0xc1   :  { %1280 = vperm.xlu0 %2169, %v2413_v8  }
  0xc3   :  { %v2568_v50 = vpop.permute.xlu0 %169 }
  0xc4   :  { %501 = vperm.xlu1 %2128, %v2393_v3   ;;  %v2571_v51 = vpop.permute.xlu1 %200 }
  0xc5   :  { %4811 = vst [vmem:[#allocation20_spill] sm:$0xff] %v2571_v51  ;;  %1292 = vperm.xlu0 %2169, %v2417_v9  }
  0xc7   :  { %v2574_v52 = vpop.permute.xlu0 %1041 }
  0xc8   :  { %4812 = vst [vmem:[#allocation21_spill] sm:$0xff] %v2574_v52  ;;  %2129 = vset.pattern.permute.xlu1 %v4688_v53 }
  0xc9   :  { %520 = vperm.xlu1 %2129, %v2398_v4   ;;  %v2578_v54 = vpop.permute.xlu1 %219  ;;  %2171 = vset.pattern.permute.xlu0 %v4673_v34 }
  0xca   :  { %439 = vperm.xlu0 %2171, %v2398_v4  }
  0xcc   :  { %v2582_v55 = vpop.permute.xlu0 %192 }
  0xcd   :  { %524 = vperm.xlu1 %2129, %v2381_v1   ;;  %v2585_v56 = vpop.permute.xlu1 %227 }
  0xce   :  { %4813 = vst [vmem:[#allocation22_spill] sm:$0xff] %v2585_v56  ;;  %1311 = vperm.xlu0 %2171, %v2402_v5  }
  0xd0   :  { %v2588_v57 = vpop.permute.xlu0 %204 }
  0xd1   :  { %2130 = vset.pattern.permute.xlu1 %v4700_v58  ;;  %v2591_v59 = vpop.permute.xlu1 %231 }
  0xd2   :  { %543 = vperm.xlu1 %2130, %v2386_v2   ;;  %2173 = vset.pattern.permute.xlu0 %v4674_v40  ;;  %v4696_v40 = vmov 19  }
  0xd3   :  { %462 = vperm.xlu0 %2173, %v2386_v2  }
  0xd4   :  { %v2596_v60 = vpop.permute.xlu0 %1064 }
  0xd5   :  { %4814 = vst [vmem:[#allocation23_spill] sm:$0xff] %v2596_v60  ;;  %v4845_v60 = vmov 23  }
  0xd6   :  { %551 = vperm.xlu1 %2130, %v2381_v1   ;;  %v2599_v61 = vpop.permute.xlu1 %250 }
  0xd7   :  { %474 = vperm.xlu0 %2173, %v2393_v3  }
  0xd8   :  { %v2602_v62 = vpop.permute.xlu0 %1076 }
  0xd9   :  { %4815 = vst [vmem:[#allocation24_spill] sm:$0xff] %v2602_v62 }
  0xda   :  { %555 = vperm.xlu1 %2130, %v2393_v3   ;;  %v2605_v63 = vpop.permute.xlu1 %254 }
  0xdb   :  { %4816 = vst [vmem:[#allocation25_spill] sm:$0xff] %v2605_v63  ;;  %1334 = vperm.xlu0 %2173, %v2413_v8   ;;  %v4701_v63 = vmov 23  }
  0xdd   :  { %v2608_v34 = vpop.permute.xlu0 %223 }
  0xde   :  { %2131 = vset.pattern.permute.xlu1 %v4696_v40 }
  0xdf   :  { %574 = vperm.xlu1 %2131, %v2398_v4   ;;  %v2612_v28 = vpop.permute.xlu1 %273  ;;  %1346 = vperm.xlu0 %2173, %v2417_v9  }
  0xe1   :  { %v2615_v22 = vpop.permute.xlu0 %1095 }
  0xe2   :  { %4817 = vst [vmem:[#allocation26_spill] sm:$0xff] %v2615_v22 }
  0xe3   :  { %578 = vperm.xlu1 %2131, %v2381_v1   ;;  %v2618_v18 = vpop.permute.xlu1 %281  ;;  %2175 = vset.pattern.permute.xlu0 %v4683_v46 }
  0xe4   :  { %4818 = vst [vmem:[#allocation27_spill] sm:$0xff] %v2618_v18  ;;  %493 = vperm.xlu0 %2175, %v2398_v4   ;;  %v4825_v18 = vmov 19  }
  0xe6   :  { %v2622_v17 = vpop.permute.xlu0 %246 }
  0xe7   :  { %2132 = vset.pattern.permute.xlu1 %v4692_v16  ;;  %v2625_v15 = vpop.permute.xlu1 %285  ;;  %v4698_v16 = vmov 22  }
  0xe8   :  { %597 = vperm.xlu1 %2132, %v2386_v2   ;;  %1365 = vperm.xlu0 %2175, %v2402_v5  }
  0xea   :  { %v2629_v14 = vpop.permute.xlu0 %258 }
  0xec   :  { %605 = vperm.xlu1 %2132, %v2381_v1   ;;  %v2632_v13 = vpop.permute.xlu1 %304  ;;  %2177 = vset.pattern.permute.xlu0 %v4688_v53 }
  0xed   :  { %516 = vperm.xlu0 %2177, %v2386_v2  }
  0xee   :  { %v2636_v46 = vpop.permute.xlu0 %1118 }
  0xef   :  { %4819 = vst [vmem:[#allocation28_spill] sm:$0xff] %v2636_v46  ;;  %v4709_v46 = vmov 27  }
  0xf0   :  { %609 = vperm.xlu1 %2132, %v2393_v3   ;;  %v2639_v12 = vpop.permute.xlu1 %308 }
  0xf1   :  { %4820 = vst [vmem:[#allocation29_spill] sm:$0xff] %v2639_v12  ;;  %528 = vperm.xlu0 %2177, %v2393_v3  }
  0xf2   :  { %v2642_v11 = vpop.permute.xlu0 %1130 }
  0xf3   :  { %4821 = vst [vmem:[#allocation30_spill] sm:$0xff] %v2642_v11 }
  0xf4   :  { %2133 = vset.pattern.permute.xlu1 %v4694_v10 }
  0xf5   :  { %628 = vperm.xlu1 %2133, %v2398_v4   ;;  %v2646_v7 = vpop.permute.xlu1 %327  ;;  %1388 = vperm.xlu0 %2177, %v2413_v8  }
  0xf7   :  { %v2649_v53 = vpop.permute.xlu0 %277 }
  0xf9   :  { %632 = vperm.xlu1 %2133, %v2381_v1   ;;  %v2652_v6 = vpop.permute.xlu1 %335  ;;  %1400 = vperm.xlu0 %2177, %v2417_v9  }
  0xfa   :  { %4822 = vst [vmem:[#allocation31_spill] sm:$0xff] %v2652_v6 }
  0xfb   :  { %v2655_v0 = vpop.permute.xlu0 %1149 }
  0xfc   :  { %4823 = vst [vmem:[#allocation32_spill] sm:$0xff] %v2655_v0 }
  0xfd   :  { %2134 = vset.pattern.permute.xlu1 %v4698_v16  ;;  %v2658_v10 = vpop.permute.xlu1 %339  ;;  %2179 = vset.pattern.permute.xlu0 %v4700_v58 }
  0xfe   :  { %651 = vperm.xlu1 %2134, %v2386_v2   ;;  %547 = vperm.xlu0 %2179, %v2398_v4  }
 0x100   :  { %v2663_v40 = vpop.permute.xlu0 %300 }
 0x102   :  { %659 = vperm.xlu1 %2134, %v2381_v1   ;;  %v2666_v6 = vpop.permute.xlu1 %358  ;;  %1419 = vperm.xlu0 %2179, %v2402_v5  }
 0x104   :  { %v2669_v12 = vpop.permute.xlu0 %312 }
 0x106   :  { %663 = vperm.xlu1 %2134, %v2393_v3   ;;  %v2672_v16 = vpop.permute.xlu1 %362  ;;  %2181 = vset.pattern.permute.xlu0 %v4825_v18 }
 0x107   :  { %4824 = vst [vmem:[#allocation33_spill] sm:$0xff] %v2672_v16  ;;  %570 = vperm.xlu0 %2181, %v2386_v2  }
 0x108   :  { %v2676_v58 = vpop.permute.xlu0 %1172 }
 0x109   :  { %4826 = vst [vmem:[#allocation34_spill] sm:$0xff] %v2676_v58  ;;  %v4707_v58 = vmov 26  }
 0x10a   :  { %2135 = vset.pattern.permute.xlu1 %v4701_v63 }
 0x10b   :  { %682 = vperm.xlu1 %2135, %v2398_v4   ;;  %v2680_v56 = vpop.permute.xlu1 %381  ;;  %582 = vperm.xlu0 %2181, %v2393_v3  }
 0x10c   :  { %v2683_v51 = vpop.permute.xlu0 %1184 }
 0x10d   :  { %4827 = vst [vmem:[#allocation35_spill] sm:$0xff] %v2683_v51  ;;  %v4705_v51 = vmov 25  }
 0x10f   :  { %686 = vperm.xlu1 %2135, %v2381_v1   ;;  %v2686_v16 = vpop.permute.xlu1 %389  ;;  %1442 = vperm.xlu0 %2181, %v2413_v8  }
 0x110   :  { %4828 = vst [vmem:[#allocation36_spill] sm:$0xff] %v2686_v16 }
 0x111   :  { %v2689_v44 = vpop.permute.xlu0 %331 }
 0x113   :  { %2136 = vset.pattern.permute.xlu1 %v4703_v39  ;;  %v2692_v63 = vpop.permute.xlu1 %393  ;;  %1454 = vperm.xlu0 %2181, %v2417_v9  }
 0x114   :  { %4829 = vst [vmem:[#allocation37_spill] sm:$0xff] %v2692_v63  ;;  %705 = vperm.xlu1 %2136, %v2386_v2  }
 0x115   :  { %v2696_v32 = vpop.permute.xlu0 %1203 }
 0x116   :  { %4830 = vst [vmem:[#allocation38_spill] sm:$0xff] %v2696_v32  ;;  %v4833_v32 = vmov 21  }
 0x117   :  { %2183 = vset.pattern.permute.xlu0 %v4831_v26  ;;  %v4715_v26 = vmov 30  }
 0x118   :  { %713 = vperm.xlu1 %2136, %v2381_v1   ;;  %v2700_v16 = vpop.permute.xlu1 %412  ;;  %601 = vperm.xlu0 %2183, %v2398_v4  }
 0x11a   :  { %v2703_v19 = vpop.permute.xlu0 %354 }
 0x11c   :  { %717 = vperm.xlu1 %2136, %v2393_v3   ;;  %v2706_v39 = vpop.permute.xlu1 %416  ;;  %1473 = vperm.xlu0 %2183, %v2402_v5  }
 0x11d   :  { %4832 = vst [vmem:[#allocation39_spill] sm:$0xff] %v2706_v39 }
 0x11e   :  { %v2709_v0 = vpop.permute.xlu0 %366 }
 0x120   :  { %2137 = vset.pattern.permute.xlu1 %v4705_v51  ;;  %2185 = vset.pattern.permute.xlu0 %v4833_v32 }
 0x121   :  { %736 = vperm.xlu1 %2137, %v2398_v4   ;;  %v2714_v22 = vpop.permute.xlu1 %435  ;;  %624 = vperm.xlu0 %2185, %v2386_v2  }
 0x122   :  { %4834 = vst [vmem:[#allocation40_spill] sm:$0xff] %v2714_v22  ;;  %v2717_v11 = vpop.permute.xlu0 %1226  ;;  %v4882_v22 = vmov 28  }
 0x123   :  { %4835 = vst [vmem:[#allocation41_spill] sm:$0xff] %v2717_v11 }
 0x125   :  { %740 = vperm.xlu1 %2137, %v2381_v1   ;;  %v2720_v39 = vpop.permute.xlu1 %443  ;;  %636 = vperm.xlu0 %2185, %v2393_v3  }
 0x126   :  { %4836 = vst [vmem:[#allocation42_spill] sm:$0xff] %v2720_v39  ;;  %v2723_v52 = vpop.permute.xlu0 %1238 }
 0x127   :  { %4837 = vst [vmem:[#allocation43_spill] sm:$0xff] %v2723_v52  ;;  %v4840_v52 = vmov 22  }
 0x129   :  { %2138 = vset.pattern.permute.xlu1 %v4707_v58  ;;  %v2726_v51 = vpop.permute.xlu1 %447  ;;  %1496 = vperm.xlu0 %2185, %v2413_v8  }
 0x12a   :  { %4838 = vst [vmem:[#allocation44_spill] sm:$0xff] %v2726_v51  ;;  %759 = vperm.xlu1 %2138, %v2386_v2  }
 0x12b   :  { %v2730_v62 = vpop.permute.xlu0 %385 }
 0x12d   :  { %1508 = vperm.xlu0 %2185, %v2417_v9  }
 0x12e   :  { %767 = vperm.xlu1 %2138, %v2381_v1   ;;  %v2734_v39 = vpop.permute.xlu1 %466 }
 0x12f   :  { %v2736_v11 = vpop.permute.xlu0 %1257 }
 0x130   :  { %4839 = vst [vmem:[#allocation45_spill] sm:$0xff] %v2736_v11 }
 0x131   :  { %2187 = vset.pattern.permute.xlu0 %v4840_v52  ;;  %v4713_v52 = vmov 29  }
 0x132   :  { %771 = vperm.xlu1 %2138, %v2393_v3   ;;  %v2740_v58 = vpop.permute.xlu1 %470  ;;  %655 = vperm.xlu0 %2187, %v2398_v4  }
 0x133   :  { %4841 = vst [vmem:[#allocation46_spill] sm:$0xff] %v2740_v58 }
 0x134   :  { %v2743_v38 = vpop.permute.xlu0 %408 }
 0x135   :  { %4842 = vst [vmem:[#allocation47_spill] sm:$0xff] %v2743_v38 }
 0x136   :  { %2139 = vset.pattern.permute.xlu1 %v4709_v46  ;;  %1527 = vperm.xlu0 %2187, %v2402_v5  }
 0x137   :  { %790 = vperm.xlu1 %2139, %v2398_v4   ;;  %v2748_v48 = vpop.permute.xlu1 %489 }
 0x138   :  { %4843 = vst [vmem:[#allocation48_spill] sm:$0xff] %v2748_v48  ;;  %v2750_v11 = vpop.permute.xlu0 %420  ;;  %v4869_v48 = vmov 0  }
 0x139   :  { %4844 = vst [vmem:[#allocation49_spill] sm:$0xff] %v2750_v11 }
 0x13a   :  { %2189 = vset.pattern.permute.xlu0 %v4845_v60  ;;  %v4853_v60 = vmov 24  }
 0x13b   :  { %794 = vperm.xlu1 %2139, %v2381_v1   ;;  %v2754_v58 = vpop.permute.xlu1 %497  ;;  %678 = vperm.xlu0 %2189, %v2386_v2  }
 0x13c   :  { %4846 = vst [vmem:[#allocation50_spill] sm:$0xff] %v2754_v58  ;;  %v2757_v33 = vpop.permute.xlu0 %1280 }
 0x13d   :  { %4847 = vst [vmem:[#allocation51_spill] sm:$0xff] %v2757_v33 }
 0x13f   :  { %2140 = vset.pattern.permute.xlu1 %v4711_v24  ;;  %v2760_v46 = vpop.permute.xlu1 %501  ;;  %690 = vperm.xlu0 %2189, %v2393_v3  }
 0x140   :  { %4848 = vst [vmem:[#allocation52_spill] sm:$0xff] %v2760_v46  ;;  %813 = vperm.xlu1 %2140, %v2386_v2   ;;  %v2764_v45 = vpop.permute.xlu0 %1292 }
 0x141   :  { %4849 = vst [vmem:[#allocation53_spill] sm:$0xff] %v2764_v45 }
 0x143   :  { %1550 = vperm.xlu0 %2189, %v2413_v8  }
 0x144   :  { %821 = vperm.xlu1 %2140, %v2381_v1   ;;  %v2768_v58 = vpop.permute.xlu1 %520 }
 0x145   :  { %4850 = vst [vmem:[#allocation54_spill] sm:$0xff] %v2768_v58  ;;  %v2770_v31 = vpop.permute.xlu0 %439  ;;  %v4888_v58 = vmov 0 }
 0x147   :  { %1562 = vperm.xlu0 %2189, %v2417_v9  }
 0x148   :  { %825 = vperm.xlu1 %2140, %v2393_v3   ;;  %v2774_v24 = vpop.permute.xlu1 %524 }
 0x149   :  { %4851 = vst [vmem:[#allocation55_spill] sm:$0xff] %v2774_v24  ;;  %v2776_v33 = vpop.permute.xlu0 %1311 }
 0x14a   :  { %4852 = vst [vmem:[#allocation56_spill] sm:$0xff] %v2776_v33 }
 0x14b   :  { %2191 = vset.pattern.permute.xlu0 %v4853_v60  ;;  %v4858_v60 = vmov 25  }
 0x14c   :  { %2141 = vset.pattern.permute.xlu1 %v4713_v52  ;;  %709 = vperm.xlu0 %2191, %v2398_v4  }
 0x14d   :  { %844 = vperm.xlu1 %2141, %v2398_v4   ;;  %v2782_v45 = vpop.permute.xlu1 %543 }
 0x14e   :  { %4854 = vst [vmem:[#allocation57_spill] sm:$0xff] %v2782_v45  ;;  %v2784_v32 = vpop.permute.xlu0 %462 }
 0x14f   :  { %4855 = vst [vmem:[#allocation58_spill] sm:$0xff] %v2784_v32 }
 0x150   :  { %1581 = vperm.xlu0 %2191, %v2402_v5  }
 0x151   :  { %848 = vperm.xlu1 %2141, %v2381_v1   ;;  %v2788_v24 = vpop.permute.xlu1 %551 }
 0x152   :  { %4856 = vst [vmem:[#allocation59_spill] sm:$0xff] %v2788_v24  ;;  %v2790_v33 = vpop.permute.xlu0 %474 }
 0x153   :  { %4857 = vst [vmem:[#allocation60_spill] sm:$0xff] %v2790_v33 }
 0x154   :  { %2193 = vset.pattern.permute.xlu0 %v4858_v60 }
 0x155   :  { %2142 = vset.pattern.permute.xlu1 %v4715_v26  ;;  %v2794_v52 = vpop.permute.xlu1 %555  ;;  %732 = vperm.xlu0 %2193, %v2386_v2  }
 0x156   :  { %4859 = vst [vmem:[#allocation61_spill] sm:$0xff] %v2794_v52  ;;  %867 = vperm.xlu1 %2142, %v2386_v2   ;;  %v2798_v18 = vpop.permute.xlu0 %1334  ;;  %v4717_v52 = vmov 31  }
 0x157   :  { %4860 = vst [vmem:[#allocation62_spill] sm:$0xff] %v2798_v18 }
 0x159   :  { %744 = vperm.xlu0 %2193, %v2393_v3  }
 0x15a   :  { %875 = vperm.xlu1 %2142, %v2381_v1   ;;  %v2802_v24 = vpop.permute.xlu1 %574  ;;  %v2804_v45 = vpop.permute.xlu0 %1346 }
 0x15b   :  { %4861 = vst [vmem:[#allocation63_spill] sm:$0xff] %v2802_v24  ;;  %4862 = vst [vmem:[#allocation64_spill] sm:$0xff] %v2804_v45  ;;  %v4866_v45 = vmov 26  }
 0x15d   :  { %1604 = vperm.xlu0 %2193, %v2413_v8  }
 0x15e   :  { %879 = vperm.xlu1 %2142, %v2393_v3   ;;  %v2808_v26 = vpop.permute.xlu1 %578 }
 0x15f   :  { %4863 = vst [vmem:[#allocation65_spill] sm:$0xff] %v2808_v26  ;;  %v2810_v60 = vpop.permute.xlu0 %493 }
 0x161   :  { %1616 = vperm.xlu0 %2193, %v2417_v9  }
 0x162   :  { %2143 = vset.pattern.permute.xlu1 %v4717_v52 }
 0x163   :  { %898 = vperm.xlu1 %2143, %v2398_v4   ;;  %v2815_v18 = vpop.permute.xlu1 %597  ;;  %v2817_v46 = vpop.permute.xlu0 %1365 }
 0x164   :  { %4864 = vst [vmem:[#allocation66_spill] sm:$0xff] %v2815_v18  ;;  %4865 = vst [vmem:[#allocation67_spill] sm:$0xff] %v2817_v46  ;;  %v2833_v46 = vld [vmem:[#allocation3 + $0x10] sm:$0xff] }
 0x165   :  { %2195 = vset.pattern.permute.xlu0 %v4866_v45  ;;  %v4872_v45 = vmov 27  }
 0x166   :  { %763 = vperm.xlu0 %2195, %v2398_v4  }
 0x167   :  { %902 = vperm.xlu1 %2143, %v2381_v1   ;;  %v2822_v26 = vpop.permute.xlu1 %605 }
 0x168   :  { %4867 = vst [vmem:[#allocation68_spill] sm:$0xff] %v2822_v26  ;;  %v2824_v33 = vpop.permute.xlu0 %516 }
 0x169   :  { %4868 = vst [vmem:[#allocation69_spill] sm:$0xff] %v2824_v33  ;;  %v47_v33 = vlaneseq }
 0x16a   :  { %1635 = vperm.xlu0 %2195, %v2402_v5  }
 0x16b   :  { %2144 = vset.pattern.permute.xlu1 %v4869_v48  ;;  %v2828_v52 = vpop.permute.xlu1 %609  ;;  %v48_v51 = vshrl.u32 %v47_v33, 7 }
 0x16c   :  { %4870 = vst [vmem:[#allocation70_spill] sm:$0xff] %v2828_v52  ;;  %926 = vperm.xlu1 %2144, %v2413_v8   ;;  %v2831_v18 = vpop.permute.xlu0 %528  ;;  %v2846_v52 = vld [vmem:[%s4666_s0] sm:$0x1] }
 0x16d   :  { %4871 = vst [vmem:[#allocation71_spill] sm:$0xff] %v2831_v18  ;;  %vm41_vm0 = vcmp.eq.s32.totalorder %v2846_v52, 0  ;;  %vm76_vm1 = vcmp.eq.s32.totalorder %v2846_v52, 1  ;;  %vm103_vm2 = vcmp.eq.s32.totalorder %v2846_v52, 2  ;;  %vm130_vm3 = vcmp.eq.s32.totalorder %v2846_v52, 3 }
 0x16e   :  { %2197 = vset.pattern.permute.xlu0 %v4872_v45  ;;  %v77_v33 = vsel %vm76_vm1, 1, %v4869_v48  ;;  %v104_v11 = vsel %vm103_vm2, 1, %v4869_v48  ;;  %vm157_vm4 = vcmp.eq.s32.totalorder %v2846_v52, 4  ;;  %vm184_vm5 = vcmp.eq.s32.totalorder %v2846_v52, 5 }
 0x16f   :  { %786 = vperm.xlu0 %2197, %v2386_v2   ;;  %vm211_vm8 = vcmp.eq.s32.totalorder %v2846_v52, 6  ;;  %vm238_vm10 = vcmp.eq.s32.totalorder %v2846_v52, 7  ;;  %vm265_vm12 = vcmp.eq.s32.totalorder %v2846_v52, 8  ;;  %vm292_vm14 = vcmp.eq.s32.totalorder %v2846_v52, 9 }
 0x170   :  { %936 = vperm.xlu1 %2144, %v2833_v46   ;;  %v2838_v1 = vpop.permute.xlu1 %628  ;;  %v2840_v26 = vpop.permute.xlu0 %1388  ;;  %vm319_vm15 = vcmp.eq.s32.totalorder %v2846_v52, 10  ;;  %vm346_vm2 = vcmp.eq.s32.totalorder %v2846_v52, 11 }
 0x171   :  { %4873 = vst [vmem:[#allocation72_spill] sm:$0xff] %v2838_v1  ;;  %4874 = vst [vmem:[#allocation73_spill] sm:$0xff] %v2840_v26  ;;  %v4877_v26 = vmov 1   ;;  %v2857_v1 = vsub.s32 0, %v48_v51 }
 0x173   :  { %798 = vperm.xlu0 %2197, %v2393_v3  }
 0x174   :  { %941 = vperm.xlu1 %2144, %v2417_v9   ;;  %v2849_v18 = vpop.permute.xlu1 %632  ;;  %v2851_v45 = vpop.permute.xlu0 %1400 }
 0x175   :  { %4875 = vst [vmem:[#allocation74_spill] sm:$0xff] %v2849_v18  ;;  %4876 = vst [vmem:[#allocation75_spill] sm:$0xff] %v2851_v45  ;;  %v46_v18 = vsel %vm41_vm0, 1, %v4869_v48 }
 0x177   :  { %1658 = vperm.xlu0 %2197, %v2413_v8  }
 0x178   :  { %2146 = vset.pattern.permute.xlu1 %v4877_v26  ;;  %v50_v26 = vrot.slane %v46_v18, %v2857_v1  ;;  %v4883_v18 = vmov 0 }
 0x179   :  { %960 = vperm.xlu1 %2146, %v2402_v5   ;;  %v2860_v24 = vpop.permute.xlu1 %651  ;;  %v2862_v32 = vpop.permute.xlu0 %547 }
 0x17a   :  { %4878 = vst [vmem:[#allocation76_spill] sm:$0xff] %v2860_v24  ;;  %4879 = vst [vmem:[#allocation77_spill] sm:$0xff] %v2862_v32  ;;  %v81_v24 = vrot.slane %v77_v33, %v2857_v1  ;;  %v131_v32 = vsel %vm130_vm3, 1, %v4869_v48  ;;  %vm2882_vm6 = vcmp.eq.s32.totalorder %v50_v26, 1  ;;  %v158_v33 = vsel %vm157_vm4, 1, %v4869_v48 }
 0x17b   :  { %1670 = vperm.xlu0 %2197, %v2417_v9   ;;  %v4884_v18 = vsel %vm2882_vm6, 4294967295, %v4883_v18  ;;  %v135_v26 = vrot.slane %v131_v32, %v2857_v1  ;;  %v212_v32 = vsel %vm211_vm8, 1, %v4869_v48  ;;  %vm373_vm3 = vcmp.eq.s32.totalorder %v2846_v52, 12 }
 0x17c   :  { %4885 = vst [vmem:[#allocation80_spill] sm:$0xff] %v4884_v18  ;;  %vm2894_vm7 = vcmp.eq.s32.totalorder %v81_v24, 1  ;;  %v4892_v24 = vmov 0  ;;  %vm400_vm8 = vcmp.eq.s32.totalorder %v2846_v52, 13  ;;  %v5059_v18 = vmov 24  }
 0x17d   :  { %964 = vperm.xlu1 %2146, %v2833_v46   ;;  %v2871_v51 = vpop.permute.xlu1 %659  ;;  %v2873_v45 = vpop.permute.xlu0 %1419  ;;  %v4889_v58 = vsel %vm2894_vm7, 4294967295, %v4888_v58  ;;  %vm2918_vm11 = vcmp.eq.s32.totalorder %v135_v26, 1  ;;  %v216_v26 = vrot.slane %v212_v32, %v2857_v1 }
 0x17e   :  { %4880 = vst [vmem:[#allocation78_spill] sm:$0xff] %v2871_v51  ;;  %4881 = vst [vmem:[#allocation79_spill] sm:$0xff] %v2873_v45  ;;  %v108_v51 = vrot.slane %v104_v11, %v2857_v1  ;;  %v4886_v45 = vmov 2  }
 0x17f   :  { %2199 = vset.pattern.permute.xlu0 %v4882_v22  ;;  %v73_v22 = vsel %vm2882_vm6, %v2490_v23, 0.0  ;;  %4890 = vst [vmem:[#allocation82_spill] sm:$0xff] %v4889_v58  ;;  %vm2965_vm1 = vcmp.eq.s32.totalorder %v216_v26, 1 }
 0x180   :  { %817 = vperm.xlu0 %2199, %v2398_v4   ;;  %v100_v23 = vsel %vm2894_vm7, %v2496_v25, %v73_v22  ;;  %vm2909_vm9 = vcmp.eq.s32.totalorder %v108_v51, 1  ;;  %v72_v51 = vsel %vm2882_vm6, %v2484_v20, 0.0 }
 0x181   :  { %2148 = vset.pattern.permute.xlu1 %v4886_v45  ;;  %v2889_v63 = vpop.permute.xlu1 %663  ;;  %v185_v45 = vsel %vm184_vm5, 1, %v4869_v48  ;;  %v4893_v24 = vsel %vm2909_vm9, 4294967295, %v4892_v24 }
 0x182   :  { %4887 = vst [vmem:[#allocation81_spill] sm:$0xff] %v2889_v63  ;;  %983 = vperm.xlu1 %2148, %v2413_v8   ;;  %v2901_v11 = vpop.permute.xlu0 %570  ;;  %v162_v63 = vrot.slane %v158_v33, %v2857_v1  ;;  %4894 = vst [vmem:[#allocation84_spill] sm:$0xff] %v4893_v24  ;;  %v4895_v33 = vmov 0  ;;  %v189_v38 = vrot.slane %v185_v45, %v2857_v1  ;;  %v239_v45 = vsel %vm238_vm10, 1, %v4869_v48 }
 0x183   :  { %4891 = vst [vmem:[#allocation83_spill] sm:$0xff] %v2901_v11  ;;  %v127_v11 = vsel %vm2909_vm9, %v2528_v36, %v100_v23  ;;  %v4896_v33 = vsel %vm2918_vm11, 4294967295, %v4895_v33  ;;  %v4900_v36 = vmov 0  ;;  %v4903_v23 = vmov 29  }
 0x184   :  { %1689 = vperm.xlu0 %2199, %v2402_v5   ;;  %4897 = vst [vmem:[#allocation85_spill] sm:$0xff] %v4896_v33  ;;  %vm2932_vm13 = vcmp.eq.s32.totalorder %v162_v63, 1  ;;  %vm2949_vm0 = vcmp.eq.s32.totalorder %v189_v38, 1  ;;  %v4904_v63 = vmov 0  ;;  %v320_v38 = vsel %vm319_vm15, 1, %v4869_v48 }
 0x185   :  { %v4901_v36 = vsel %vm2932_vm13, 4294967295, %v4900_v36  ;;  %v4905_v63 = vsel %vm2949_vm0, 4294967295, %v4904_v63  ;;  %vm427_vm10 = vcmp.eq.s32.totalorder %v2846_v52, 14  ;;  %vm454_vm15 = vcmp.eq.s32.totalorder %v2846_v52, 15 }
 0x186   :  { %991 = vperm.xlu1 %2148, %v2833_v46   ;;  %v2925_v22 = vpop.permute.xlu1 %682  ;;  %v2927_v25 = vpop.permute.xlu0 %582  ;;  %4902 = vst [vmem:[#allocation88_spill] sm:$0xff] %v4901_v36  ;;  %4906 = vst [vmem:[#allocation89_spill] sm:$0xff] %v4905_v63  ;;  %v4767_v63 = vmov 35   ;;  %v5058_v24 = vmov 23  }
 0x187   :  { %4898 = vst [vmem:[#allocation86_spill] sm:$0xff] %v2925_v22  ;;  %4899 = vst [vmem:[#allocation87_spill] sm:$0xff] %v2927_v25  ;;  %v154_v22 = vsel %vm2918_vm11, %v2531_v37, %v127_v11  ;;  %v266_v25 = vsel %vm265_vm12, 1, %v4869_v48  ;;  %v99_v11 = vsel %vm2894_vm7, %v2504_v27, %v72_v51  ;;  %v4912_v51 = vmov 3  }
 0x188   :  { %2201 = vset.pattern.permute.xlu0 %v4903_v23  ;;  %v181_v20 = vsel %vm2932_vm13, %v2568_v50, %v154_v22  ;;  %v270_v23 = vrot.slane %v266_v25, %v2857_v1  ;;  %v293_v50 = vsel %vm292_vm14, 1, %v4869_v48  ;;  %v4909_v22 = vmov 0 }
 0x189   :  { %840 = vperm.xlu0 %2201, %v2386_v2   ;;  %v243_v2 = vrot.slane %v239_v45, %v2857_v1  ;;  %v4910_v22 = vsel %vm2965_vm1, 4294967295, %v4909_v22  ;;  %v126_v27 = vsel %vm2909_vm9, %v2511_v30, %v99_v11  ;;  %v324_v30 = vrot.slane %v320_v38, %v2857_v1 }
 0x18a   :  { %995 = vperm.xlu1 %2148, %v2417_v9   ;;  %v2954_v32 = vpop.permute.xlu1 %686  ;;  %v2956_v37 = vpop.permute.xlu0 %1442  ;;  %4911 = vst [vmem:[#allocation92_spill] sm:$0xff] %v4910_v22  ;;  %vm2996_vm5 = vcmp.eq.s32.totalorder %v270_v23, 1  ;;  %v374_v11 = vsel %vm373_vm3, 1, %v4869_v48 }
 0x18b   :  { %4907 = vst [vmem:[#allocation90_spill] sm:$0xff] %v2954_v32  ;;  %4908 = vst [vmem:[#allocation91_spill] sm:$0xff] %v2956_v37  ;;  %v208_v32 = vsel %vm2949_vm0, %v2565_v49, %v181_v20  ;;  %v297_v49 = vrot.slane %v293_v50, %v2857_v1  ;;  %vm2992_vm4 = vcmp.eq.s32.totalorder %v243_v2, 1  ;;  %v4917_v20 = vmov 0 }
 0x18c   :  { %v235_v25 = vsel %vm2965_vm1, %v2608_v34, %v208_v32  ;;  %v4914_v34 = vmov 0  ;;  %v4918_v20 = vsel %vm2996_vm5, 4294967295, %v4917_v20  ;;  %v347_v32 = vsel %vm346_vm2, 1, %v4869_v48 }
 0x18d   :  { %852 = vperm.xlu0 %2201, %v2393_v3   ;;  %v153_v3 = vsel %vm2918_vm11, %v2542_v41, %v126_v27  ;;  %v4915_v34 = vsel %vm2992_vm4, 4294967295, %v4914_v34  ;;  %4919 = vst [vmem:[#allocation95_spill] sm:$0xff] %v4918_v20  ;;  %v262_v41 = vsel %vm2992_vm4, %v2599_v61, %v235_v25  ;;  %vm3023_vm12 = vcmp.eq.s32.totalorder %v297_v49, 1 }
 0x18e   :  { %2150 = vset.pattern.permute.xlu1 %v4912_v51  ;;  %v2982_v26 = vpop.permute.xlu0 %1454  ;;  %4916 = vst [vmem:[#allocation94_spill] sm:$0xff] %v4915_v34  ;;  %v180_v23 = vsel %vm2932_vm13, %v2545_v42, %v153_v3  ;;  %v289_v61 = vsel %vm2996_vm5, %v2649_v53, %v262_v41  ;;  %vm3027_vm14 = vcmp.eq.s32.totalorder %v324_v30, 1  ;;  %v4923_v42 = vmov 0 }
 0x18f   :  { %4913 = vst [vmem:[#allocation93_spill] sm:$0xff] %v2982_v26  ;;  %1014 = vperm.xlu1 %2150, %v2402_v5   ;;  %v2990_v45 = vpop.permute.xlu1 %705  ;;  %v75_v5 = vsel %vm2882_vm6, %v2487_v21, 0.0  ;;  %v207_v50 = vsel %vm2949_vm0, %v2582_v55, %v180_v23  ;;  %v4920_v21 = vmov 0  ;;  %v4924_v42 = vsel %vm3027_vm14, 4294967295, %v4923_v42 }
 0x190   :  { %v102_v2 = vsel %vm2894_vm7, %v2508_v29, %v75_v5  ;;  %v4921_v21 = vsel %vm3023_vm12, 4294967295, %v4920_v21  ;;  %4925 = vst [vmem:[#allocation97_spill] sm:$0xff] %v4924_v42  ;;  %v351_v55 = vrot.slane %v347_v32, %v2857_v1  ;;  %v378_v27 = vrot.slane %v374_v11, %v2857_v1 }
 0x191   :  { %1712 = vperm.xlu0 %2201, %v2413_v8   ;;  %4922 = vst [vmem:[#allocation96_spill] sm:$0xff] %v4921_v21  ;;  %v129_v29 = vsel %vm2909_vm9, %v2524_v35, %v102_v2  ;;  %v401_v25 = vsel %vm400_vm8, 1, %v4869_v48  ;;  %v316_v3 = vsel %vm3023_vm12, %v2632_v13, %v289_v61  ;;  %v428_v49 = vsel %vm427_vm10, 1, %v4869_v48 }
 0x192   :  { %v156_v51 = vsel %vm2918_vm11, %v2548_v43, %v129_v29  ;;  %v234_v30 = vsel %vm2965_vm1, %v2578_v54, %v207_v50  ;;  %v343_v43 = vsel %vm3027_vm14, %v2689_v44, %v316_v3  ;;  %vm481_vm2 = vcmp.eq.s32.totalorder %v2846_v52, 16 }
 0x193   :  { %1018 = vperm.xlu1 %2150, %v2833_v46   ;;  %v3032_v53 = vpop.permute.xlu1 %713  ;;  %v3034_v38 = vpop.permute.xlu0 %601  ;;  %v183_v35 = vsel %vm2932_vm13, %v2558_v47, %v156_v51  ;;  %v261_v41 = vsel %vm2992_vm4, %v2622_v17, %v234_v30  ;;  %v4927_v32 = vmov 4   ;;  %vm3074_vm3 = vcmp.eq.s32.totalorder %v351_v55, 1 }
 0x194   :  { %4926 = vst [vmem:[#allocation98_spill] sm:$0xff] %v3032_v53  ;;  %v210_v13 = vsel %vm2949_vm0, %v2588_v57, %v183_v35  ;;  %v4929_v54 = vmov 0  ;;  %vm3078_vm8 = vcmp.eq.s32.totalorder %v378_v27, 1  ;;  %v4932_v44 = vmov 0  ;;  %v3144_v35 = vld [vmem:[#allocation3 + $0x8] sm:$0xff] }
 0x195   :  { %1724 = vperm.xlu0 %2201, %v2417_v9   ;;  %v4930_v54 = vsel %vm3074_vm3, 4294967295, %v4929_v54  ;;  %v4933_v44 = vsel %vm3078_vm8, 4294967295, %v4932_v44  ;;  %v405_v57 = vrot.slane %v401_v25, %v2857_v1  ;;  %v432_v5 = vrot.slane %v428_v49, %v2857_v1 }
 0x196   :  { %4931 = vst [vmem:[#allocation100_spill] sm:$0xff] %v4930_v54  ;;  %4934 = vst [vmem:[#allocation101_spill] sm:$0xff] %v4933_v44  ;;  %v370_v17 = vsel %vm3074_vm3, %v2666_v6, %v343_v43  ;;  %v455_v23 = vsel %vm454_vm15, 1, %v4869_v48  ;;  %v482_v61 = vsel %vm481_vm2, 1, %v4869_v48  ;;  %v4935_v2 = vmov 30  }
 0x197   :  { %2152 = vset.pattern.permute.xlu1 %v4927_v32  ;;  %v3070_v47 = vpop.permute.xlu1 %717  ;;  %v3072_v11 = vpop.permute.xlu0 %1473  ;;  %v237_v50 = vsel %vm2965_vm1, %v2591_v59, %v210_v13  ;;  %v397_v6 = vsel %vm3078_vm8, %v2730_v62, %v370_v17  ;;  %vm535_vm15 = vcmp.eq.s32.totalorder %v2846_v52, 18  ;;  %vm3111_vm2 = vcmp.eq.s32.totalorder %v405_v57, 1 }
 0x198   :  { %4928 = vst [vmem:[#allocation99_spill] sm:$0xff] %v3072_v11  ;;  %1037 = vperm.xlu1 %2152, %v2413_v8   ;;  %v288_v8 = vsel %vm2996_vm5, %v2612_v28, %v261_v41  ;;  %v264_v29 = vsel %vm2992_vm4, %v2629_v14, %v237_v50  ;;  %v4936_v55 = vmov 0  ;;  %vm3115_vm10 = vcmp.eq.s32.totalorder %v432_v5, 1 }
 0x199   :  { %2203 = vset.pattern.permute.xlu0 %v4935_v2  ;;  %v315_v59 = vsel %vm3023_vm12, %v2663_v40, %v288_v8  ;;  %v4937_v55 = vsel %vm3111_vm2, 4294967295, %v4936_v55  ;;  %v4939_v28 = vmov 0  ;;  %v459_v62 = vrot.slane %v455_v23, %v2857_v1 }
 0x19a   :  { %871 = vperm.xlu0 %2203, %v2398_v4   ;;  %4938 = vst [vmem:[#allocation102_spill] sm:$0xff] %v4937_v55  ;;  %v4940_v28 = vsel %vm3115_vm10, 4294967295, %v4939_v28  ;;  %v486_v4 = vrot.slane %v482_v61, %v2857_v1  ;;  %v424_v40 = vsel %vm3111_vm2, %v2700_v16, %v397_v6  ;;  %vm4942_vm4 = vcmp.eq.s32.totalorder %v2846_v52, 17  ;;  %v4951_v61 = vld [vmem:[#allocation47_spill] sm:$0xff] }
 0x19b   :  { %4941 = vst [vmem:[#allocation103_spill] sm:$0xff] %v4940_v28  ;;  %v509_v25 = vsel %vm4942_vm4, 1, %v4869_v48  ;;  %v536_v51 = vsel %vm535_vm15, 1, %v4869_v48  ;;  %vm562_vm1 = vcmp.eq.s32.totalorder %v2846_v52, 19  ;;  %v291_v3 = vsel %vm2996_vm5, %v2625_v15, %v264_v29 }
 0x19c   :  { %1045 = vperm.xlu1 %2152, %v2833_v46   ;;  %v3122_v27 = vpop.permute.xlu1 %736  ;;  %v3124_v14 = vpop.permute.xlu0 %624  ;;  %v342_v49 = vsel %vm3027_vm14, %v2646_v7, %v315_v59  ;;  %v451_v16 = vsel %vm3115_vm10, %v2770_v31, %v424_v40  ;;  %vm589_vm0 = vcmp.eq.s32.totalorder %v2846_v52, 20  ;;  %v318_v30 = vsel %vm3023_vm12, %v2669_v12, %v291_v3  ;;  %v4962_v3 = vld [vmem:[#allocation40_spill] sm:$0xff] }
 0x19d   :  { %v369_v15 = vsel %vm3074_vm3, %v2703_v19, %v342_v49  ;;  %vm3153_vm4 = vcmp.eq.s32.totalorder %v459_v62, 1  ;;  %v4943_v7 = vmov 0  ;;  %vm3157_vm15 = vcmp.eq.s32.totalorder %v486_v4, 1  ;;  %v4960_v62 = vld [vmem:[#allocation54_spill] sm:$0xff] }
 0x19e   :  { %1743 = vperm.xlu0 %2203, %v3144_v35   ;;  %v4944_v7 = vsel %vm3153_vm4, 4294967295, %v4943_v7  ;;  %v4946_v31 = vmov 0  ;;  %v513_v43 = vrot.slane %v509_v25, %v2857_v1  ;;  %v540_v12 = vrot.slane %v536_v51, %v2857_v1  ;;  %v4961_v25 = vld [vmem:[#allocation37_spill] sm:$0xff] }
 0x19f   :  { %4945 = vst [vmem:[#allocation104_spill] sm:$0xff] %v4944_v7  ;;  %v4947_v31 = vsel %vm3157_vm15, 4294967295, %v4946_v31  ;;  %v563_v19 = vsel %vm562_vm1, 1, %v4869_v48  ;;  %v478_v32 = vsel %vm3153_vm4, %v2734_v39, %v451_v16  ;;  %v590_v57 = vsel %vm589_vm0, 1, %v4869_v48  ;;  %v4963_v16 = vld [vmem:[#allocation77_spill] sm:$0xff] }
 0x1a0   :  { %4948 = vst [vmem:[#allocation105_spill] sm:$0xff] %v4947_v31  ;;  %1049 = vperm.xlu1 %2152, %v2417_v9   ;;  %v3163_v13 = vpop.permute.xlu1 %740  ;;  %v3165_v41 = vpop.permute.xlu0 %636  ;;  %v345_v9 = vsel %vm3027_vm14, %v2658_v10, %v318_v30  ;;  %v396_v5 = vsel %vm3078_vm8, %v2680_v56, %v369_v15  ;;  %v505_v17 = vsel %vm3157_vm15, %v2810_v60, %v478_v32  ;;  %vm616_vm1 = vcmp.eq.s32.totalorder %v2846_v52, 21  ;;  %v2241_v56 = vld [vmem:[%s4668_s2] sm:$0xff] }
 0x1a1   :  { %4949 = vst [vmem:[#allocation106_spill] sm:$0xff] %v3163_v13  ;;  %v4950_v23 = vmov 31   ;;  %v372_v39 = vsel %vm3074_vm3, %v2709_v0, %v345_v9  ;;  %v423_v10 = vsel %vm3111_vm2, %v4951_v61, %v396_v5  ;;  %vm643_vm0 = vcmp.eq.s32.totalorder %v2846_v52, 22 }
 0x1a2   :  { %2205 = vset.pattern.permute.xlu0 %v4950_v23  ;;  %vm3196_vm14 = vcmp.eq.s32.totalorder %v513_v43, 1  ;;  %v4952_v60 = vmov 0  ;;  %v567_v50 = vrot.slane %v563_v19, %v2857_v1  ;;  %v4955_v8 = vmov 5   ;;  %v4964_v43 = vld [vmem:[#allocation49_spill] sm:$0xff]  ;;  %v4965_v19 = vld [vmem:[#allocation58_spill] sm:$0xff] }
 0x1a3   :  { %894 = vperm.xlu0 %2205, %v2241_v56   ;;  %v4953_v60 = vsel %vm3196_vm14, 4294967295, %v4952_v60  ;;  %vm3204_vm3 = vcmp.eq.s32.totalorder %v540_v12, 1  ;;  %v4957_v6 = vmov 0  ;;  %v594_v29 = vrot.slane %v590_v57, %v2857_v1  ;;  %v2242_v57 = vld [vmem:[%s4668_s2 + $0x18] sm:$0xff] }
 0x1a4   :  { %4954 = vst [vmem:[#allocation47_spill] sm:$0xff] %v4953_v60  ;;  %2154 = vset.pattern.permute.xlu1 %v4955_v8  ;;  %v3202_v0 = vpop.permute.xlu0 %1496  ;;  %v4958_v6 = vsel %vm3204_vm3, 4294967295, %v4957_v6  ;;  %v617_v59 = vsel %vm616_vm1, 1, %v4869_v48  ;;  %v532_v4 = vsel %vm3196_vm14, %v4960_v62, %v505_v17  ;;  %v399_v51 = vsel %vm3078_vm8, %v4961_v25, %v372_v39  ;;  %v4975_v8 = vld [vmem:[#allocation44_spill] sm:$0xff] }
 0x1a5   :  { %4956 = vst [vmem:[#allocation107_spill] sm:$0xff] %v3202_v0  ;;  %4959 = vst [vmem:[#allocation108_spill] sm:$0xff] %v4958_v6  ;;  %1068 = vperm.xlu1 %2154, %v3144_v35   ;;  %v3214_v40 = vpop.permute.xlu1 %759  ;;  %v450_v49 = vsel %vm3115_vm10, %v4962_v3, %v423_v10  ;;  %v559_v30 = vsel %vm3204_vm3, %v4963_v16, %v532_v4  ;;  %v644_v15 = vsel %vm643_vm0, 1, %v4869_v48  ;;  %vm3237_vm1 = vcmp.eq.s32.totalorder %v567_v50, 1  ;;  %v4973_v10 = vld [vmem:[#allocation63_spill] sm:$0xff]  ;;  %v4976_v62 = vld [vmem:[#allocation48_spill] sm:$0xff] }
 0x1a6   :  { %v426_v12 = vsel %vm3111_vm2, %v4964_v43, %v399_v51  ;;  %v477_v32 = vsel %vm3153_vm4, %v4965_v19, %v450_v49  ;;  %v4966_v9 = vmov 0  ;;  %v621_v5 = vrot.slane %v617_v59, %v2857_v1  ;;  %v4977_v25 = vld [vmem:[#allocation60_spill] sm:$0xff]  ;;  %v4978_v3 = vld [vmem:[#allocation69_spill] sm:$0xff] }
 0x1a7   :  { %906 = vperm.xlu0 %2205, %v2242_v57   ;;  %v4967_v9 = vsel %vm3237_vm1, 4294967295, %v4966_v9  ;;  %vm3244_vm0 = vcmp.eq.s32.totalorder %v594_v29, 1  ;;  %v4970_v39 = vmov 0  ;;  %v648_v61 = vrot.slane %v644_v15, %v2857_v1  ;;  %v3270_v16 = vld [vmem:[#allocation3] sm:$0xff] }
 0x1a8   :  { %4968 = vst [vmem:[#allocation54_spill] sm:$0xff] %v4967_v9  ;;  %v3242_v17 = vpop.permute.xlu0 %1508  ;;  %v4971_v39 = vsel %vm3244_vm0, 4294967295, %v4970_v39  ;;  %v586_v56 = vsel %vm3237_vm1, %v4973_v10, %v559_v30  ;;  %v453_v59 = vsel %vm3115_vm10, %v4975_v8, %v426_v12  ;;  %v504_v29 = vsel %vm3157_vm15, %v4976_v62, %v477_v32  ;;  %v4986_v19 = vld [vmem:[#allocation72_spill] sm:$0xff]  ;;  %v4988_v10 = vld [vmem:[#allocation57_spill] sm:$0xff]  ;;  %v4989_v8 = vld [vmem:[#allocation71_spill] sm:$0xff] }
 0x1a9   :  { %4969 = vst [vmem:[#allocation37_spill] sm:$0xff] %v3242_v17  ;;  %4972 = vst [vmem:[#allocation40_spill] sm:$0xff] %v4971_v39  ;;  %1072 = vperm.xlu1 %2154, %v2833_v46   ;;  %v3253_v50 = vpop.permute.xlu1 %767  ;;  %v613_v4 = vsel %vm3244_vm0, %v3034_v38, %v586_v56  ;;  %v480_v51 = vsel %vm3153_vm4, %v4977_v25, %v453_v59  ;;  %v531_v49 = vsel %vm3196_vm14, %v4978_v3, %v504_v29  ;;  %v4979_v30 = vmov 0  ;;  %v4987_v57 = vld [vmem:[#allocation52_spill] sm:$0xff]  ;;  %v4990_v62 = vld [vmem:[#allocation83_spill] sm:$0xff] }
 0x1aa   :  { %4974 = vst [vmem:[#allocation77_spill] sm:$0xff] %v3253_v50  ;;  %vm3273_vm10 = vcmp.eq.s32.totalorder %v621_v5, 1  ;;  %vm670_vm2 = vcmp.eq.s32.totalorder %v2846_v52, 23  ;;  %vm3278_vm8 = vcmp.eq.s32.totalorder %v648_v61, 1  ;;  %v4982_v38 = vmov 0  ;;  %v3304_v25 = vld [vmem:[#allocation3 + $0x18] sm:$0xff] }
 0x1ab   :  { %1766 = vperm.xlu0 %2205, %v3270_v16   ;;  %v4980_v30 = vsel %vm3273_vm10, 4294967295, %v4979_v30  ;;  %v4983_v38 = vsel %vm3278_vm8, 4294967295, %v4982_v38  ;;  %v4985_v15 = vmov 6   ;;  %v640_v32 = vsel %vm3273_vm10, %v4986_v19, %v613_v4  ;;  %v4992_v3 = vld [vmem:[#allocation61_spill] sm:$0xff] }
 0x1ac   :  { %4981 = vst [vmem:[#allocation49_spill] sm:$0xff] %v4980_v30  ;;  %4984 = vst [vmem:[#allocation58_spill] sm:$0xff] %v4983_v38  ;;  %v507_v5 = vsel %vm3157_vm15, %v4987_v57, %v480_v51  ;;  %v558_v61 = vsel %vm3204_vm3, %v4988_v10, %v531_v49  ;;  %v671_v4 = vsel %vm670_vm2, 1, %v4869_v48  ;;  %v4994_v57 = vld [vmem:[#allocation87_spill] sm:$0xff]  ;;  %v5014_v13 = vmov 0 }
 0x1ad   :  { %2156 = vset.pattern.permute.xlu1 %v4985_v15  ;;  %v3283_v43 = vpop.permute.xlu1 %771  ;;  %v656_v12 = vpop.permute.xlu0 %655  ;;  %v534_v59 = vsel %vm3196_vm14, %v4989_v8, %v507_v5  ;;  %v585_v29 = vsel %vm3237_vm1, %v4990_v62, %v558_v61  ;;  %v675_v15 = vrot.slane %v671_v4, %v2857_v1  ;;  %v4995_v61 = vmov 0  ;;  %v4998_v8 = vld [vmem:[#allocation70_spill] sm:$0xff]  ;;  %v5000_v4 = vld [vmem:[#allocation76_spill] sm:$0xff] }
 0x1ae   :  { %v667_v56 = vsel %vm3278_vm8, %v656_v12, %v640_v32  ;;  %1091 = vperm.xlu1 %2156, %v3270_v16   ;;  %v561_v49 = vsel %vm3204_vm3, %v4992_v3, %v534_v59  ;;  %v4993_v12 = vld [vmem:[#allocation66_spill] sm:$0xff]  ;;  %v5030_v38 = vmov 11   ;;  %v5048_v60 = vmov 14  }
 0x1af   :  { %1778 = vperm.xlu0 %2205, %v3304_v25   ;;  %v612_v19 = vsel %vm3244_vm0, %v4993_v12, %v585_v29  ;;  %v588_v5 = vsel %vm3237_vm1, %v4994_v57, %v561_v49  ;;  %vm3325_vm2 = vcmp.eq.s32.totalorder %v675_v15, 1  ;;  %v5001_v15 = vmov 7  }
 0x1b0   :  { %v639_v10 = vsel %vm3273_vm10, %v3124_v14, %v612_v19  ;;  %v4996_v61 = vsel %vm3325_vm2, 4294967295, %v4995_v61  ;;  %v615_v59 = vsel %vm3244_vm0, %v4998_v8, %v588_v5  ;;  %v5002_v19 = vld [vmem:[#allocation81_spill] sm:$0xff]  ;;  %vm697_vm0 = vcmp.eq.s32.totalorder %v2846_v52, 24 }
 0x1b1   :  { %v3307_v51 = vpop.permute.xlu0 %1527  ;;  %4997 = vst [vmem:[#allocation44_spill] sm:$0xff] %v4996_v61  ;;  %v666_v3 = vsel %vm3278_vm8, %v5000_v4, %v639_v10  ;;  %v642_v14 = vsel %vm3273_vm10, %v3165_v41, %v615_v59  ;;  %v698_v59 = vsel %vm697_vm0, 1, %v4869_v48  ;;  %v5053_v28 = vmov 18  }
 0x1b2   :  { %4991 = vst [vmem:[#allocation63_spill] sm:$0xff] %v3307_v51  ;;  %1099 = vperm.xlu1 %2156, %v2833_v46   ;;  %v3317_v32 = vpop.permute.xlu1 %790  ;;  %v669_v57 = vsel %vm3278_vm8, %v5002_v19, %v642_v14  ;;  %v702_v4 = vrot.slane %v698_v59, %v2857_v1  ;;  %vm724_vm8 = vcmp.eq.s32.totalorder %v2846_v52, 25  ;;  %v5010_v19 = vld [vmem:[#allocation86_spill] sm:$0xff]  ;;  %v5054_v54 = vmov 19   ;;  %v3681_v51 = vld [vmem:[%s4667_s1] sm:$0x1] }
 0x1b3   :  { %v4754_v21 = vmov 32   ;;  %v4756_v20 = vmov 33   ;;  %v4762_v34 = vmov 36   ;;  %vm975_vm1 = vcmp.eq.s32.totalorder %v3681_v51, 2 }
 0x1b4   :  { %vm3367_vm10 = vcmp.eq.s32.totalorder %v702_v4, 1  ;;  %2208 = vset.pattern.permute.xlu0 %v4754_v21  ;;  %v4759_v21 = vmov 34   ;;  %vm1002_vm3 = vcmp.eq.s32.totalorder %v3681_v51, 3  ;;  %v976_v26 = vsel %vm975_vm1, 1, %v4869_v48 }
 0x1b5   :  { %1797 = vperm.xlu0 %2208, %v3144_v35   ;;  %vm1029_vm14 = vcmp.eq.s32.totalorder %v3681_v51, 4  ;;  %vm1083_vm1 = vcmp.eq.s32.totalorder %v3681_v51, 6  ;;  %vm1137_vm15 = vcmp.eq.s32.totalorder %v3681_v51, 8  ;;  %vm1164_vm4 = vcmp.eq.s32.totalorder %v3681_v51, 9 }
 0x1b6   :  { %1103 = vperm.xlu1 %2156, %v3304_v25   ;;  %v3333_v62 = vpop.permute.xlu1 %794  ;;  %v679_v29 = vpop.permute.xlu0 %678  ;;  %v1084_v37 = vsel %vm1083_vm1, 1, %v4869_v48  ;;  %vm1191_vm13 = vcmp.eq.s32.totalorder %v3681_v51, 10  ;;  %vm1245_vm11 = vcmp.eq.s32.totalorder %v3681_v51, 12  ;;  %vm1299_vm9 = vcmp.eq.s32.totalorder %v3681_v51, 14 }
 0x1b7   :  { %4999 = vst [vmem:[#allocation48_spill] sm:$0xff] %v3333_v62  ;;  %v693_v49 = vsel %vm3325_vm2, %v679_v29, %v666_v3  ;;  %v5006_v3 = vmov 8   ;;  %vm1353_vm7 = vcmp.eq.s32.totalorder %v3681_v51, 16 }
 0x1b9   :  { %2209 = vset.pattern.permute.xlu0 %v4756_v20  ;;  %v5056_v20 = vmov 21  }
 0x1ba   :  { %2158 = vset.pattern.permute.xlu1 %v5001_v15  ;;  %v691_v12 = vpop.permute.xlu0 %690  ;;  %v5007_v15 = vmov 0  ;;  %1820 = vperm.xlu0 %2209, %v3270_v16  }
 0x1bb   :  { %v696_v5 = vsel %vm3325_vm2, %v691_v12, %v669_v57  ;;  %1122 = vperm.xlu1 %2158, %v3144_v35   ;;  %v3350_v10 = vpop.permute.xlu1 %813  ;;  %v5008_v15 = vsel %vm3367_vm10, 4294967295, %v5007_v15  ;;  %v694_v57 = vsel %vm3325_vm2, %v5010_v19, %v667_v56  ;;  %v5017_v56 = vmov 9  }
 0x1bc   :  { %5009 = vst [vmem:[#allocation52_spill] sm:$0xff] %v5008_v15  ;;  %v720_v19 = vsel %vm3367_vm10, %v2990_v45, %v693_v49  ;;  %v5021_v49 = vmov 10  }
 0x1be   :  { %v3353_v41 = vpop.permute.xlu0 %1550  ;;  %2212 = vset.pattern.permute.xlu0 %v4759_v21 }
 0x1bf   :  { %5003 = vst [vmem:[#allocation60_spill] sm:$0xff] %v3353_v41  ;;  %1126 = vperm.xlu1 %2158, %v2833_v46   ;;  %v3356_v8 = vpop.permute.xlu1 %821  ;;  %1851 = vperm.xlu0 %2212, %v3144_v35  }
 0x1c0   :  { %5004 = vst [vmem:[#allocation69_spill] sm:$0xff] %v3356_v8  ;;  %v725_v8 = vsel %vm724_vm8, 1, %v4869_v48  ;;  %vm751_vm8 = vcmp.eq.s32.totalorder %v2846_v52, 26 }
 0x1c1   :  { %v729_v4 = vrot.slane %v725_v8, %v2857_v1 }
 0x1c2   :  { %v3359_v29 = vpop.permute.xlu0 %1562 }
 0x1c3   :  { %5005 = vst [vmem:[#allocation72_spill] sm:$0xff] %v3359_v29  ;;  %2160 = vset.pattern.permute.xlu1 %v5006_v3  ;;  %v3363_v14 = vpop.permute.xlu1 %825  ;;  %vm3386_vm0 = vcmp.eq.s32.totalorder %v729_v4, 1  ;;  %v723_v4 = vsel %vm3367_vm10, %v3070_v47, %v696_v5  ;;  %2217 = vset.pattern.permute.xlu0 %v4762_v34  ;;  %v5057_v34 = vmov 22  }
 0x1c4   :  { %1145 = vperm.xlu1 %2160, %v3270_v16   ;;  %v5015_v13 = vsel %vm3386_vm0, 4294967295, %v5014_v13  ;;  %1905 = vperm.xlu0 %2217, %v3144_v35  }
 0x1c5   :  { %5016 = vst [vmem:[#allocation61_spill] sm:$0xff] %v5015_v13  ;;  %v5034_v13 = vmov 12  }
 0x1c7   :  { %v710_v12 = vpop.permute.xlu0 %709 }
 0x1c8   :  { %v721_v59 = vsel %vm3367_vm10, %v710_v12, %v694_v57  ;;  %1153 = vperm.xlu1 %2160, %v2833_v46   ;;  %v3377_v3 = vpop.permute.xlu1 %844  ;;  %vm778_vm10 = vcmp.eq.s32.totalorder %v2846_v52, 27  ;;  %1909 = vperm.xlu0 %2217, %v2833_v46  }
 0x1c9   :  { %5011 = vst [vmem:[#allocation57_spill] sm:$0xff] %v3377_v3  ;;  %v779_v15 = vsel %vm778_vm10, 1, %v4869_v48  ;;  %vm805_vm10 = vcmp.eq.s32.totalorder %v2846_v52, 28 }
 0x1cb   :  { %v3380_v62 = vpop.permute.xlu0 %1581 }
 0x1cc   :  { %5012 = vst [vmem:[#allocation71_spill] sm:$0xff] %v3380_v62  ;;  %1157 = vperm.xlu1 %2160, %v3304_v25   ;;  %v3384_v50 = vpop.permute.xlu1 %848  ;;  %2222 = vset.pattern.permute.xlu0 %v4767_v63  ;;  %v2007_v62 = vld [vmem:[%s4670_s4 + $0x10] sm:$0xff] }
 0x1cd   :  { %5013 = vst [vmem:[#allocation83_spill] sm:$0xff] %v3384_v50  ;;  %1878 = vperm.xlu0 %2222, %v3144_v35  }
 0x1d0   :  { %2162 = vset.pattern.permute.xlu1 %v5017_v56  ;;  %v733_v12 = vpop.permute.xlu0 %732 }
 0x1d1   :  { %v747_v57 = vsel %vm3386_vm0, %v733_v12, %v720_v19  ;;  %1176 = vperm.xlu1 %2162, %v3144_v35   ;;  %v3397_v8 = vpop.permute.xlu1 %867  ;;  %v752_v19 = vsel %vm751_vm8, 1, %v4869_v48  ;;  %1886 = vperm.xlu0 %2222, %v3304_v25  }
 0x1d2   :  { %5018 = vst [vmem:[#allocation66_spill] sm:$0xff] %v3397_v8  ;;  %v5055_v8 = vmov 20  }
 0x1d4   :  { %v745_v53 = vpop.permute.xlu0 %744 }
 0x1d5   :  { %v750_v56 = vsel %vm3386_vm0, %v745_v53, %v723_v4  ;;  %1180 = vperm.xlu1 %2162, %v2833_v46   ;;  %v3405_v50 = vpop.permute.xlu1 %875  ;;  %v756_v53 = vrot.slane %v752_v19, %v2857_v1  ;;  %v5025_v4 = vmov 0 }
 0x1d6   :  { %5019 = vst [vmem:[#allocation87_spill] sm:$0xff] %v3405_v50 }
 0x1d7   :  { %vm3422_vm2 = vcmp.eq.s32.totalorder %v756_v53, 1  ;;  %v783_v53 = vrot.slane %v779_v15, %v2857_v1 }
 0x1d8   :  { %v3408_v45 = vpop.permute.xlu0 %1604  ;;  %v5026_v4 = vsel %vm3422_vm2, 4294967295, %v5025_v4 }
 0x1d9   :  { %5020 = vst [vmem:[#allocation70_spill] sm:$0xff] %v3408_v45  ;;  %2164 = vset.pattern.permute.xlu1 %v5021_v49  ;;  %v3411_v12 = vpop.permute.xlu1 %879  ;;  %5027 = vst [vmem:[#allocation109_spill] sm:$0xff] %v5026_v4  ;;  %vm3442_vm8 = vcmp.eq.s32.totalorder %v783_v53, 1  ;;  %v777_v53 = vsel %vm3422_vm2, %v3283_v43, %v750_v56  ;;  %v5042_v4 = vmov 13  }
 0x1da   :  { %5022 = vst [vmem:[#allocation76_spill] sm:$0xff] %v3411_v12  ;;  %1199 = vperm.xlu1 %2164, %v3270_v16   ;;  %v748_v12 = vsel %vm3386_vm0, %v3122_v27, %v721_v59  ;;  %v5031_v27 = vmov 0 }
 0x1db   :  { %v5032_v27 = vsel %vm3442_vm8, 4294967295, %v5031_v27 }
 0x1dc   :  { %v3415_v47 = vpop.permute.xlu0 %1616  ;;  %5033 = vst [vmem:[#allocation112_spill] sm:$0xff] %v5032_v27 }
 0x1dd   :  { %5023 = vst [vmem:[#allocation81_spill] sm:$0xff] %v3415_v47 }
 0x1de   :  { %1207 = vperm.xlu1 %2164, %v2833_v46   ;;  %v3419_v5 = vpop.permute.xlu1 %898 }
 0x1df   :  { %5024 = vst [vmem:[#allocation86_spill] sm:$0xff] %v3419_v5  ;;  %v4775_v5 = vmov 37  }
 0x1e1   :  { %v764_v49 = vpop.permute.xlu0 %763 }
 0x1e2   :  { %v775_v50 = vsel %vm3422_vm2, %v764_v49, %v748_v12  ;;  %1211 = vperm.xlu1 %2164, %v3304_v25   ;;  %v3432_v19 = vpop.permute.xlu1 %902  ;;  %v774_v12 = vsel %vm3422_vm2, %v3214_v40, %v747_v57  ;;  %v806_v57 = vsel %vm805_vm10, 1, %v4869_v48  ;;  %vm832_vm2 = vcmp.eq.s32.totalorder %v2846_v52, 29 }
 0x1e3   :  { %5028 = vst [vmem:[#allocation110_spill] sm:$0xff] %v3432_v19  ;;  %v810_v56 = vrot.slane %v806_v57, %v2857_v1  ;;  %v833_v52 = vsel %vm832_vm2, 1, %v4869_v48  ;;  %vm913_vm2 = vcmp.eq.s32.totalorder %v3681_v51, 0 }
 0x1e4   :  { %v837_v6 = vrot.slane %v833_v52, %v2857_v1 }
 0x1e5   :  { %v3435_v61 = vpop.permute.xlu0 %1635  ;;  %vm3477_vm0 = vcmp.eq.s32.totalorder %v810_v56, 1 }
 0x1e6   :  { %5029 = vst [vmem:[#allocation111_spill] sm:$0xff] %v3435_v61  ;;  %2166 = vset.pattern.permute.xlu1 %v5030_v38  ;;  %vm3503_vm10 = vcmp.eq.s32.totalorder %v837_v6, 1  ;;  %v5068_v61 = vmov 28  }
 0x1e7   :  { %1230 = vperm.xlu1 %2166, %v3144_v35   ;;  %v3440_v30 = vpop.permute.xlu1 %926 }
 0x1ea   :  { %v787_v59 = vpop.permute.xlu0 %786 }
 0x1eb   :  { %v801_v49 = vsel %vm3442_vm8, %v787_v59, %v774_v12  ;;  %1234 = vperm.xlu1 %2166, %v2833_v46   ;;  %v3452_v15 = vpop.permute.xlu1 %936  ;;  %v5037_v12 = vmov 0 }
 0x1ec   :  { %v5038_v12 = vsel %vm3477_vm0, 4294967295, %v5037_v12 }
 0x1ed   :  { %5039 = vst [vmem:[#allocation115_spill] sm:$0xff] %v5038_v12 }
 0x1ee   :  { %v799_v38 = vpop.permute.xlu0 %798 }
 0x1ef   :  { %v804_v19 = vsel %vm3442_vm8, %v799_v38, %v777_v53  ;;  %2168 = vset.pattern.permute.xlu1 %v5034_v13  ;;  %v3460_v39 = vpop.permute.xlu1 %941  ;;  %v3486_v53 = vsel %vm3442_vm8, %v3317_v32, %v775_v50  ;;  %v5044_v32 = vmov 0  ;;  %vm948_vm8 = vcmp.eq.s32.totalorder %v3681_v51, 1 }
 0x1f0   :  { %1253 = vperm.xlu1 %2168, %v3270_v16   ;;  %5041 = vst [vmem:[#allocation117_spill] sm:$0xff] %v3486_v53  ;;  %v5045_v32 = vsel %vm3503_vm10, 4294967295, %v5044_v32  ;;  %v831_v6 = vsel %vm3477_vm0, %v3363_v14, %v804_v19  ;;  %v5062_v53 = vmov 26   ;;  %v949_v11 = vsel %vm948_vm8, 1, %v4869_v48 }
 0x1f1   :  { %5046 = vst [vmem:[#allocation119_spill] sm:$0xff] %v5045_v32 }
 0x1f2   :  { %v3464_v40 = vpop.permute.xlu0 %1658 }
 0x1f3   :  { %5035 = vst [vmem:[#allocation113_spill] sm:$0xff] %v3464_v40  ;;  %v2005_v40 = vld [vmem:[%s4670_s4] sm:$0xff] }
 0x1f4   :  { %1261 = vperm.xlu1 %2168, %v2833_v46   ;;  %v3468_v59 = vpop.permute.xlu1 %960 }
 0x1f6   :  { %v3470_v43 = vpop.permute.xlu0 %1670 }
 0x1f7   :  { %5036 = vst [vmem:[#allocation114_spill] sm:$0xff] %v3470_v43 }
 0x1f8   :  { %1265 = vperm.xlu1 %2168, %v3304_v25   ;;  %v3474_v13 = vpop.permute.xlu1 %964 }
 0x1fb   :  { %v3481_v38 = vpop.permute.xlu0 %817 }
 0x1fc   :  { %5040 = vst [vmem:[#allocation116_spill] sm:$0xff] %v3481_v38  ;;  %2170 = vset.pattern.permute.xlu1 %v5042_v4  ;;  %v828_v4 = vsel %vm3477_vm0, %v3350_v10, %v801_v49  ;;  %v5050_v49 = vmov 15  }
 0x1fd   :  { %1284 = vperm.xlu1 %2170, %v3144_v35   ;;  %v3495_v56 = vpop.permute.xlu1 %983 }
 0x1ff   :  { %v3497_v9 = vpop.permute.xlu0 %1689 }
 0x200   :  { %5043 = vst [vmem:[#allocation118_spill] sm:$0xff] %v3497_v9  ;;  %v5066_v9 = vmov 27  }
 0x201   :  { %1288 = vperm.xlu1 %2170, %v2833_v46   ;;  %v3501_v50 = vpop.permute.xlu1 %991 }
 0x204   :  { %v841_v57 = vpop.permute.xlu0 %840 }
 0x205   :  { %v3512_v27 = vsel %vm3503_vm10, %v841_v57, %v828_v4  ;;  %2172 = vset.pattern.permute.xlu1 %v5048_v60  ;;  %v3515_v52 = vpop.permute.xlu1 %995 }
 0x206   :  { %5047 = vst [vmem:[#allocation120_spill] sm:$0xff] %v3512_v27  ;;  %1307 = vperm.xlu1 %2172, %v3270_v16  }
 0x208   :  { %v853_v31 = vpop.permute.xlu0 %852 }
 0x209   :  { %v3523_v7 = vsel %vm3503_vm10, %v853_v31, %v831_v6  ;;  %v5051_v31 = vmov 16  }
 0x20a   :  { %5049 = vst [vmem:[#allocation121_spill] sm:$0xff] %v3523_v7  ;;  %1315 = vperm.xlu1 %2172, %v2833_v46   ;;  %v3526_v10 = vpop.permute.xlu1 %1014 }
 0x20e   :  { %1319 = vperm.xlu1 %2172, %v3304_v25   ;;  %v3529_v60 = vpop.permute.xlu1 %1018 }
 0x212   :  { %2174 = vset.pattern.permute.xlu1 %v5050_v49  ;;  %v5052_v49 = vmov 17  }
 0x213   :  { %1338 = vperm.xlu1 %2174, %v3144_v35   ;;  %v3533_v57 = vpop.permute.xlu1 %1037 }
 0x217   :  { %1342 = vperm.xlu1 %2174, %v2833_v46   ;;  %v3536_v14 = vpop.permute.xlu1 %1045 }
 0x21b   :  { %2176 = vset.pattern.permute.xlu1 %v5051_v31  ;;  %v3539_v19 = vpop.permute.xlu1 %1049 }
 0x21c   :  { %1361 = vperm.xlu1 %2176, %v3270_v16  }
 0x220   :  { %1369 = vperm.xlu1 %2176, %v2833_v46   ;;  %v3543_v4 = vpop.permute.xlu1 %1068 }
 0x224   :  { %1373 = vperm.xlu1 %2176, %v3304_v25   ;;  %v3546_v6 = vpop.permute.xlu1 %1072 }
 0x228   :  { %2178 = vset.pattern.permute.xlu1 %v5052_v49 }
 0x229   :  { %1392 = vperm.xlu1 %2178, %v3144_v35   ;;  %v3550_v7 = vpop.permute.xlu1 %1091 }
 0x22d   :  { %1396 = vperm.xlu1 %2178, %v2833_v46   ;;  %v3553_v31 = vpop.permute.xlu1 %1099 }
 0x231   :  { %2180 = vset.pattern.permute.xlu1 %v5053_v28  ;;  %v3556_v55 = vpop.permute.xlu1 %1103 }
 0x232   :  { %1415 = vperm.xlu1 %2180, %v3270_v16  }
 0x236   :  { %1423 = vperm.xlu1 %2180, %v2833_v46   ;;  %v3560_v44 = vpop.permute.xlu1 %1122 }
 0x23a   :  { %1427 = vperm.xlu1 %2180, %v3304_v25   ;;  %v3563_v49 = vpop.permute.xlu1 %1126 }
 0x23e   :  { %2182 = vset.pattern.permute.xlu1 %v5054_v54 }
 0x23f   :  { %1446 = vperm.xlu1 %2182, %v3144_v35   ;;  %v3567_v42 = vpop.permute.xlu1 %1145 }
 0x243   :  { %1450 = vperm.xlu1 %2182, %v2833_v46   ;;  %v3571_v28 = vpop.permute.xlu1 %1153 }
 0x247   :  { %2184 = vset.pattern.permute.xlu1 %v5055_v8  ;;  %v3575_v27 = vpop.permute.xlu1 %1157 }
 0x248   :  { %1469 = vperm.xlu1 %2184, %v3270_v16  }
 0x24c   :  { %1477 = vperm.xlu1 %2184, %v2833_v46   ;;  %v3581_v54 = vpop.permute.xlu1 %1176 }
 0x250   :  { %1481 = vperm.xlu1 %2184, %v3304_v25   ;;  %v3586_v8 = vpop.permute.xlu1 %1180 }
 0x254   :  { %2186 = vset.pattern.permute.xlu1 %v5056_v20 }
 0x255   :  { %1500 = vperm.xlu1 %2186, %v3144_v35   ;;  %v3592_v22 = vpop.permute.xlu1 %1199 }
 0x259   :  { %1504 = vperm.xlu1 %2186, %v2833_v46   ;;  %v3596_v21 = vpop.permute.xlu1 %1207 }
 0x25d   :  { %2188 = vset.pattern.permute.xlu1 %v5057_v34  ;;  %v3601_v36 = vpop.permute.xlu1 %1211  ;;  %v4773_v34 = vmov 39  }
 0x25e   :  { %1523 = vperm.xlu1 %2188, %v3270_v16   ;;  %2226 = vset.pattern.permute.xlu0 %v4773_v34 }
 0x25f   :  { %1986 = vperm.xlu0 %2226, %v3144_v35  }
 0x262   :  { %1531 = vperm.xlu1 %2188, %v2833_v46   ;;  %v3606_v20 = vpop.permute.xlu1 %1230 }
 0x263   :  { %2227 = vset.pattern.permute.xlu0 %v4775_v5  ;;  %v5061_v5 = vmov 25  }
 0x264   :  { %1928 = vperm.xlu0 %2227, %v3270_v16  }
 0x266   :  { %1535 = vperm.xlu1 %2188, %v3304_v25   ;;  %v3609_v33 = vpop.permute.xlu1 %1234 }
 0x268   :  { %1940 = vperm.xlu0 %2227, %v3304_v25  }
 0x26a   :  { %2190 = vset.pattern.permute.xlu1 %v5058_v24 }
 0x26b   :  { %1554 = vperm.xlu1 %2190, %v3144_v35   ;;  %v3613_v63 = vpop.permute.xlu1 %1253 }
 0x26c   :  { %2232 = vset.pattern.permute.xlu0 %v4869_v48 }
 0x26d   :  { %2011 = vperm.xlu0 %2232, %v2005_v40   ;;  %v5072_v40 = vmov 29  }
 0x26f   :  { %1558 = vperm.xlu1 %2190, %v2833_v46   ;;  %v3618_v58 = vpop.permute.xlu1 %1261 }
 0x271   :  { %2021 = vperm.xlu0 %2232, %v2007_v62  }
 0x273   :  { %2192 = vset.pattern.permute.xlu1 %v5059_v18  ;;  %v3622_v32 = vpop.permute.xlu1 %1265 }
 0x274   :  { %1577 = vperm.xlu1 %2192, %v3270_v16  }
 0x278   :  { %1585 = vperm.xlu1 %2192, %v2833_v46   ;;  %v3628_v24 = vpop.permute.xlu1 %1284 }
 0x279   :  { %5060 = vst [vmem:[#allocation122_spill] sm:$0xff] %v3628_v24 }
 0x27c   :  { %1589 = vperm.xlu1 %2192, %v3304_v25   ;;  %v3632_v34 = vpop.permute.xlu1 %1288 }
 0x280   :  { %2194 = vset.pattern.permute.xlu1 %v5061_v5 }
 0x281   :  { %1608 = vperm.xlu1 %2194, %v3144_v35   ;;  %v3636_v18 = vpop.permute.xlu1 %1307 }
 0x285   :  { %1612 = vperm.xlu1 %2194, %v2833_v46   ;;  %v3639_v3 = vpop.permute.xlu1 %1315 }
 0x289   :  { %2196 = vset.pattern.permute.xlu1 %v5062_v53  ;;  %v3642_v38 = vpop.permute.xlu1 %1319 }
 0x28a   :  { %5063 = vst [vmem:[#allocation123_spill] sm:$0xff] %v3642_v38  ;;  %1631 = vperm.xlu1 %2196, %v3270_v16   ;;  %v5098_v38 = vld [vmem:[#allocation23_spill] sm:$0xff] }
 0x28e   :  { %1639 = vperm.xlu1 %2196, %v2833_v46   ;;  %v3646_v12 = vpop.permute.xlu1 %1338 }
 0x28f   :  { %5064 = vst [vmem:[#allocation124_spill] sm:$0xff] %v3646_v12 }
 0x292   :  { %1643 = vperm.xlu1 %2196, %v3304_v25   ;;  %v3649_v5 = vpop.permute.xlu1 %1342 }
 0x293   :  { %5065 = vst [vmem:[#allocation125_spill] sm:$0xff] %v3649_v5 }
 0x296   :  { %2198 = vset.pattern.permute.xlu1 %v5066_v9 }
 0x297   :  { %1662 = vperm.xlu1 %2198, %v3144_v35   ;;  %v3653_v43 = vpop.permute.xlu1 %1361 }
 0x29b   :  { %1666 = vperm.xlu1 %2198, %v2833_v46   ;;  %v3656_v53 = vpop.permute.xlu1 %1369 }
 0x29c   :  { %5067 = vst [vmem:[#allocation126_spill] sm:$0xff] %v3656_v53 }
 0x29f   :  { %2200 = vset.pattern.permute.xlu1 %v5068_v61  ;;  %v3662_v47 = vpop.permute.xlu1 %1373 }
 0x2a0   :  { %5069 = vst [vmem:[#allocation127_spill] sm:$0xff] %v3662_v47  ;;  %1685 = vperm.xlu1 %2200, %v3270_v16  }
 0x2a4   :  { %1693 = vperm.xlu1 %2200, %v2833_v46   ;;  %v3666_v9 = vpop.permute.xlu1 %1392 }
 0x2a5   :  { %5070 = vst [vmem:[#allocation128_spill] sm:$0xff] %v3666_v9  ;;  %v1003_v9 = vsel %vm1002_vm3, 1, %v4869_v48 }
 0x2a6   :  { %v1007_v12 = vrot.slane %v1003_v9, %v2857_v1 }
 0x2a8   :  { %1697 = vperm.xlu1 %2200, %v3304_v25   ;;  %v3669_v45 = vpop.permute.xlu1 %1396  ;;  %vm3744_vm1 = vcmp.eq.s32.totalorder %v1007_v12, 1  ;;  %v5092_v12 = vld [vmem:[#allocation18_spill] sm:$0xff] }
 0x2a9   :  { %5071 = vst [vmem:[#allocation129_spill] sm:$0xff] %v3669_v45 }
 0x2ac   :  { %2202 = vset.pattern.permute.xlu1 %v5072_v40  ;;  %v918_v40 = vsel %vm913_vm2, 1, %v4869_v48  ;;  %vm1056_vm2 = vcmp.eq.s32.totalorder %v3681_v51, 5 }
 0x2ad   :  { %1716 = vperm.xlu1 %2202, %v3144_v35   ;;  %v3676_v61 = vpop.permute.xlu1 %1415  ;;  %v922_v17 = vrot.slane %v918_v40, %v2857_v1 }
 0x2ae   :  { %5073 = vst [vmem:[#allocation130_spill] sm:$0xff] %v3676_v61  ;;  %v1192_v61 = vsel %vm1191_vm13, 1, %v4869_v48  ;;  %vm1326_vm13 = vcmp.eq.s32.totalorder %v3681_v51, 15 }
 0x2af   :  { %vm3705_vm8 = vcmp.eq.s32.totalorder %v922_v17, 1 }
 0x2b0   :  { %v944_v0 = vsel %vm3705_vm8, %v3440_v30, 0.0 }
 0x2b1   :  { %1720 = vperm.xlu1 %2202, %v2833_v46   ;;  %v3684_v29 = vpop.permute.xlu1 %1423 }
 0x2b2   :  { %5074 = vst [vmem:[#allocation131_spill] sm:$0xff] %v3684_v29  ;;  %v5094_v29 = vld [vmem:[#allocation10_spill] sm:$0xff] }
 0x2b3   :  { %v945_v45 = vsel %vm3705_vm8, %v5094_v29, 0.0 }
 0x2b5   :  { %2204 = vset.pattern.permute.xlu1 %v4935_v2  ;;  %v3688_v62 = vpop.permute.xlu1 %1427  ;;  %v953_v2 = vrot.slane %v949_v11, %v2857_v1  ;;  %v1030_v11 = vsel %vm1029_vm14, 1, %v4869_v48  ;;  %vm1110_vm14 = vcmp.eq.s32.totalorder %v3681_v51, 7 }
 0x2b6   :  { %5075 = vst [vmem:[#allocation132_spill] sm:$0xff] %v3688_v62  ;;  %1739 = vperm.xlu1 %2204, %v3270_v16   ;;  %v1034_v47 = vrot.slane %v1030_v11, %v2857_v1 }
 0x2b7   :  { %vm3719_vm3 = vcmp.eq.s32.totalorder %v953_v2, 1 }
 0x2b8   :  { %vm3750_vm12 = vcmp.eq.s32.totalorder %v1034_v47, 1 }
 0x2ba   :  { %1747 = vperm.xlu1 %2204, %v2833_v46   ;;  %v3698_v41 = vpop.permute.xlu1 %1446  ;;  %v980_v46 = vrot.slane %v976_v26, %v2857_v1 }
 0x2bb   :  { %5076 = vst [vmem:[#allocation133_spill] sm:$0xff] %v3698_v41  ;;  %v1057_v41 = vsel %vm1056_vm2, 1, %v4869_v48 }
 0x2bc   :  { %v1061_v26 = vrot.slane %v1057_v41, %v2857_v1  ;;  %vm3732_vm2 = vcmp.eq.s32.totalorder %v980_v46, 1 }
 0x2be   :  { %1751 = vperm.xlu1 %2204, %v3304_v25   ;;  %v3710_v40 = vpop.permute.xlu1 %1450  ;;  %vm3754_vm5 = vcmp.eq.s32.totalorder %v1061_v26, 1  ;;  %v947_v26 = vsel %vm3705_vm8, %v3460_v39, 0.0 }
 0x2bf   :  { %5079 = vst [vmem:[#allocation134_spill] sm:$0xff] %v3710_v40  ;;  %v5082_v40 = vld [vmem:[#allocation12_spill] sm:$0xff] }
 0x2c0   :  { %v971_v30 = vsel %vm3719_vm3, %v5082_v40, %v944_v0  ;;  %v1088_v0 = vrot.slane %v1084_v37, %v2857_v1  ;;  %v1111_v40 = vsel %vm1110_vm14, 1, %v4869_v48  ;;  %vm1218_vm14 = vcmp.eq.s32.totalorder %v3681_v51, 11  ;;  %v3766_v37 = vld [vmem:[#allocation3 + $0x10] sm:$0xff] }
 0x2c2   :  { %2206 = vset.pattern.permute.xlu1 %v4950_v23  ;;  %v998_v23 = vsel %vm3732_vm2, %v3495_v56, %v971_v30  ;;  %v1165_v56 = vsel %vm1164_vm4, 1, %v4869_v48  ;;  %vm1272_vm4 = vcmp.eq.s32.totalorder %v3681_v51, 13 }
 0x2c3   :  { %1770 = vperm.xlu1 %2206, %v3144_v35   ;;  %v3739_v41 = vpop.permute.xlu1 %1469  ;;  %v1025_v30 = vsel %vm3744_vm1, %v5092_v12, %v998_v23  ;;  %v1115_v12 = vrot.slane %v1111_v40, %v2857_v1  ;;  %v1169_v39 = vrot.slane %v1165_v56, %v2857_v1  ;;  %v1246_v40 = vsel %vm1245_vm11, 1, %v4869_v48 }
 0x2c4   :  { %5085 = vst [vmem:[#allocation12_spill] sm:$0xff] %v3739_v41  ;;  %v1138_v41 = vsel %vm1137_vm15, 1, %v4869_v48  ;;  %v1052_v23 = vsel %vm3750_vm12, %v3533_v57, %v1025_v30  ;;  %vm3782_vm15 = vcmp.eq.s32.totalorder %v1088_v0, 1  ;;  %v1219_v57 = vsel %vm1218_vm14, 1, %v4869_v48  ;;  %v5097_v30 = vld [vmem:[#allocation14_spill] sm:$0xff] }
 0x2c5   :  { %v974_v53 = vsel %vm3719_vm3, %v5097_v30, %v947_v26  ;;  %v1079_v29 = vsel %vm3754_vm5, %v5098_v38, %v1052_v23  ;;  %v1273_v0 = vsel %vm1272_vm4, 1, %v4869_v48  ;;  %vm3808_vm11 = vcmp.eq.s32.totalorder %v1115_v12, 1 }
 0x2c6   :  { %v1001_v5 = vsel %vm3732_vm2, %v3515_v52, %v974_v53  ;;  %v1106_v26 = vsel %vm3782_vm15, %v3550_v7, %v1079_v29  ;;  %v972_v38 = vsel %vm3719_vm3, %v3468_v59, %v945_v45  ;;  %v1196_v52 = vrot.slane %v1192_v61, %v2857_v1  ;;  %v5108_v59 = vld [vmem:[#allocation28_spill] sm:$0xff] }
 0x2c7   :  { %1774 = vperm.xlu1 %2206, %v3766_v37   ;;  %v3769_v47 = vpop.permute.xlu1 %1477  ;;  %v1223_v7 = vrot.slane %v1219_v57, %v2857_v1  ;;  %vm3823_vm4 = vcmp.eq.s32.totalorder %v1169_v39, 1  ;;  %v1250_v12 = vrot.slane %v1246_v40, %v2857_v1  ;;  %v1277_v29 = vrot.slane %v1273_v0, %v2857_v1  ;;  %v5109_v39 = vld [vmem:[#allocation15_spill] sm:$0xff] }
 0x2c8   :  { %5093 = vst [vmem:[#allocation18_spill] sm:$0xff] %v3769_v47  ;;  %v1142_v47 = vrot.slane %v1138_v41, %v2857_v1  ;;  %v5099_v41 = vmov 32   ;;  %v1133_v61 = vsel %vm3808_vm11, %v5108_v59, %v1106_v26  ;;  %v999_v57 = vsel %vm3732_vm2, %v5109_v39, %v972_v38  ;;  %v5116_v59 = vld [vmem:[#allocation24_spill] sm:$0xff] }
 0x2c9   :  { %vm3858_vm6 = vcmp.eq.s32.totalorder %v1223_v7, 1  ;;  %v946_v38 = vsel %vm3705_vm8, %v3452_v15, 0.0  ;;  %vm3866_vm10 = vcmp.eq.s32.totalorder %v1250_v12, 1  ;;  %vm1407_vm8 = vcmp.eq.s32.totalorder %v3681_v51, 18  ;;  %v5118_v15 = vld [vmem:[#allocation21_spill] sm:$0xff] }
 0x2ca   :  { %vm3817_vm14 = vcmp.eq.s32.totalorder %v1142_v47, 1  ;;  %v1327_v47 = vsel %vm1326_vm13, 1, %v4869_v48  ;;  %vm3854_vm13 = vcmp.eq.s32.totalorder %v1196_v52, 1  ;;  %v1354_v52 = vsel %vm1353_vm7, 1, %v4869_v48 }
 0x2cb   :  { %2207 = vset.pattern.permute.xlu1 %v5099_v41  ;;  %v3800_v56 = vpop.permute.xlu1 %1481  ;;  %v1300_v41 = vsel %vm1299_vm9, 1, %v4869_v48  ;;  %vm1380_vm9 = vcmp.eq.s32.totalorder %v3681_v51, 17  ;;  %vm3889_vm7 = vcmp.eq.s32.totalorder %v1277_v29, 1  ;;  %v1408_v17 = vsel %vm1407_vm8, 1, %v4869_v48 }
 0x2cc   :  { %5100 = vst [vmem:[#allocation10_spill] sm:$0xff] %v3800_v56  ;;  %1793 = vperm.xlu1 %2207, %v3270_v16   ;;  %v5107_v56 = vld [vmem:[#allocation19_spill] sm:$0xff]  ;;  %v1381_v39 = vsel %vm1380_vm9, 1, %v4869_v48 }
 0x2cd   :  { %v1028_v45 = vsel %vm3744_vm1, %v5107_v56, %v1001_v5  ;;  %v1160_v5 = vsel %vm3817_vm14, %v3567_v42, %v1133_v61  ;;  %v1026_v56 = vsel %vm3744_vm1, %v3526_v10, %v999_v57  ;;  %v1304_v42 = vrot.slane %v1300_v41, %v2857_v1  ;;  %v5117_v61 = vld [vmem:[#allocation34_spill] sm:$0xff] }
 0x2ce   :  { %v1055_v40 = vsel %vm3750_vm12, %v3539_v19, %v1028_v45  ;;  %v1331_v10 = vrot.slane %v1327_v47, %v2857_v1  ;;  %v1187_v41 = vsel %vm3823_vm4, %v5117_v61, %v1160_v5  ;;  %v1053_v62 = vsel %vm3750_vm12, %v5118_v15, %v1026_v56  ;;  %v5133_v15 = vld [vmem:[#allocation35_spill] sm:$0xff]  ;;  %v5144_v19 = vld [vmem:[#allocation53_spill] sm:$0xff] }
 0x2cf   :  { %v1082_v7 = vsel %vm3754_vm5, %v5116_v59, %v1055_v40  ;;  %v1214_v47 = vsel %vm3854_vm13, %v3592_v22, %v1187_v41  ;;  %v973_v5 = vsel %vm3719_vm3, %v3474_v13, %v946_v38  ;;  %vm3902_vm9 = vcmp.eq.s32.totalorder %v1304_v42, 1  ;;  %v5125_v42 = vld [vmem:[#allocation30_spill] sm:$0xff] }
 0x2d0   :  { %1801 = vperm.xlu1 %2207, %v3766_v37   ;;  %v3849_v0 = vpop.permute.xlu1 %1500  ;;  %v1109_v12 = vsel %vm3782_vm15, %v3556_v55, %v1082_v7  ;;  %v1080_v55 = vsel %vm3754_vm5, %v3543_v4, %v1053_v62  ;;  %v1358_v22 = vrot.slane %v1354_v52, %v2857_v1  ;;  %v1000_v29 = vsel %vm3732_vm2, %v3501_v50, %v973_v5  ;;  %v5126_v52 = vld [vmem:[#allocation41_spill] sm:$0xff]  ;;  %v5134_v62 = vld [vmem:[#allocation51_spill] sm:$0xff] }
 0x2d1   :  { %vm3910_vm0 = vcmp.eq.s32.totalorder %v1331_v10, 1  ;;  %v1385_v13 = vrot.slane %v1381_v39, %v2857_v1  ;;  %v1027_v4 = vsel %vm3744_vm1, %v3529_v60, %v1000_v29  ;;  %v1136_v38 = vsel %vm3808_vm11, %v5125_v42, %v1109_v12  ;;  %v5127_v10 = vld [vmem:[#allocation26_spill] sm:$0xff]  ;;  %v5135_v12 = vld [vmem:[#allocation32_spill] sm:$0xff]  ;;  %v5139_v29 = vld [vmem:[#allocation43_spill] sm:$0xff] }
 0x2d2   :  { %v1241_v50 = vsel %vm3858_vm6, %v5126_v52, %v1214_v47  ;;  %vm1434_vm3 = vcmp.eq.s32.totalorder %v3681_v51, 19  ;;  %v1054_v2 = vsel %vm3750_vm12, %v3536_v14, %v1027_v4  ;;  %v1107_v7 = vsel %vm3782_vm15, %v5127_v10, %v1080_v55  ;;  %v5141_v4 = vld [vmem:[#allocation38_spill] sm:$0xff] }
 0x2d3   :  { %v1163_v60 = vsel %vm3817_vm14, %v3575_v27, %v1136_v38  ;;  %v1268_v9 = vsel %vm3866_vm10, %v3613_v63, %v1241_v50  ;;  %v5128_v61 = vmov 33   ;;  %v1081_v41 = vsel %vm3754_vm5, %v3546_v6, %v1054_v2 }
 0x2d4   :  { %1805 = vperm.xlu1 %2207, %v3304_v25   ;;  %v3894_v40 = vpop.permute.xlu1 %1504  ;;  %v1134_v14 = vsel %vm3808_vm11, %v3560_v44, %v1107_v7  ;;  %vm3945_vm12 = vcmp.eq.s32.totalorder %v1358_v22, 1  ;;  %v1412_v27 = vrot.slane %v1408_v17, %v2857_v1  ;;  %v1108_v63 = vsel %vm3782_vm15, %v3553_v31, %v1081_v41  ;;  %v5140_v17 = vld [vmem:[#allocation62_spill] sm:$0xff]  ;;  %v5146_v41 = vld [vmem:[#allocation73_spill] sm:$0xff] }
 0x2d5   :  { %vm3956_vm2 = vcmp.eq.s32.totalorder %v1385_v13, 1  ;;  %v1435_v44 = vsel %vm1434_vm3, 1, %v4869_v48  ;;  %vm1461_vm5 = vcmp.eq.s32.totalorder %v3681_v51, 20  ;;  %v1135_v11 = vsel %vm3808_vm11, %v3563_v49, %v1108_v63  ;;  %v5148_v63 = vld [vmem:[#allocation123_spill] sm:$0xff] }
 0x2d6   :  { %v1295_v31 = vsel %vm3889_vm7, %v5134_v62, %v1268_v9  ;;  %vm1488_vm1 = vcmp.eq.s32.totalorder %v3681_v51, 21  ;;  %v1162_v24 = vsel %vm3817_vm14, %v3571_v28, %v1135_v11  ;;  %v1161_v47 = vsel %vm3817_vm14, %v5135_v12, %v1134_v14  ;;  %v5147_v14 = vld [vmem:[#allocation45_spill] sm:$0xff]  ;;  %v5149_v11 = vld [vmem:[#allocation126_spill] sm:$0xff] }
 0x2d7   :  { %v1322_v30 = vsel %vm3902_vm9, %v3636_v18, %v1295_v31  ;;  %v1188_v5 = vsel %vm3823_vm4, %v3581_v54, %v1161_v47  ;;  %v1189_v28 = vsel %vm3823_vm4, %v3586_v8, %v1162_v24  ;;  %vm3990_vm15 = vcmp.eq.s32.totalorder %v1412_v27, 1  ;;  %v5151_v31 = vld [vmem:[#allocation122_spill] sm:$0xff]  ;;  %v5152_v12 = vld [vmem:[#allocation129_spill] sm:$0xff] }
 0x2d8   :  { %2210 = vset.pattern.permute.xlu1 %v5128_v61  ;;  %v1439_v23 = vrot.slane %v1435_v44, %v2857_v1  ;;  %v5138_v22 = vmov 34   ;;  %v1216_v18 = vsel %vm3854_vm13, %v3596_v21, %v1189_v28  ;;  %v1462_v54 = vsel %vm1461_vm5, 1, %v4869_v48 }
 0x2d9   :  { %1824 = vperm.xlu1 %2210, %v3144_v35   ;;  %v3951_v39 = vpop.permute.xlu1 %1523  ;;  %v1190_v35 = vsel %vm3823_vm4, %v5133_v15, %v1163_v60  ;;  %v1489_v53 = vsel %vm1488_vm1, 1, %v4869_v48  ;;  %vm1515_vm11 = vcmp.eq.s32.totalorder %v3681_v51, 22  ;;  %v1243_v8 = vsel %vm3858_vm6, %v3609_v33, %v1216_v18  ;;  %v5145_v60 = vld [vmem:[#allocation125_spill] sm:$0xff]  ;;  %v5158_v18 = vld [vmem:[#allocation64_spill] sm:$0xff] }
 0x2da   :  { %v1217_v49 = vsel %vm3854_vm13, %v3601_v36, %v1190_v35  ;;  %v1349_v21 = vsel %vm3910_vm0, %v5140_v17, %v1322_v30  ;;  %vm1542_vm14 = vcmp.eq.s32.totalorder %v3681_v51, 23  ;;  %v1215_v42 = vsel %vm3854_vm13, %v5141_v4, %v1188_v5  ;;  %v5150_v35 = vld [vmem:[#allocation130_spill] sm:$0xff]  ;;  %v5162_v4 = vld [vmem:[#allocation56_spill] sm:$0xff] }
 0x2db   :  { %v1244_v13 = vsel %vm3858_vm6, %v5139_v29, %v1217_v49  ;;  %v1270_v38 = vsel %vm3866_vm10, %v3618_v58, %v1243_v8  ;;  %v1376_v52 = vsel %vm3945_vm12, %v3653_v43, %v1349_v21  ;;  %v1242_v50 = vsel %vm3858_vm6, %v3606_v20, %v1215_v42  ;;  %v5153_v49 = vld [vmem:[#allocation131_spill] sm:$0xff]  ;;  %v5186_v5 = vld [vmem:[#allocation72_spill] sm:$0xff] }
 0x2dc   :  { %v1271_v33 = vsel %vm3866_vm10, %v3622_v32, %v1244_v13  ;;  %v1297_v26 = vsel %vm3889_vm7, %v3632_v34, %v1270_v38  ;;  %vm4033_vm4 = vcmp.eq.s32.totalorder %v1439_v23, 1  ;;  %v1466_v58 = vrot.slane %v1462_v54, %v2857_v1  ;;  %v5160_v29 = vld [vmem:[#allocation91_spill] sm:$0xff] }
 0x2dd   :  { %2211 = vset.pattern.permute.xlu1 %v5138_v22  ;;  %v1532_v36 = vpop.permute.xlu1 %1531  ;;  %v1324_v43 = vsel %vm3902_vm9, %v3639_v3, %v1297_v26  ;;  %v1493_v32 = vrot.slane %v1489_v53, %v2857_v1  ;;  %v1516_v20 = vsel %vm1515_vm11, 1, %v4869_v48  ;;  %v1543_v34 = vsel %vm1542_vm14, 1, %v4869_v48  ;;  %v5159_v53 = vld [vmem:[#allocation134_spill] sm:$0xff]  ;;  %v5163_v38 = vld [vmem:[#allocation127_spill] sm:$0xff] }
 0x2de   :  { %1847 = vperm.xlu1 %2211, %v3270_v16   ;;  %v1298_v7 = vsel %vm3889_vm7, %v5144_v19, %v1271_v33  ;;  %v1351_v9 = vsel %vm3910_vm0, %v5145_v60, %v1324_v43  ;;  %v1403_v3 = vsel %vm3956_vm2, %v5146_v41, %v1376_v52  ;;  %vm1569_vm6 = vcmp.eq.s32.totalorder %v3681_v51, 24  ;;  %v5164_v52 = vld [vmem:[#allocation12_spill] sm:$0xff]  ;;  %v5165_v26 = vld [vmem:[#allocation18_spill] sm:$0xff]  ;;  %v5171_v60 = vld [vmem:[#allocation75_spill] sm:$0xff] }
 0x2df   :  { %v1269_v27 = vsel %vm3866_vm10, %v5147_v14, %v1242_v50  ;;  %v1325_v44 = vsel %vm3902_vm9, %v5148_v63, %v1298_v7  ;;  %v1378_v15 = vsel %vm3945_vm12, %v5149_v11, %v1351_v9  ;;  %v1430_v62 = vsel %vm3990_vm15, %v5150_v35, %v1403_v3  ;;  %v5166_v43 = vld [vmem:[#allocation124_spill] sm:$0xff]  ;;  %v5172_v9 = vld [vmem:[#allocation107_spill] sm:$0xff]  ;;  %v5176_v35 = vld [vmem:[#allocation93_spill] sm:$0xff] }
 0x2e0   :  { %v1296_v24 = vsel %vm3889_vm7, %v5151_v31, %v1269_v27  ;;  %v1405_v45 = vsel %vm3956_vm2, %v5152_v12, %v1378_v15  ;;  %v1520_v47 = vrot.slane %v1516_v20, %v2857_v1  ;;  %vm4082_vm10 = vcmp.eq.s32.totalorder %v1466_v58, 1  ;;  %v5173_v14 = vld [vmem:[#allocation67_spill] sm:$0xff]  ;;  %v5174_v27 = vld [vmem:[#allocation132_spill] sm:$0xff]  ;;  %v5192_v19 = vld [vmem:[#allocation70_spill] sm:$0xff] }
 0x2e1   :  { %v4038_v10 = vpop.permute.xlu1 %1535  ;;  %v1432_v30 = vsel %vm3990_vm15, %v5153_v49, %v1405_v45  ;;  %vm4086_vm13 = vcmp.eq.s32.totalorder %v1493_v32, 1  ;;  %v1547_v23 = vrot.slane %v1543_v34, %v2857_v1  ;;  %v1352_v54 = vsel %vm3910_vm0, %v5158_v18, %v1325_v44  ;;  %v5175_v11 = vld [vmem:[#allocation128_spill] sm:$0xff]  ;;  %v5181_v45 = vld [vmem:[#allocation10_spill] sm:$0xff] }
 0x2e2   :  { %2213 = vset.pattern.permute.xlu1 %v5128_v61  ;;  %v1459_v8 = vsel %vm4033_vm4, %v5159_v53, %v1432_v30  ;;  %v1457_v13 = vsel %vm4033_vm4, %v5160_v29, %v1430_v62  ;;  %v5161_v17 = vmov 35   ;;  %v1570_v21 = vsel %vm1569_vm6, 1, %v4869_v48  ;;  %v5177_v31 = vld [vmem:[#allocation60_spill] sm:$0xff]  ;;  %v5182_v30 = vld [vmem:[#allocation133_spill] sm:$0xff] }
 0x2e3   :  { %1828 = vperm.xlu1 %2213, %v3766_v37   ;;  %v1323_v42 = vsel %vm3902_vm9, %v5162_v4, %v1296_v24  ;;  %v1379_v33 = vsel %vm3945_vm12, %v5163_v38, %v1352_v54  ;;  %v1484_v50 = vsel %vm4082_vm10, %v5164_v52, %v1457_v13  ;;  %v1486_v58 = vsel %vm4082_vm10, %v5165_v26, %v1459_v8  ;;  %v5184_v54 = vld [vmem:[#allocation37_spill] sm:$0xff]  ;;  %v5185_v8 = vld [vmem:[#allocation99_spill] sm:$0xff] }
 0x2e4   :  { %v1350_v32 = vsel %vm3910_vm0, %v5166_v43, %v1323_v42  ;;  %v1513_v56 = vsel %vm4086_vm13, %v3894_v40, %v1486_v58  ;;  %vm4123_vm8 = vcmp.eq.s32.totalorder %v1520_v47, 1  ;;  %vm4129_vm7 = vcmp.eq.s32.totalorder %v1547_v23, 1  ;;  %v5187_v38 = vld [vmem:[#allocation63_spill] sm:$0xff] }
 0x2e5   :  { %v1540_v34 = vsel %vm4123_vm8, %v1532_v36, %v1513_v56  ;;  %v1406_v59 = vsel %vm3956_vm2, %v5171_v60, %v1379_v33  ;;  %v1511_v40 = vsel %vm4086_vm13, %v5172_v9, %v1484_v50  ;;  %v1574_v3 = vrot.slane %v1570_v21, %v2857_v1  ;;  %v5188_v52 = vld [vmem:[#allocation71_spill] sm:$0xff]  ;;  %v2246_v56 = vld [vmem:[#allocation3 + $0x8] sm:$0xff] }
 0x2e6   :  { %v1555_v57 = vpop.permute.xlu1 %1554  ;;  %v1377_v36 = vsel %vm3945_vm12, %v5173_v14, %v1350_v32  ;;  %v1433_v63 = vsel %vm3990_vm15, %v5174_v27, %v1406_v59  ;;  %v1538_v44 = vsel %vm4123_vm8, %v3951_v39, %v1511_v40  ;;  %v5180_v39 = vld [vmem:[#allocation79_spill] sm:$0xff]  ;;  %v5183_v18 = vmov 36  }
 0x2e7   :  { %2214 = vset.pattern.permute.xlu1 %v5161_v17  ;;  %v1404_v15 = vsel %vm3956_vm2, %v5175_v11, %v1377_v36  ;;  %v1460_v46 = vsel %vm4033_vm4, %v5176_v35, %v1433_v63  ;;  %v1565_v24 = vsel %vm4129_vm7, %v5177_v31, %v1538_v44  ;;  %vm4162_vm0 = vcmp.eq.s32.totalorder %v1574_v3, 1  ;;  %v5195_v36 = vld [vmem:[#allocation81_spill] sm:$0xff]  ;;  %v5196_v11 = vld [vmem:[#allocation111_spill] sm:$0xff] }
 0x2e8   :  { %1874 = vperm.xlu1 %2214, %v3270_v16   ;;  %v1431_v6 = vsel %vm3990_vm15, %v5180_v39, %v1404_v15  ;;  %v1487_v47 = vsel %vm4082_vm10, %v5181_v45, %v1460_v46  ;;  %vm1596_vm9 = vcmp.eq.s32.totalorder %v3681_v51, 25  ;;  %vm1623_vm3 = vcmp.eq.s32.totalorder %v3681_v51, 26  ;;  %v5200_v45 = vld [vmem:[#allocation113_spill] sm:$0xff] }
 0x2e9   :  { %v1458_v23 = vsel %vm4033_vm4, %v5182_v30, %v1431_v6  ;;  %v1514_v55 = vsel %vm4086_vm13, %v5184_v54, %v1487_v47  ;;  %v1597_v21 = vsel %vm1596_vm9, 1, %v4869_v48  ;;  %v5191_v43 = vmov 37  }
 0x2ea   :  { %v1559_v7 = vpop.permute.xlu1 %1558  ;;  %v1485_v29 = vsel %vm4082_vm10, %v5185_v8, %v1458_v23  ;;  %v1541_v2 = vsel %vm4123_vm8, %v4038_v10, %v1514_v55  ;;  %vm1650_vm5 = vcmp.eq.s32.totalorder %v3681_v51, 27  ;;  %v2336_v40 = vmov 38   ;;  %v2248_v23 = vld [vmem:[#allocation3 + $0x18] sm:$0xff]  ;;  %v1713_v8 = vpop.permute.xlu0 %1712 }
 0x2eb   :  { %v1567_v41 = vsel %vm4129_vm7, %v1559_v7, %v1540_v34  ;;  %v1568_v42 = vsel %vm4129_vm7, %v5186_v5, %v1541_v2  ;;  %v1651_v3 = vsel %vm1650_vm5, 1, %v4869_v48  ;;  %vm1677_vm1 = vcmp.eq.s32.totalorder %v3681_v51, 28  ;;  %v5203_v2 = vld [vmem:[#allocation114_spill] sm:$0xff] }
 0x2ec   :  { %2215 = vset.pattern.permute.xlu1 %v5138_v22  ;;  %v1655_v63 = vrot.slane %v1651_v3, %v2857_v1  ;;  %v5199_v39 = vmov 39   ;;  %vm1704_vm14 = vcmp.eq.s32.totalorder %v3681_v51, 29  ;;  %vm1731_vm4 = vcmp.eq.s32.totalorder %v3681_v51, 30  ;;  %v5204_v5 = vld [vmem:[#allocation118_spill] sm:$0xff] }
 0x2ed   :  { %1855 = vperm.xlu1 %2215, %v3766_v37   ;;  %vm1812_vm9 = vcmp.eq.s32.totalorder %v3681_v51, 33  ;;  %vm1866_vm5 = vcmp.eq.s32.totalorder %v3681_v51, 35 }
 0x2ee   :  { %vm4250_vm15 = vcmp.eq.s32.totalorder %v1655_v63, 1 }
 0x2ef   :  { %v1578_v62 = vpop.permute.xlu1 %1577 }
 0x2f0   :  { %v1592_v49 = vsel %vm4162_vm0, %v1578_v62, %v1565_v24  ;;  %v1678_v62 = vsel %vm1677_vm1, 1, %v4869_v48  ;;  %vm1893_vm1 = vcmp.eq.s32.totalorder %v3681_v51, 36 }
 0x2f1   :  { %2216 = vset.pattern.permute.xlu1 %v5183_v18  ;;  %v1682_v12 = vrot.slane %v1678_v62, %v2857_v1 }
 0x2f2   :  { %1901 = vperm.xlu1 %2216, %v3270_v16   ;;  %v1512_v16 = vsel %vm4086_vm13, %v3849_v0, %v1485_v29  ;;  %v1601_v0 = vrot.slane %v1597_v21, %v2857_v1  ;;  %v1725_v21 = vpop.permute.xlu0 %1724  ;;  %vm1758_vm13 = vcmp.eq.s32.totalorder %v3681_v51, 31 }
 0x2f3   :  { %v1586_v53 = vpop.permute.xlu1 %1585  ;;  %v1539_v10 = vsel %vm4123_vm8, %v5187_v38, %v1512_v16  ;;  %vm4266_vm11 = vcmp.eq.s32.totalorder %v1682_v12, 1  ;;  %vm1785_vm8 = vcmp.eq.s32.totalorder %v3681_v51, 32 }
 0x2f4   :  { %v1594_v13 = vsel %vm4162_vm0, %v1586_v53, %v1567_v41  ;;  %v1566_v28 = vsel %vm4129_vm7, %v1555_v57, %v1539_v10  ;;  %vm4214_vm12 = vcmp.eq.s32.totalorder %v1601_v0, 1  ;;  %v1624_v57 = vsel %vm1623_vm3, 1, %v4869_v48  ;;  %v2247_v41 = vld [vmem:[#allocation3] sm:$0xff] }
 0x2f5   :  { %v1593_v50 = vsel %vm4162_vm0, %v5188_v52, %v1566_v28  ;;  %v1628_v20 = vrot.slane %v1624_v57, %v2857_v1  ;;  %v1619_v7 = vsel %vm4214_vm12, %v5192_v19, %v1592_v49  ;;  %v1705_v53 = vsel %vm1704_vm14, 1, %v4869_v48  ;;  %v2006_v52 = vld [vmem:[%s4670_s4 + $0x8] sm:$0xff]  ;;  %v2008_v19 = vld [vmem:[%s4670_s4 + $0x18] sm:$0xff] }
 0x2f6   :  { %2218 = vset.pattern.permute.xlu1 %v5128_v61  ;;  %v1709_v16 = vrot.slane %v1705_v53, %v2857_v1  ;;  %vm1839_vm3 = vcmp.eq.s32.totalorder %v3681_v51, 34  ;;  %vm1974_vm14 = vcmp.eq.s32.totalorder %v3681_v51, 39 }
 0x2f7   :  { %1832 = vperm.xlu1 %2218, %v3304_v25   ;;  %v1590_v4 = vpop.permute.xlu1 %1589  ;;  %vm4229_vm2 = vcmp.eq.s32.totalorder %v1628_v20, 1  ;;  %v1840_v49 = vsel %vm1839_vm3, 1, %v4869_v48 }
 0x2f8   :  { %v1595_v33 = vsel %vm4162_vm0, %v1590_v4, %v1568_v42  ;;  %vm4290_vm6 = vcmp.eq.s32.totalorder %v1709_v16, 1  ;;  %v1844_v53 = vrot.slane %v1840_v49, %v2857_v1 }
 0x2f9   :  { %v1622_v27 = vsel %vm4214_vm12, %v5195_v36, %v1595_v33  ;;  %v1732_v33 = vsel %vm1731_vm4, 1, %v4869_v48  ;;  %vm1947_vm4 = vcmp.eq.s32.totalorder %v3681_v51, 38 }
 0x2fb   :  { %2219 = vset.pattern.permute.xlu1 %v5161_v17 }
 0x2fc   :  { %1882 = vperm.xlu1 %2219, %v3766_v37   ;;  %v1609_v61 = vpop.permute.xlu1 %1608 }
 0x2fd   :  { %v1620_v58 = vsel %vm4214_vm12, %v1609_v61, %v1593_v50  ;;  %v4300_v61 = vpop.permute.xlu0 %871 }
 0x2fe   :  { %v1647_v15 = vsel %vm4229_vm2, %v5196_v11, %v1620_v58  ;;  %v5329_v11 = vld [vmem:[#allocation110_spill] sm:$0xff] }
 0x300   :  { %2220 = vset.pattern.permute.xlu1 %v5191_v43  ;;  %v1613_v17 = vpop.permute.xlu1 %1612 }
 0x301   :  { %v1621_v32 = vsel %vm4214_vm12, %v1613_v17, %v1594_v13  ;;  %1932 = vperm.xlu1 %2220, %v2246_v56  }
 0x305   :  { %2221 = vset.pattern.permute.xlu1 %v5138_v22  ;;  %v1632_v34 = vpop.permute.xlu1 %1631 }
 0x306   :  { %v1646_v59 = vsel %vm4229_vm2, %v1632_v34, %v1619_v7  ;;  %1859 = vperm.xlu1 %2221, %v3304_v25  }
 0x307   :  { %v1673_v47 = vsel %vm4250_vm15, %v5200_v45, %v1646_v59 }
 0x309   :  { %v1640_v9 = vpop.permute.xlu1 %1639 }
 0x30a   :  { %v1648_v22 = vsel %vm4229_vm2, %v1640_v9, %v1621_v32  ;;  %2223 = vset.pattern.permute.xlu1 %v2336_v40 }
 0x30b   :  { %1955 = vperm.xlu1 %2223, %v2247_v41  }
 0x30d   :  { %v1644_v14 = vpop.permute.xlu1 %1643 }
 0x30e   :  { %v1649_v25 = vsel %vm4229_vm2, %v1644_v14, %v1622_v27  ;;  %v1786_v14 = vsel %vm1785_vm8, 1, %v4869_v48  ;;  %vm4385_vm2 = vcmp.eq.s32.totalorder %v1844_v53, 1  ;;  %v2043_v53 = vstv %s4671_s5 }
 0x30f   :  { %1959 = vperm.xlu1 %2223, %v2246_v56   ;;  %v1676_v13 = vsel %vm4250_vm15, %v5203_v2, %v1649_v25  ;;  %v1759_v56 = vsel %vm1758_vm13, 1, %v4869_v48  ;;  %v1790_v27 = vrot.slane %v1786_v14, %v2857_v1 }
 0x310   :  { %v1763_v60 = vrot.slane %v1759_v56, %v2857_v1  ;;  %v1975_v56 = vsel %vm1974_vm14, 1, %v4869_v48 }
 0x311   :  { %vm4349_vm0 = vcmp.eq.s32.totalorder %v1790_v27, 1 }
 0x312   :  { %v1663_v44 = vpop.permute.xlu1 %1662  ;;  %vm4331_vm7 = vcmp.eq.s32.totalorder %v1763_v60, 1 }
 0x313   :  { %v1674_v46 = vsel %vm4250_vm15, %v1663_v44, %v1647_v15  ;;  %2224 = vset.pattern.permute.xlu1 %v5191_v43  ;;  %v1744_v43 = vpop.permute.xlu0 %1743 }
 0x314   :  { %1936 = vperm.xlu1 %2224, %v3766_v37   ;;  %v1701_v42 = vsel %vm4266_vm11, %v5204_v5, %v1674_v46 }
 0x316   :  { %v1667_v31 = vpop.permute.xlu1 %1666 }
 0x317   :  { %v1675_v24 = vsel %vm4250_vm15, %v1667_v31, %v1648_v22  ;;  %v4324_v7 = vpop.permute.xlu0 %894 }
 0x318   :  { %2225 = vset.pattern.permute.xlu1 %v5199_v39 }
 0x319   :  { %1982 = vperm.xlu1 %2225, %v2247_v41  }
 0x31b   :  { %v1686_v6 = vpop.permute.xlu1 %1685  ;;  %v4339_v3 = vpop.permute.xlu0 %906 }
 0x31c   :  { %v1700_v30 = vsel %vm4266_vm11, %v1686_v6, %v1673_v47 }
 0x31d   :  { %2228 = vset.pattern.permute.xlu1 %v5183_v18  ;;  %v1727_v26 = vsel %vm4290_vm6, %v1713_v8, %v1700_v30 }
 0x31e   :  { %1913 = vperm.xlu1 %2228, %v2248_v23  }
 0x31f   :  { %v1694_v54 = vpop.permute.xlu1 %1693  ;;  %v1767_v63 = vpop.permute.xlu0 %1766 }
 0x320   :  { %v1702_v55 = vsel %vm4266_vm11, %v1694_v54, %v1675_v24  ;;  %v1813_v24 = vsel %vm1812_vm9, 1, %v4869_v48 }
 0x321   :  { %v1817_v45 = vrot.slane %v1813_v24, %v2857_v1  ;;  %v5229_v24 = vld [vmem:[#allocation119_spill] sm:$0xff] }
 0x322   :  { %2229 = vset.pattern.permute.xlu1 %v2336_v40  ;;  %vm5230_vm9 = vnez %v5229_v24 }
 0x323   :  { %1963 = vperm.xlu1 %2229, %v3766_v37   ;;  %v1698_v29 = vpop.permute.xlu1 %1697  ;;  %v1779_v46 = vpop.permute.xlu0 %1778  ;;  %vm4378_vm12 = vcmp.eq.s32.totalorder %v1817_v45, 1 }
 0x324   :  { %v1703_v18 = vsel %vm4266_vm11, %v1698_v29, %v1676_v13  ;;  %vm1920_vm11 = vcmp.eq.s32.totalorder %v3681_v51, 37  ;;  %v1948_v51 = vsel %vm1947_vm4, 1, %v4869_v48 }
 0x325   :  { %v1730_v34 = vsel %vm4290_vm6, %v1725_v21, %v1703_v18 }
 0x327   :  { %2230 = vset.pattern.permute.xlu1 %v5199_v39  ;;  %v1798_v47 = vpop.permute.xlu0 %1797 }
 0x328   :  { %1990 = vperm.xlu1 %2230, %v3766_v37   ;;  %v1717_v4 = vpop.permute.xlu1 %1716  ;;  %v1736_v37 = vrot.slane %v1732_v33, %v2857_v1 }
 0x329   :  { %v1728_v10 = vsel %vm4290_vm6, %v1717_v4, %v1701_v42 }
 0x32a   :  { %vm4308_vm10 = vcmp.eq.s32.totalorder %v1736_v37, 1 }
 0x32b   :  { %v1821_v8 = vpop.permute.xlu0 %1820 }
 0x32c   :  { %2231 = vset.pattern.permute.xlu1 %v2336_v40  ;;  %v1721_v0 = vpop.permute.xlu1 %1720  ;;  %v1755_v40 = vsel %vm4308_vm10, %v1744_v43, %v1728_v10 }
 0x32d   :  { %v1729_v28 = vsel %vm4290_vm6, %v1721_v0, %v1702_v55  ;;  %1967 = vperm.xlu1 %2231, %v2248_v23  }
 0x32f   :  { %v1852_v42 = vpop.permute.xlu0 %1851 }
 0x331   :  { %2233 = vset.pattern.permute.xlu1 %v4869_v48  ;;  %v1740_v50 = vpop.permute.xlu1 %1739 }
 0x332   :  { %v1754_v57 = vsel %vm4308_vm10, %v1740_v50, %v1727_v26  ;;  %2016 = vperm.xlu1 %2233, %v2006_v52   ;;  %v2249_v52 = vld [vmem:[%s4666_s0] sm:$0x1]  ;;  %v1894_v26 = vsel %vm1893_vm1, 1, %v4869_v48 }
 0x333   :  { %v1781_v44 = vsel %vm4331_vm7, %v1767_v63, %v1754_v57  ;;  %v1906_v10 = vpop.permute.xlu0 %1905  ;;  %vm859_vm15 = vcmp.eq.s32.totalorder %v2249_v52, 30  ;;  %vm886_vm6 = vcmp.eq.s32.totalorder %v2249_v52, 31  ;;  %v5223_v63 = vld [vmem:[#allocation115_spill] sm:$0xff] }
 0x334   :  { %v860_v57 = vsel %vm859_vm15, 1, %v4869_v48  ;;  %v887_v60 = vsel %vm886_vm6, 1, %v4869_v48 }
 0x335   :  { %v1748_v17 = vpop.permute.xlu1 %1747  ;;  %v891_v27 = vrot.slane %v887_v60, %v2857_v1 }
 0x336   :  { %v1756_v32 = vsel %vm4308_vm10, %v1748_v17, %v1729_v28  ;;  %2234 = vset.pattern.permute.xlu1 %v5199_v39  ;;  %v1867_v28 = vsel %vm1866_vm5, 1, %v4869_v48  ;;  %v1898_v17 = vrot.slane %v1894_v26, %v2857_v1  ;;  %v5244_v26 = vld [vmem:[#allocation82_spill] sm:$0xff] }
 0x337   :  { %1994 = vperm.xlu1 %2234, %v2248_v23   ;;  %v4410_v0 = vpop.permute.xlu0 %1909  ;;  %v1871_v50 = vrot.slane %v1867_v28, %v2857_v1  ;;  %vm4480_vm15 = vcmp.eq.s32.totalorder %v891_v27, 1  ;;  %v5242_v28 = vld [vmem:[#allocation86_spill] sm:$0xff]  ;;  %vm5245_vm14 = vnez %v5244_v26 }
 0x338   :  { %vm4443_vm13 = vcmp.eq.s32.totalorder %v1898_v17, 1  ;;  %v5246_v17 = vld [vmem:[#allocation13_spill] sm:$0xff] }
 0x339   :  { %v1752_v20 = vpop.permute.xlu1 %1751 }
 0x33a   :  { %v1757_v59 = vsel %vm4308_vm10, %v1752_v20, %v1730_v34  ;;  %vm4430_vm10 = vcmp.eq.s32.totalorder %v1871_v50, 1  ;;  %v5243_v50 = vld [vmem:[#allocation11_spill] sm:$0xff] }
 0x33b   :  { %2235 = vset.pattern.permute.xlu1 %v4869_v48  ;;  %v4365_v12 = vsel %vm4331_vm7, %v1779_v46, %v1757_v59  ;;  %v1879_v58 = vpop.permute.xlu0 %1878  ;;  %v5228_v46 = vld [vmem:[#allocation57_spill] sm:$0xff] }
 0x33c   :  { %2026 = vperm.xlu1 %2235, %v2008_v19   ;;  %v864_v19 = vrot.slane %v860_v57, %v2857_v1 }
 0x33e   :  { %v1771_v22 = vpop.permute.xlu1 %1770  ;;  %vm4449_vm8 = vcmp.eq.s32.totalorder %v864_v19, 1 }
 0x33f   :  { %v1782_v41 = vsel %vm4331_vm7, %v1771_v22, %v1755_v40  ;;  %v4437_v59 = vpop.permute.xlu0 %1886  ;;  %v1979_v22 = vrot.slane %v1975_v56, %v2857_v1 }
 0x340   :  { %v1809_v30 = vsel %vm4349_vm0, %v1798_v47, %v1782_v41 }
 0x341   :  { %vm4470_vm5 = vcmp.eq.s32.totalorder %v1979_v22, 1  ;;  %v5252_v22 = vld [vmem:[#allocation17_spill] sm:$0xff] }
 0x342   :  { %v1775_v36 = vpop.permute.xlu1 %1774 }
 0x343   :  { %v4345_v25 = vsel %vm4331_vm7, %v1775_v36, %v1756_v32  ;;  %v1921_v32 = vsel %vm1920_vm11, 1, %v4869_v48  ;;  %v1952_v36 = vrot.slane %v1948_v51, %v2857_v1  ;;  %vm5224_vm7 = vnez %v5223_v63  ;;  %v5250_v51 = vld [vmem:[#allocation85_spill] sm:$0xff] }
 0x344   :  { %v1925_v9 = vrot.slane %v1921_v32, %v2857_v1  ;;  %v5247_v32 = vld [vmem:[#allocation84_spill] sm:$0xff]  ;;  %vm5251_vm6 = vnez %v5250_v51 }
 0x345   :  { %vm4476_vm1 = vcmp.eq.s32.totalorder %v1952_v36, 1  ;;  %vm5248_vm4 = vnez %v5247_v32  ;;  %v5272_v32 = vld [vmem:[#allocation31_spill] sm:$0xff] }
 0x346   :  { %vm4464_vm3 = vcmp.eq.s32.totalorder %v1925_v9, 1 }
 0x347   :  { %v1794_v15 = vpop.permute.xlu1 %1793 }
 0x348   :  { %v1808_v35 = vsel %vm4349_vm0, %v1794_v15, %v1781_v44  ;;  %v5225_v44 = vld [vmem:[#allocation116_spill] sm:$0xff]  ;;  %v5226_v15 = vld [vmem:[#allocation117_spill] sm:$0xff] }
 0x349   :  { %v4393_v13 = vsel %vm4378_vm12, %v1821_v8, %v1808_v35  ;;  %v5227_v35 = vsel %vm5224_vm7, %v5225_v44, %v5226_v15  ;;  %v5237_v8 = vmov 0  ;;  %v5255_v15 = vld [vmem:[#allocation20_spill] sm:$0xff] }
 0x34a   :  { %v856_v45 = vsel %vm5230_vm9, %v5228_v46, %v5227_v35  ;;  %v5238_v8 = vsel %vm4480_vm15, 4294967295, %v5237_v8  ;;  %v5256_v35 = vld [vmem:[#allocation89_spill] sm:$0xff] }
 0x34b   :  { %v4356_v62 = vpop.permute.xlu1 %1801  ;;  %v883_v47 = vsel %vm4449_vm8, %v4300_v61, %v856_v45  ;;  %v5258_v45 = vld [vmem:[#allocation22_spill] sm:$0xff] }
 0x34c   :  { %v1810_v31 = vsel %vm4349_vm0, %v4356_v62, %v4345_v25 }
 0x34f   :  { %v4367_v39 = vpop.permute.xlu1 %1805 }
 0x350   :  { %v1811_v6 = vsel %vm4349_vm0, %v4367_v39, %v4365_v12 }
 0x354   :  { %v1825_v23 = vpop.permute.xlu1 %1824 }
 0x355   :  { %v1836_v55 = vsel %vm4378_vm12, %v1825_v23, %v1809_v30  ;;  %v1987_v23 = vpop.permute.xlu0 %1986 }
 0x356   :  { %v1863_v20 = vsel %vm4385_vm2, %v1852_v42, %v1836_v55  ;;  %v5240_v42 = vld [vmem:[#allocation80_spill] sm:$0xff] }
 0x357   :  { %v1890_v40 = vsel %vm4430_vm10, %v1879_v58, %v1863_v20  ;;  %vm5241_vm11 = vnez %v5240_v42  ;;  %v5249_v20 = vld [vmem:[#allocation16_spill] sm:$0xff]  ;;  %v5268_v42 = vld [vmem:[#allocation66_spill] sm:$0xff] }
 0x358   :  { %v1917_v1 = vsel %vm4443_vm13, %v1906_v10, %v1890_v40  ;;  %v5253_v40 = vld [vmem:[#allocation88_spill] sm:$0xff] }
 0x359   :  { %v4389_v2 = vpop.permute.xlu1 %1847  ;;  %v1929_v44 = vpop.permute.xlu0 %1928 }
 0x35a   :  { %v1862_v18 = vsel %vm4385_vm2, %v4389_v2, %v4393_v13  ;;  %v5239_v13 = vld [vmem:[#allocation9_spill] sm:$0xff] }
 0x35b   :  { %v74_v10 = vsel %vm5241_vm11, %v5239_v13, 0.0  ;;  %vm5254_vm11 = vnez %v5253_v40  ;;  %v5267_v13 = vld [vmem:[#allocation120_spill] sm:$0xff]  ;;  %v5279_v40 = vld [vmem:[#allocation101_spill] sm:$0xff] }
 0x35c   :  { %v101_v58 = vsel %vm5245_vm14, %v5243_v50, %v74_v10  ;;  %vm5257_vm14 = vnez %v5256_v35  ;;  %v882_v10 = vsel %vm4449_vm8, %v5268_v42, %v5267_v13  ;;  %v5270_v50 = vld [vmem:[#allocation96_spill] sm:$0xff]  ;;  %v5284_v35 = vld [vmem:[#allocation42_spill] sm:$0xff]  ;;  %v5296_v13 = vld [vmem:[#allocation59_spill] sm:$0xff] }
 0x35d   :  { %v128_v56 = vsel %vm5248_vm4, %v5246_v17, %v101_v58  ;;  %v909_v58 = vsel %vm4480_vm15, %v4324_v7, %v882_v10  ;;  %v5297_v42 = vld [vmem:[#allocation108_spill] sm:$0xff]  ;;  %v1941_v62 = vpop.permute.xlu0 %1940 }
 0x35e   :  { %v4399_v16 = vpop.permute.xlu1 %1828  ;;  %v155_v19 = vsel %vm5251_vm6, %v5249_v20, %v128_v56  ;;  %v5273_v56 = vld [vmem:[#allocation97_spill] sm:$0xff] }
 0x35f   :  { %v182_v36 = vsel %vm5254_vm11, %v5252_v22, %v155_v19  ;;  %v5275_v19 = vld [vmem:[#allocation33_spill] sm:$0xff]  ;;  %v5278_v22 = vld [vmem:[#allocation36_spill] sm:$0xff] }
 0x360   :  { %v209_v46 = vsel %vm5257_vm14, %v5255_v15, %v182_v36  ;;  %vm5271_vm14 = vnez %v5270_v50 }
 0x363   :  { %v1875_v21 = vpop.permute.xlu1 %1874 }
 0x364   :  { %v1889_v60 = vsel %vm4430_vm10, %v1875_v21, %v1862_v18  ;;  %v5262_v18 = vld [vmem:[#allocation94_spill] sm:$0xff] }
 0x365   :  { %vm5263_vm6 = vnez %v5262_v18  ;;  %v5290_v18 = vld [vmem:[#allocation50_spill] sm:$0xff] }
 0x368   :  { %v4401_v4 = vpop.permute.xlu1 %1855 }
 0x36d   :  { %v4403_v5 = vpop.permute.xlu1 %1901 }
 0x36e   :  { %v1916_v27 = vsel %vm4443_vm13, %v4403_v5, %v1889_v60  ;;  %v5276_v60 = vld [vmem:[#allocation100_spill] sm:$0xff] }
 0x372   :  { %v4405_v38 = vpop.permute.xlu1 %1832 }
 0x377   :  { %v4407_v33 = vpop.permute.xlu1 %1882 }
 0x37c   :  { %v1933_v37 = vpop.permute.xlu1 %1932 }
 0x37d   :  { %v1944_v55 = vsel %vm4464_vm3, %v1933_v37, %v1917_v1  ;;  %v910_v37 = vsel %vm4480_vm15, %v5242_v28, %v883_v47  ;;  %v5259_v47 = vld [vmem:[#allocation92_spill] sm:$0xff] }
 0x37e   :  { %vm5260_vm4 = vnez %v5259_v47  ;;  %v5287_v47 = vld [vmem:[#allocation46_spill] sm:$0xff] }
 0x37f   :  { %v236_v1 = vsel %vm5260_vm4, %v5258_v45, %v209_v46  ;;  %vm5274_vm4 = vnez %v5273_v56  ;;  %v5285_v46 = vld [vmem:[#allocation103_spill] sm:$0xff]  ;;  %v5306_v56 = vld [vmem:[#allocation49_spill] sm:$0xff] }
 0x380   :  { %vm5286_vm15 = vnez %v5285_v46  ;;  %v5317_v46 = vld [vmem:[#allocation106_spill] sm:$0xff] }
 0x381   :  { %v4423_v43 = vpop.permute.xlu1 %1859 }
 0x386   :  { %v1956_v14 = vpop.permute.xlu1 %1955 }
 0x38a   :  { %v1960_v61 = vpop.permute.xlu1 %1959 }
 0x38b   :  { %v1971_v2 = vsel %vm4476_vm1, %v1960_v61, %v1944_v55  ;;  %v1943_v55 = vsel %vm4464_vm3, %v1929_v44, %v1916_v27  ;;  %v5264_v61 = vld [vmem:[#allocation27_spill] sm:$0xff]  ;;  %v5282_v44 = vld [vmem:[#allocation102_spill] sm:$0xff] }
 0x38c   :  { %v1998_v52 = vsel %vm4470_vm5, %v1987_v23, %v1971_v2  ;;  %v5261_v23 = vld [vmem:[#allocation25_spill] sm:$0xff]  ;;  %v5265_v2 = vld [vmem:[#allocation95_spill] sm:$0xff]  ;;  %v1970_v28 = vsel %vm4476_vm1, %v1956_v14, %v1943_v55 }
 0x38d   :  { %v4497_v57 = vmul.f32 %v1998_v52, %v910_v37  ;;  %v263_v21 = vsel %vm5263_vm6, %v5261_v23, %v236_v1  ;;  %vm5266_vm11 = vnez %v5265_v2  ;;  %v5269_v52 = vld [vmem:[#allocation29_spill] sm:$0xff]  ;;  %vm5277_vm6 = vnez %v5276_v60  ;;  %v5281_v27 = vld [vmem:[#allocation39_spill] sm:$0xff]  ;;  %v5288_v1 = vld [vmem:[#allocation104_spill] sm:$0xff] }
 0x38e   :  { %v290_v5 = vsel %vm5266_vm11, %v5264_v61, %v263_v21  ;;  %vm5280_vm11 = vnez %v5279_v40  ;;  %v5291_v21 = vld [vmem:[#allocation105_spill] sm:$0xff]  ;;  %v5293_v61 = vld [vmem:[#allocation55_spill] sm:$0xff]  ;;  %v5308_v60 = vld [vmem:[#allocation78_spill] sm:$0xff] }
 0x38f   :  { %v1937_v9 = vpop.permute.xlu1 %1936  ;;  %v317_v26 = vsel %vm5271_vm14, %v5269_v52, %v290_v5  ;;  %vm5283_vm14 = vnez %v5282_v44  ;;  %v5294_v2 = vld [vmem:[#allocation47_spill] sm:$0xff]  ;;  %v5300_v52 = vld [vmem:[#allocation54_spill] sm:$0xff] }
 0x390   :  { %v344_v20 = vsel %vm5274_vm4, %v5272_v32, %v317_v26  ;;  %vm5289_vm4 = vnez %v5288_v1  ;;  %v5302_v26 = vld [vmem:[#allocation68_spill] sm:$0xff]  ;;  %v5305_v32 = vld [vmem:[#allocation74_spill] sm:$0xff]  ;;  %v5320_v1 = vld [vmem:[#allocation77_spill] sm:$0xff] }
 0x391   :  { %v371_v14 = vsel %vm5277_vm6, %v5275_v19, %v344_v20  ;;  %vm5292_vm6 = vnez %v5291_v21  ;;  %v1837_v19 = vsel %vm4378_vm12, %v4399_v16, %v1810_v31  ;;  %v5315_v31 = vld [vmem:[#allocation52_spill] sm:$0xff] }
 0x392   :  { %v398_v36 = vsel %vm5280_vm11, %v5278_v22, %v371_v14  ;;  %vm5295_vm11 = vnez %v5294_v2  ;;  %v5309_v14 = vld [vmem:[#allocation58_spill] sm:$0xff]  ;;  %v1864_v40 = vsel %vm4385_vm2, %v4401_v4, %v1837_v19  ;;  %v5321_v4 = vld [vmem:[#allocation109_spill] sm:$0xff]  ;;  %v5323_v21 = vld [vmem:[#allocation48_spill] sm:$0xff] }
 0x393   :  { %v425_v7 = vsel %vm5283_vm14, %v5281_v27, %v398_v36  ;;  %vm5298_vm14 = vnez %v5297_v42  ;;  %v5311_v36 = vld [vmem:[#allocation90_spill] sm:$0xff]  ;;  %v5312_v27 = vld [vmem:[#allocation44_spill] sm:$0xff]  ;;  %v1891_v25 = vsel %vm4430_vm10, %v4407_v33, %v1864_v40  ;;  %v5326_v2 = vld [vmem:[#allocation69_spill] sm:$0xff] }
 0x394   :  { %v1983_v37 = vpop.permute.xlu1 %1982  ;;  %v452_v45 = vsel %vm5286_vm15, %v5284_v35, %v425_v7  ;;  %vm5301_vm15 = vnez %v5300_v52  ;;  %v5314_v35 = vld [vmem:[#allocation98_spill] sm:$0xff]  ;;  %v5324_v33 = vld [vmem:[#allocation112_spill] sm:$0xff]  ;;  %v5328_v52 = vld [vmem:[#allocation87_spill] sm:$0xff] }
 0x395   :  { %v1997_v17 = vsel %vm4470_vm5, %v1983_v37, %v1970_v28  ;;  %v479_v23 = vsel %vm5289_vm4, %v5287_v47, %v452_v45  ;;  %v5299_v37 = vld [vmem:[#allocation65_spill] sm:$0xff] }
 0x396   :  { %v2001_v51 = vmul.f32 %v1997_v17, %v909_v58  ;;  %v506_v55 = vsel %vm5292_vm6, %v5290_v18, %v479_v23  ;;  %v5303_v58 = vld [vmem:[#allocation40_spill] sm:$0xff]  ;;  %vm5307_vm6 = vnez %v5306_v56  ;;  %v5318_v45 = vld [vmem:[#allocation61_spill] sm:$0xff]  ;;  %v1918_v18 = vsel %vm4443_vm13, %v4410_v0, %v1891_v25 }
 0x397   :  { %v533_v5 = vsel %vm5295_vm11, %v5293_v61, %v506_v55  ;;  %vm5304_vm4 = vnez %v5303_v58  ;;  %vm5310_vm11 = vnez %v5309_v14  ;;  %v1945_v61 = vsel %vm4464_vm3, %v1937_v9, %v1918_v18  ;;  %v2012_v9 = vpop.permute.xlu0 %2011  ;;  %v5332_v56 = vld [vmem:[#allocation76_spill] sm:$0xff] }
 0x398   :  { %v560_v10 = vsel %vm5298_vm14, %v5296_v13, %v533_v5  ;;  %vm5313_vm14 = vnez %v5312_v27  ;;  %v1838_v0 = vsel %vm4378_vm12, %v4405_v38, %v1811_v6 }
 0x399   :  { %v1914_v15 = vpop.permute.xlu1 %1913  ;;  %v587_v50 = vsel %vm5301_vm15, %v5299_v37, %v560_v10  ;;  %vm5316_vm15 = vnez %v5315_v31  ;;  %v5327_v10 = vld [vmem:[#allocation83_spill] sm:$0xff]  ;;  %v1865_v24 = vsel %vm4385_vm2, %v4423_v43, %v1838_v0 }
 0x39a   :  { %v614_v17 = vsel %vm5304_vm4, %v5302_v26, %v587_v50  ;;  %vm5319_vm4 = vnez %v5318_v45  ;;  %v1892_v6 = vsel %vm4430_vm10, %v4437_v59, %v1865_v24  ;;  %v2029_v50 = vmul.f32 %v2012_v9, %v2001_v51 }
 0x39b   :  { %v641_v20 = vsel %vm5307_vm6, %v5305_v32, %v614_v17  ;;  %vm5322_vm6 = vnez %v5321_v4  ;;  %v2022_v54 = vpop.permute.xlu0 %2021  ;;  %v1919_v26 = vsel %vm4443_vm13, %v1914_v15, %v1892_v6  ;;  %v5331_v32 = vld [vmem:[#allocation121_spill] sm:$0xff] }
 0x39c   :  { %v668_v22 = vsel %vm5310_vm11, %v5308_v60, %v641_v20  ;;  %vm5325_vm11 = vnez %v5324_v33  ;;  %v1946_v43 = vsel %vm4464_vm3, %v1941_v62, %v1919_v26  ;;  %v885_v20 = vsel %vm4449_vm8, %v5332_v56, %v5331_v32 }
 0x39d   :  { %v695_v44 = vsel %vm5313_vm14, %v5311_v36, %v668_v22 }
 0x39e   :  { %v1964_v28 = vpop.permute.xlu1 %1963  ;;  %v722_v16 = vsel %vm5316_vm15, %v5314_v35, %v695_v44 }
 0x39f   :  { %v749_v47 = vsel %vm5319_vm4, %v5317_v46, %v722_v16  ;;  %v1972_v13 = vsel %vm4476_vm1, %v1964_v28, %v1945_v61 }
 0x3a0   :  { %v776_v23 = vsel %vm5322_vm6, %v5320_v1, %v749_v47 }
 0x3a1   :  { %v803_v55 = vsel %vm5325_vm11, %v5323_v21, %v776_v23 }
 0x3a2   :  { %v830_v5 = vsel %vm5224_vm7, %v5326_v2, %v803_v55  ;;  %vm5330_vm7 = vnez %v5238_v8 }
 0x3a3   :  { %v1991_v7 = vpop.permute.xlu1 %1990  ;;  %v857_v37 = vsel %vm5230_vm9, %v5327_v10, %v830_v5  ;;  %v912_v41 = vsel %vm5330_vm7, %v4339_v3, %v885_v20 }
 0x3a4   :  { %v1999_v63 = vsel %vm4470_vm5, %v1991_v7, %v1972_v13  ;;  %v884_v28 = vsel %vm4449_vm8, %v5328_v52, %v857_v37 }
 0x3a5   :  { %v911_v12 = vsel %vm5330_vm7, %v5329_v11, %v884_v28 }
 0x3a6   :  { %v2003_v39 = vmul.f32 %v1999_v63, %v911_v12 }
 0x3a8   :  { %v1968_v42 = vpop.permute.xlu1 %1967  ;;  %v2031_v17 = vmul.f32 %v2022_v54, %v2003_v39 }
 0x3a9   :  { %v1973_v34 = vsel %vm4476_vm1, %v1968_v42, %v1946_v43 }
 0x3ad   :  { %v2017_v38 = vpop.permute.xlu1 %2016 }
 0x3ae   :  { %v2030_v58 = vmul.f32 %v2017_v38, %v4497_v57 }
 0x3b0   :  { %v2033_v29 = vadd.f32 %v2030_v58, %v2029_v50 }
 0x3b2   :  { %v1995_v59 = vpop.permute.xlu1 %1994  ;;  %v2034_v51 = vadd.f32 %v2033_v29, %v2031_v17 }
 0x3b3   :  { %v2000_v57 = vsel %vm4470_vm5, %v1995_v59, %v1973_v34 }
 0x3b4   :  { %v2004_v15 = vmul.f32 %v2000_v57, %v912_v41 }
 0x3b7   :  { %v2027_v49 = vpop.permute.xlu1 %2026 }
 0x3b8   :  { %v2032_v19 = vmul.f32 %v2027_v49, %v2004_v15 }
 0x3ba   :  { %v2035_v60 = vadd.f32 %v2034_v51, %v2032_v19 }
 0x3bc   :  { %v2036_v14 = vrot.slane %v2035_v60, 4 }
 0x3be   :  { %v2037_v22 = vadd.f32 %v2036_v14, %v2035_v60 }
 0x3c0   :  { %v2038_v48 = vrot.slane %v2037_v22, 2 }
 0x3c2   :  { %v2039_v40 = vadd.f32 %v2038_v48, %v2037_v22 }
 0x3c4   :  { %v2040_v36 = vrot.slane %v2039_v40, 1 }
 0x3c6   :  { %v2041_v27 = vadd.f32 %v2040_v36, %v2039_v40 }
 0x3c8   :  { %v2044_v44 = vadd.f32 %v2043_v53, %v2041_v27 }
 0x3ca   :  { %v2045_v8 = vsub.f32 0.0, %v2044_v44 }
 0x3cc   :  { %v2046_v3 = vmul.f32 1.442695, %v2045_v8 }
 0x3ce   :  { %2236 = vpow2.f32 %v2046_v3 }
 0x3db   :  { %v2237_v30 = vpop.eup %2236 }
 0x3dc   :  { %v2048_v25 = vadd.f32 1.0, %v2237_v30 }
 0x3de   :  { %2238 = vrcp.f32 %v2048_v25 }
 0x3eb   :  { %v2239_v62 = vpop.eup %2238 }
 0x3ec   :  { %2051 = vst [vmem:[#allocation6] sm:$0x1] %v2239_v62 }
 0x3ed   :  { %2281 = shalt.err (!%p2278_p9)
}
 0x3ee   :  { %2061 = dma.vmem_to_hbm [thread:$0]  %s2059_s28, 16, %s4672_s6, [#allocation5]  }
 0x3ef   :  { %2292 = dma.done.wait [#allocation5], 16  }
 0x3f0   :  { %2293 = vsyncadd [#allocation5], 4294967280 }
 0x3f1   :  { %2065 = vsyncpa [#allocation4], 1 }
 0x3f2   :  { %2066 = vsyncpa [#allocation5], 1 }

</bundles_post_ra>
